<compile_context>
chip_gen: v7x
topology: tpu7x:2x2x1
jax: 0.10.0
libtpu: 0.0.40
codegen_flags: <defaults>
</compile_context>

<pallas_src>
import functools

import jax
import jax.numpy as jnp
import numpy as np
from jax.experimental import pallas as pl
from jax.experimental.pallas import tpu as pltpu


SQUARE_K = 3    # square_kernel_size
BAND_K = 11     # band_kernel_size
PAD_SQ = (SQUARE_K - 1) // 2    # = 1   (get_padding, dilation=1)
PAD_BAND = (BAND_K - 1) // 2    # = 5


def _inception_dw_kernel(x_ref, w_hw_ref, b_hw_ref, w_w_ref, b_w_ref,
                         w_h_ref, b_h_ref, o_ref, pad_ref, *, gc, H, W):
    """Grid = (batch, branch).  One step = all gc channels of one branch."""
    br = pl.program_id(1)

    # ---- in-kernel zero padding ---------------------------------------
    # Zero the (gc, H+2*PAD_BAND, W+2*PAD_BAND) scratch every step (safe under
    # megacore sharding) and drop the unpadded input block into its centre.
    # All three branches read their shifted taps from this scratch.
    pad_ref[...] = jnp.zeros_like(pad_ref)
    pad_ref[:, PAD_BAND:PAD_BAND + H, PAD_BAND:PAD_BAND + W] = x_ref[0]

    off = PAD_BAND - PAD_SQ   # halo offset of the 3x3 branch inside the scratch

    # ---- branch 0: square depthwise conv (3 x 3) ----------------------
    @pl.when(br == 0)
    def _square():
        for c in range(gc):
            acc = jnp.full((H, W), b_hw_ref[c], jnp.float32)   # bias folded in
            for ki in range(SQUARE_K):
                for kj in range(SQUARE_K):
                    w = w_hw_ref[c * SQUARE_K * SQUARE_K + ki * SQUARE_K + kj]
                    acc = acc + w * pad_ref[c,
                                            off + ki: off + ki + H,
                                            off + kj: off + kj + W]
            o_ref[0, c] = acc.astype(o_ref.dtype)

    # ---- branch 1: width-band depthwise conv (1 x 11) ------------------
    @pl.when(br == 1)
    def _band_w():
        for c in range(gc):
            acc = jnp.full((H, W), b_w_ref[c], jnp.float32)
            for kj in range(BAND_K):
                w = w_w_ref[c * BAND_K + kj]
                acc = acc + w * pad_ref[c, PAD_BAND:PAD_BAND + H, kj:kj + W]
            o_ref[0, c] = acc.astype(o_ref.dtype)

    # ---- branch 2: height-band depthwise conv (11 x 1) -----------------
    @pl.when(br == 2)
    def _band_h():
        for c in range(gc):
            acc = jnp.full((H, W), b_h_ref[c], jnp.float32)
            for ki in range(BAND_K):
                w = w_h_ref[c * BAND_K + ki]
                acc = acc + w * pad_ref[c, ki:ki + H, PAD_BAND:PAD_BAND + W]
            o_ref[0, c] = acc.astype(o_ref.dtype)


def init_params(key, in_chs, branch_ratio=0.125):
    gc = int(in_chs * branch_ratio)
    ks = jax.random.split(key, 6)
    return {
        "w_hw": jax.random.normal(ks[0], (gc, 1, SQUARE_K, SQUARE_K), jnp.float32) * 0.1,
        "b_hw": jax.random.normal(ks[1], (gc,), jnp.float32) * 0.1,
        "w_w": jax.random.normal(ks[2], (gc, 1, 1, BAND_K), jnp.float32) * 0.1,
        "b_w": jax.random.normal(ks[3], (gc,), jnp.float32) * 0.1,
        "w_h": jax.random.normal(ks[4], (gc, 1, BAND_K, 1), jnp.float32) * 0.1,
        "b_h": jax.random.normal(ks[5], (gc,), jnp.float32) * 0.1,
    }


@jax.jit
def inception_dwconv2d(x, params):
    """x: (N, C, H, W) float32, NCHW layout (matches PyTorch Conv2d)."""
    N, C, H, W = x.shape
    gc = params["w_hw"].shape[0]
    if gc == 0:                      # degenerate split: module is identity
        return x
    c_id = C - 3 * gc

    # Flatten depthwise weights to 1-D for cheap, unpadded SMEM scalar reads.
    w_hw = params["w_hw"].reshape(-1).astype(jnp.float32)
    w_w = params["w_w"].reshape(-1).astype(jnp.float32)
    w_h = params["w_h"].reshape(-1).astype(jnp.float32)
    b_hw = params["b_hw"].astype(jnp.float32)
    b_w = params["b_w"].astype(jnp.float32)
    b_h = params["b_h"].astype(jnp.float32)

    smem = pl.BlockSpec(memory_space=pltpu.MemorySpace.SMEM)
    kernel = functools.partial(_inception_dw_kernel, gc=gc, H=H, W=W)

    aligned = (c_id % gc) == 0       # true for the standard branch_ratio=1/8 configs

    if aligned:
        # Fast path: read conv channels straight from x, write branch results
        # in place into a full-size output aliased to x (identity channels are
        # never touched -> no concat, no extra HBM traffic).
        c_base = c_id // gc
        x_in = x
        in_spec_x = pl.BlockSpec((1, gc, H, W), lambda n, b: (n, c_base + b, 0, 0))
        out_spec = pl.BlockSpec((1, gc, H, W), lambda n, b: (n, c_base + b, 0, 0))
        out_shape = jax.ShapeDtypeStruct((N, C, H, W), x.dtype)
        io_aliases = {0: 0}
    else:
        # Fallback: fused 3-branch output + a single concat with the identity part.
        x_in = x[:, c_id:]
        in_spec_x = pl.BlockSpec((1, gc, H, W), lambda n, b: (n, b, 0, 0))
        out_spec = pl.BlockSpec((1, gc, H, W), lambda n, b: (n, b, 0, 0))
        out_shape = jax.ShapeDtypeStruct((N, 3 * gc, H, W), x.dtype)
        io_aliases = {}

    out = pl.pallas_call(
        kernel,
        grid=(N, 3),
        in_specs=[in_spec_x, smem, smem, smem, smem, smem, smem],
        out_specs=out_spec,
        out_shape=out_shape,
        scratch_shapes=[
            pltpu.VMEM((gc, H + 2 * PAD_BAND, W + 2 * PAD_BAND), jnp.float32),
        ],
        input_output_aliases=io_aliases,
        compiler_params=pltpu.CompilerParams(
            dimension_semantics=("parallel", "parallel")),
    )(x_in, w_hw, b_hw, w_w, b_w, w_h, b_h)

    if aligned:
        return out
    return jnp.concatenate([x[:, :c_id], out], axis=1)


# ---------------------------- reference ----------------------------------

def _ref_depthwise(x, w, b, pad):
    out = jax.lax.conv_general_dilated(
        x, w, window_strides=(1, 1), padding=pad,
        dimension_numbers=("NCHW", "OIHW", "NCHW"),
        feature_group_count=x.shape[1])
    return out + b[None, :, None, None]


def _reference(x, params):
    gc = params["w_hw"].shape[0]
    c_id = x.shape[1] - 3 * gc
    x_id = x[:, :c_id]
    x_hw = x[:, c_id:c_id + gc]
    x_w = x[:, c_id + gc:c_id + 2 * gc]
    x_h = x[:, c_id + 2 * gc:]
    o_hw = _ref_depthwise(x_hw, params["w_hw"], params["b_hw"],
                          [(PAD_SQ, PAD_SQ), (PAD_SQ, PAD_SQ)])
    o_w = _ref_depthwise(x_w, params["w_w"], params["b_w"],
                         [(0, 0), (PAD_BAND, PAD_BAND)])
    o_h = _ref_depthwise(x_h, params["w_h"], params["b_h"],
                         [(PAD_BAND, PAD_BAND), (0, 0)])
    return jnp.concatenate([x_id, o_hw, o_w, o_h], axis=1)


if __name__ == "__main__":
    key = jax.random.PRNGKey(0)
    k_x, k_p = jax.random.split(key)

    N, C, H, W = 2, 32, 16, 16       # gc = 32 * 0.125 = 4, split = (20, 4, 4, 4)
    x = jax.random.normal(k_x, (N, C, H, W), jnp.float32)
    params = init_params(k_p, C)

    out = jax.block_until_ready(inception_dwconv2d(x, params))
    ref = jax.block_until_ready(_reference(x, params))

    assert out.shape == (N, C, H, W)
    np.testing.assert_allclose(np.asarray(out), np.asarray(ref), atol=1e-4, rtol=1e-4)

    print("KERNEL_OK")
</pallas_src>

<mosaic_0001>
module attributes {stable_mosaic.version = 11 : i64} {
  func.func @_inception_dw_kernel(%arg0: i32, %arg1: i32, %arg2: memref<1x4x16x16xf32, #tpu.memory_space<vmem>>, %arg3: memref<36xf32, #tpu.memory_space<smem>>, %arg4: memref<4xf32, #tpu.memory_space<smem>>, %arg5: memref<44xf32, #tpu.memory_space<smem>>, %arg6: memref<4xf32, #tpu.memory_space<smem>>, %arg7: memref<44xf32, #tpu.memory_space<smem>>, %arg8: memref<4xf32, #tpu.memory_space<smem>>, %arg9: memref<1x4x16x16xf32, #tpu.memory_space<vmem>>, %arg10: memref<4x26x26xf32, #tpu.memory_space<vmem>>) attributes {dimension_semantics = [#tpu.dimension_semantics<parallel>, #tpu.dimension_semantics<parallel>], iteration_bounds = array<i64: 2, 3>, scalar_prefetch = 0 : i64, scratch_operands = 1 : i64, tpu.core_type = #tpu.core_type<tc>, window_params = [{transform_indices = @transform_0, window_bounds = array<i64: 1, 4, 16, 16>}, {transform_indices = @transform_1, window_bounds = array<i64: 36>}, {transform_indices = @transform_2, window_bounds = array<i64: 4>}, {transform_indices = @transform_3, window_bounds = array<i64: 44>}, {transform_indices = @transform_4, window_bounds = array<i64: 4>}, {transform_indices = @transform_5, window_bounds = array<i64: 44>}, {transform_indices = @transform_6, window_bounds = array<i64: 4>}, {transform_indices = @transform_7, window_bounds = array<i64: 1, 4, 16, 16>}]} {
    %cst = arith.constant 0.000000e+00 : f32
    %0 = vector.broadcast %cst : f32 to vector<4x26x26xf32>
    %c0 = arith.constant 0 : index
    %c0_0 = arith.constant 0 : index
    %c0_1 = arith.constant 0 : index
    %1 = vector.load %arg10[%c0, %c0_0, %c0_1] : memref<4x26x26xf32, #tpu.memory_space<vmem>>, vector<4x26x26xf32>
    tpu.vector_store %arg10[%c0, %c0_0, %c0_1], %0 {strides = array<i32>} : memref<4x26x26xf32, #tpu.memory_space<vmem>>, vector<4x26x26xf32>,
    %c0_2 = arith.constant 0 : index
    %c0_3 = arith.constant 0 : index
    %c0_4 = arith.constant 0 : index
    %c0_5 = arith.constant 0 : index
    %2 = vector.load %arg2[%c0_2, %c0_3, %c0_4, %c0_5] : memref<1x4x16x16xf32, #tpu.memory_space<vmem>>, vector<1x4x16x16xf32>
    %3 = vector.shape_cast %2 : vector<1x4x16x16xf32> to vector<4x16x16xf32>
    %c0_6 = arith.constant 0 : index
    %c5 = arith.constant 5 : index
    %c5_7 = arith.constant 5 : index
    %4 = vector.load %arg10[%c0_6, %c5, %c5_7] : memref<4x26x26xf32, #tpu.memory_space<vmem>>, vector<4x16x16xf32>
    tpu.vector_store %arg10[%c0_6, %c5, %c5_7], %3 {strides = array<i32>} : memref<4x26x26xf32, #tpu.memory_space<vmem>>, vector<4x16x16xf32>,
    %c0_i32 = arith.constant 0 : i32
    %5 = arith.cmpi eq, %arg1, %c0_i32 : i32
    %6 = arith.extui %5 : i1 to i32
    %c0_i32_8 = arith.constant 0 : i32
    %7 = arith.cmpi ne, %6, %c0_i32_8 : i32
    scf.if %7 {
      %c0_11 = arith.constant 0 : index
      %14 = memref.load %arg4[%c0_11] : memref<4xf32, #tpu.memory_space<smem>>
      %15 = vector.broadcast %14 : f32 to vector<16x16xf32>
      %c0_12 = arith.constant 0 : index
      %16 = memref.load %arg3[%c0_12] : memref<36xf32, #tpu.memory_space<smem>>
      %c0_13 = arith.constant 0 : index
      %c4 = arith.constant 4 : index
      %c4_14 = arith.constant 4 : index
      %17 = vector.load %arg10[%c0_13, %c4, %c4_14] : memref<4x26x26xf32, #tpu.memory_space<vmem>>, vector<1x16x16xf32>
      %18 = vector.shape_cast %17 : vector<1x16x16xf32> to vector<16x16xf32>
      %19 = vector.broadcast %16 : f32 to vector<16x16xf32>
      %20 = arith.mulf %19, %18 : vector<16x16xf32>
      %21 = arith.addf %15, %20 : vector<16x16xf32>
      %c1 = arith.constant 1 : index
      %22 = memref.load %arg3[%c1] : memref<36xf32, #tpu.memory_space<smem>>
      %c0_15 = arith.constant 0 : index
      %c4_16 = arith.constant 4 : index
      %c5_17 = arith.constant 5 : index
      %23 = vector.load %arg10[%c0_15, %c4_16, %c5_17] : memref<4x26x26xf32, #tpu.memory_space<vmem>>, vector<1x16x16xf32>
      %24 = vector.shape_cast %23 : vector<1x16x16xf32> to vector<16x16xf32>
      %25 = vector.broadcast %22 : f32 to vector<16x16xf32>
      %26 = arith.mulf %25, %24 : vector<16x16xf32>
      %27 = arith.addf %21, %26 : vector<16x16xf32>
      %c2 = arith.constant 2 : index
      %28 = memref.load %arg3[%c2] : memref<36xf32, #tpu.memory_space<smem>>
      %c0_18 = arith.constant 0 : index
      %c4_19 = arith.constant 4 : index
      %c6 = arith.constant 6 : index
      %29 = vector.load %arg10[%c0_18, %c4_19, %c6] : memref<4x26x26xf32, #tpu.memory_space<vmem>>, vector<1x16x16xf32>
      %30 = vector.shape_cast %29 : vector<1x16x16xf32> to vector<16x16xf32>
      %31 = vector.broadcast %28 : f32 to vector<16x16xf32>
      %32 = arith.mulf %31, %30 : vector<16x16xf32>
      %33 = arith.addf %27, %32 : vector<16x16xf32>
      %c3 = arith.constant 3 : index
      %34 = memref.load %arg3[%c3] : memref<36xf32, #tpu.memory_space<smem>>
      %c0_20 = arith.constant 0 : index
      %c5_21 = arith.constant 5 : index
      %c4_22 = arith.constant 4 : index
      %35 = vector.load %arg10[%c0_20, %c5_21, %c4_22] : memref<4x26x26xf32, #tpu.memory_space<vmem>>, vector<1x16x16xf32>
      %36 = vector.shape_cast %35 : vector<1x16x16xf32> to vector<16x16xf32>
      %37 = vector.broadcast %34 : f32 to vector<16x16xf32>
      %38 = arith.mulf %37, %36 : vector<16x16xf32>
      %39 = arith.addf %33, %38 : vector<16x16xf32>
      %c4_23 = arith.constant 4 : index
      %40 = memref.load %arg3[%c4_23] : memref<36xf32, #tpu.memory_space<smem>>
      %c0_24 = arith.constant 0 : index
      %c5_25 = arith.constant 5 : index
      %c5_26 = arith.constant 5 : index
      %41 = vector.load %arg10[%c0_24, %c5_25, %c5_26] : memref<4x26x26xf32, #tpu.memory_space<vmem>>, vector<1x16x16xf32>
      %42 = vector.shape_cast %41 : vector<1x16x16xf32> to vector<16x16xf32>
      %43 = vector.broadcast %40 : f32 to vector<16x16xf32>
      %44 = arith.mulf %43, %42 : vector<16x16xf32>
      %45 = arith.addf %39, %44 : vector<16x16xf32>
      %c5_27 = arith.constant 5 : index
      %46 = memref.load %arg3[%c5_27] : memref<36xf32, #tpu.memory_space<smem>>
      %c0_28 = arith.constant 0 : index
      %c5_29 = arith.constant 5 : index
      %c6_30 = arith.constant 6 : index
      %47 = vector.load %arg10[%c0_28, %c5_29, %c6_30] : memref<4x26x26xf32, #tpu.memory_space<vmem>>, vector<1x16x16xf32>
      %48 = vector.shape_cast %47 : vector<1x16x16xf32> to vector<16x16xf32>
      %49 = vector.broadcast %46 : f32 to vector<16x16xf32>
      %50 = arith.mulf %49, %48 : vector<16x16xf32>
      %51 = arith.addf %45, %50 : vector<16x16xf32>
      %c6_31 = arith.constant 6 : index
      %52 = memref.load %arg3[%c6_31] : memref<36xf32, #tpu.memory_space<smem>>
      %c0_32 = arith.constant 0 : index
      %c6_33 = arith.constant 6 : index
      %c4_34 = arith.constant 4 : index
      %53 = vector.load %arg10[%c0_32, %c6_33, %c4_34] : memref<4x26x26xf32, #tpu.memory_space<vmem>>, vector<1x16x16xf32>
      %54 = vector.shape_cast %53 : vector<1x16x16xf32> to vector<16x16xf32>
      %55 = vector.broadcast %52 : f32 to vector<16x16xf32>
      %56 = arith.mulf %55, %54 : vector<16x16xf32>
      %57 = arith.addf %51, %56 : vector<16x16xf32>
      %c7 = arith.constant 7 : index
      %58 = memref.load %arg3[%c7] : memref<36xf32, #tpu.memory_space<smem>>
      %c0_35 = arith.constant 0 : index
      %c6_36 = arith.constant 6 : index
      %c5_37 = arith.constant 5 : index
      %59 = vector.load %arg10[%c0_35, %c6_36, %c5_37] : memref<4x26x26xf32, #tpu.memory_space<vmem>>, vector<1x16x16xf32>
      %60 = vector.shape_cast %59 : vector<1x16x16xf32> to vector<16x16xf32>
      %61 = vector.broadcast %58 : f32 to vector<16x16xf32>
      %62 = arith.mulf %61, %60 : vector<16x16xf32>
      %63 = arith.addf %57, %62 : vector<16x16xf32>
      %c8 = arith.constant 8 : index
      %64 = memref.load %arg3[%c8] : memref<36xf32, #tpu.memory_space<smem>>
      %c0_38 = arith.constant 0 : index
      %c6_39 = arith.constant 6 : index
      %c6_40 = arith.constant 6 : index
      %65 = vector.load %arg10[%c0_38, %c6_39, %c6_40] : memref<4x26x26xf32, #tpu.memory_space<vmem>>, vector<1x16x16xf32>
      %66 = vector.shape_cast %65 : vector<1x16x16xf32> to vector<16x16xf32>
      %67 = vector.broadcast %64 : f32 to vector<16x16xf32>
      %68 = arith.mulf %67, %66 : vector<16x16xf32>
      %69 = arith.addf %63, %68 : vector<16x16xf32>
      %c0_41 = arith.constant 0 : index
      %c0_42 = arith.constant 0 : index
      %c0_43 = arith.constant 0 : index
      %c0_44 = arith.constant 0 : index
      %70 = vector.load %arg9[%c0_41, %c0_42, %c0_43, %c0_44] : memref<1x4x16x16xf32, #tpu.memory_space<vmem>>, vector<1x1x16x16xf32>
      %71 = vector.shape_cast %70 : vector<1x1x16x16xf32> to vector<16x16xf32>
      %72 = vector.shape_cast %69 : vector<16x16xf32> to vector<1x1x16x16xf32>
      tpu.vector_store %arg9[%c0_41, %c0_42, %c0_43, %c0_44], %72 {strides = array<i32>} : memref<1x4x16x16xf32, #tpu.memory_space<vmem>>, vector<1x1x16x16xf32>,
      %c1_45 = arith.constant 1 : index
      %73 = memref.load %arg4[%c1_45] : memref<4xf32, #tpu.memory_space<smem>>
      %74 = vector.broadcast %73 : f32 to vector<16x16xf32>
      %c9 = arith.constant 9 : index
      %75 = memref.load %arg3[%c9] : memref<36xf32, #tpu.memory_space<smem>>
      %c1_46 = arith.constant 1 : index
      %c4_47 = arith.constant 4 : index
      %c4_48 = arith.constant 4 : index
      %76 = vector.load %arg10[%c1_46, %c4_47, %c4_48] : memref<4x26x26xf32, #tpu.memory_space<vmem>>, vector<1x16x16xf32>
      %77 = vector.shape_cast %76 : vector<1x16x16xf32> to vector<16x16xf32>
      %78 = vector.broadcast %75 : f32 to vector<16x16xf32>
      %79 = arith.mulf %78, %77 : vector<16x16xf32>
      %80 = arith.addf %74, %79 : vector<16x16xf32>
      %c10 = arith.constant 10 : index
      %81 = memref.load %arg3[%c10] : memref<36xf32, #tpu.memory_space<smem>>
      %c1_49 = arith.constant 1 : index
      %c4_50 = arith.constant 4 : index
      %c5_51 = arith.constant 5 : index
      %82 = vector.load %arg10[%c1_49, %c4_50, %c5_51] : memref<4x26x26xf32, #tpu.memory_space<vmem>>, vector<1x16x16xf32>
      %83 = vector.shape_cast %82 : vector<1x16x16xf32> to vector<16x16xf32>
      %84 = vector.broadcast %81 : f32 to vector<16x16xf32>
      %85 = arith.mulf %84, %83 : vector<16x16xf32>
      %86 = arith.addf %80, %85 : vector<16x16xf32>
      %c11 = arith.constant 11 : index
      %87 = memref.load %arg3[%c11] : memref<36xf32, #tpu.memory_space<smem>>
      %c1_52 = arith.constant 1 : index
      %c4_53 = arith.constant 4 : index
      %c6_54 = arith.constant 6 : index
      %88 = vector.load %arg10[%c1_52, %c4_53, %c6_54] : memref<4x26x26xf32, #tpu.memory_space<vmem>>, vector<1x16x16xf32>
      %89 = vector.shape_cast %88 : vector<1x16x16xf32> to vector<16x16xf32>
      %90 = vector.broadcast %87 : f32 to vector<16x16xf32>
      %91 = arith.mulf %90, %89 : vector<16x16xf32>
      %92 = arith.addf %86, %91 : vector<16x16xf32>
      %c12 = arith.constant 12 : index
      %93 = memref.load %arg3[%c12] : memref<36xf32, #tpu.memory_space<smem>>
      %c1_55 = arith.constant 1 : index
      %c5_56 = arith.constant 5 : index
      %c4_57 = arith.constant 4 : index
      %94 = vector.load %arg10[%c1_55, %c5_56, %c4_57] : memref<4x26x26xf32, #tpu.memory_space<vmem>>, vector<1x16x16xf32>
      %95 = vector.shape_cast %94 : vector<1x16x16xf32> to vector<16x16xf32>
      %96 = vector.broadcast %93 : f32 to vector<16x16xf32>
      %97 = arith.mulf %96, %95 : vector<16x16xf32>
      %98 = arith.addf %92, %97 : vector<16x16xf32>
      %c13 = arith.constant 13 : index
      %99 = memref.load %arg3[%c13] : memref<36xf32, #tpu.memory_space<smem>>
      %c1_58 = arith.constant 1 : index
      %c5_59 = arith.constant 5 : index
      %c5_60 = arith.constant 5 : index
      %100 = vector.load %arg10[%c1_58, %c5_59, %c5_60] : memref<4x26x26xf32, #tpu.memory_space<vmem>>, vector<1x16x16xf32>
      %101 = vector.shape_cast %100 : vector<1x16x16xf32> to vector<16x16xf32>
      %102 = vector.broadcast %99 : f32 to vector<16x16xf32>
      %103 = arith.mulf %102, %101 : vector<16x16xf32>
      %104 = arith.addf %98, %103 : vector<16x16xf32>
      %c14 = arith.constant 14 : index
      %105 = memref.load %arg3[%c14] : memref<36xf32, #tpu.memory_space<smem>>
      %c1_61 = arith.constant 1 : index
      %c5_62 = arith.constant 5 : index
      %c6_63 = arith.constant 6 : index
      %106 = vector.load %arg10[%c1_61, %c5_62, %c6_63] : memref<4x26x26xf32, #tpu.memory_space<vmem>>, vector<1x16x16xf32>
      %107 = vector.shape_cast %106 : vector<1x16x16xf32> to vector<16x16xf32>
      %108 = vector.broadcast %105 : f32 to vector<16x16xf32>
      %109 = arith.mulf %108, %107 : vector<16x16xf32>
      %110 = arith.addf %104, %109 : vector<16x16xf32>
      %c15 = arith.constant 15 : index
      %111 = memref.load %arg3[%c15] : memref<36xf32, #tpu.memory_space<smem>>
      %c1_64 = arith.constant 1 : index
      %c6_65 = arith.constant 6 : index
      %c4_66 = arith.constant 4 : index
      %112 = vector.load %arg10[%c1_64, %c6_65, %c4_66] : memref<4x26x26xf32, #tpu.memory_space<vmem>>, vector<1x16x16xf32>
      %113 = vector.shape_cast %112 : vector<1x16x16xf32> to vector<16x16xf32>
      %114 = vector.broadcast %111 : f32 to vector<16x16xf32>
      %115 = arith.mulf %114, %113 : vector<16x16xf32>
      %116 = arith.addf %110, %115 : vector<16x16xf32>
      %c16 = arith.constant 16 : index
      %117 = memref.load %arg3[%c16] : memref<36xf32, #tpu.memory_space<smem>>
      %c1_67 = arith.constant 1 : index
      %c6_68 = arith.constant 6 : index
      %c5_69 = arith.constant 5 : index
      %118 = vector.load %arg10[%c1_67, %c6_68, %c5_69] : memref<4x26x26xf32, #tpu.memory_space<vmem>>, vector<1x16x16xf32>
      %119 = vector.shape_cast %118 : vector<1x16x16xf32> to vector<16x16xf32>
      %120 = vector.broadcast %117 : f32 to vector<16x16xf32>
      %121 = arith.mulf %120, %119 : vector<16x16xf32>
      %122 = arith.addf %116, %121 : vector<16x16xf32>
      %c17 = arith.constant 17 : index
      %123 = memref.load %arg3[%c17] : memref<36xf32, #tpu.memory_space<smem>>
      %c1_70 = arith.constant 1 : index
      %c6_71 = arith.constant 6 : index
      %c6_72 = arith.constant 6 : index
      %124 = vector.load %arg10[%c1_70, %c6_71, %c6_72] : memref<4x26x26xf32, #tpu.memory_space<vmem>>, vector<1x16x16xf32>
      %125 = vector.shape_cast %124 : vector<1x16x16xf32> to vector<16x16xf32>
      %126 = vector.broadcast %123 : f32 to vector<16x16xf32>
      %127 = arith.mulf %126, %125 : vector<16x16xf32>
      %128 = arith.addf %122, %127 : vector<16x16xf32>
      %c0_73 = arith.constant 0 : index
      %c1_74 = arith.constant 1 : index
      %c0_75 = arith.constant 0 : index
      %c0_76 = arith.constant 0 : index
      %129 = vector.load %arg9[%c0_73, %c1_74, %c0_75, %c0_76] : memref<1x4x16x16xf32, #tpu.memory_space<vmem>>, vector<1x1x16x16xf32>
      %130 = vector.shape_cast %129 : vector<1x1x16x16xf32> to vector<16x16xf32>
      %131 = vector.shape_cast %128 : vector<16x16xf32> to vector<1x1x16x16xf32>
      tpu.vector_store %arg9[%c0_73, %c1_74, %c0_75, %c0_76], %131 {strides = array<i32>} : memref<1x4x16x16xf32, #tpu.memory_space<vmem>>, vector<1x1x16x16xf32>,
      %c2_77 = arith.constant 2 : index
      %132 = memref.load %arg4[%c2_77] : memref<4xf32, #tpu.memory_space<smem>>
      %133 = vector.broadcast %132 : f32 to vector<16x16xf32>
      %c18 = arith.constant 18 : index
      %134 = memref.load %arg3[%c18] : memref<36xf32, #tpu.memory_space<smem>>
      %c2_78 = arith.constant 2 : index
      %c4_79 = arith.constant 4 : index
      %c4_80 = arith.constant 4 : index
      %135 = vector.load %arg10[%c2_78, %c4_79, %c4_80] : memref<4x26x26xf32, #tpu.memory_space<vmem>>, vector<1x16x16xf32>
      %136 = vector.shape_cast %135 : vector<1x16x16xf32> to vector<16x16xf32>
      %137 = vector.broadcast %134 : f32 to vector<16x16xf32>
      %138 = arith.mulf %137, %136 : vector<16x16xf32>
      %139 = arith.addf %133, %138 : vector<16x16xf32>
      %c19 = arith.constant 19 : index
      %140 = memref.load %arg3[%c19] : memref<36xf32, #tpu.memory_space<smem>>
      %c2_81 = arith.constant 2 : index
      %c4_82 = arith.constant 4 : index
      %c5_83 = arith.constant 5 : index
      %141 = vector.load %arg10[%c2_81, %c4_82, %c5_83] : memref<4x26x26xf32, #tpu.memory_space<vmem>>, vector<1x16x16xf32>
      %142 = vector.shape_cast %141 : vector<1x16x16xf32> to vector<16x16xf32>
      %143 = vector.broadcast %140 : f32 to vector<16x16xf32>
      %144 = arith.mulf %143, %142 : vector<16x16xf32>
      %145 = arith.addf %139, %144 : vector<16x16xf32>
      %c20 = arith.constant 20 : index
      %146 = memref.load %arg3[%c20] : memref<36xf32, #tpu.memory_space<smem>>
      %c2_84 = arith.constant 2 : index
      %c4_85 = arith.constant 4 : index
      %c6_86 = arith.constant 6 : index
      %147 = vector.load %arg10[%c2_84, %c4_85, %c6_86] : memref<4x26x26xf32, #tpu.memory_space<vmem>>, vector<1x16x16xf32>
      %148 = vector.shape_cast %147 : vector<1x16x16xf32> to vector<16x16xf32>
      %149 = vector.broadcast %146 : f32 to vector<16x16xf32>
      %150 = arith.mulf %149, %148 : vector<16x16xf32>
      %151 = arith.addf %145, %150 : vector<16x16xf32>
      %c21 = arith.constant 21 : index
      %152 = memref.load %arg3[%c21] : memref<36xf32, #tpu.memory_space<smem>>
      %c2_87 = arith.constant 2 : index
      %c5_88 = arith.constant 5 : index
      %c4_89 = arith.constant 4 : index
      %153 = vector.load %arg10[%c2_87, %c5_88, %c4_89] : memref<4x26x26xf32, #tpu.memory_space<vmem>>, vector<1x16x16xf32>
      %154 = vector.shape_cast %153 : vector<1x16x16xf32> to vector<16x16xf32>
      %155 = vector.broadcast %152 : f32 to vector<16x16xf32>
      %156 = arith.mulf %155, %154 : vector<16x16xf32>
      %157 = arith.addf %151, %156 : vector<16x16xf32>
      %c22 = arith.constant 22 : index
      %158 = memref.load %arg3[%c22] : memref<36xf32, #tpu.memory_space<smem>>
      %c2_90 = arith.constant 2 : index
      %c5_91 = arith.constant 5 : index
      %c5_92 = arith.constant 5 : index
      %159 = vector.load %arg10[%c2_90, %c5_91, %c5_92] : memref<4x26x26xf32, #tpu.memory_space<vmem>>, vector<1x16x16xf32>
      %160 = vector.shape_cast %159 : vector<1x16x16xf32> to vector<16x16xf32>
      %161 = vector.broadcast %158 : f32 to vector<16x16xf32>
      %162 = arith.mulf %161, %160 : vector<16x16xf32>
      %163 = arith.addf %157, %162 : vector<16x16xf32>
      %c23 = arith.constant 23 : index
      %164 = memref.load %arg3[%c23] : memref<36xf32, #tpu.memory_space<smem>>
      %c2_93 = arith.constant 2 : index
      %c5_94 = arith.constant 5 : index
      %c6_95 = arith.constant 6 : index
      %165 = vector.load %arg10[%c2_93, %c5_94, %c6_95] : memref<4x26x26xf32, #tpu.memory_space<vmem>>, vector<1x16x16xf32>
      %166 = vector.shape_cast %165 : vector<1x16x16xf32> to vector<16x16xf32>
      %167 = vector.broadcast %164 : f32 to vector<16x16xf32>
      %168 = arith.mulf %167, %166 : vector<16x16xf32>
      %169 = arith.addf %163, %168 : vector<16x16xf32>
      %c24 = arith.constant 24 : index
      %170 = memref.load %arg3[%c24] : memref<36xf32, #tpu.memory_space<smem>>
      %c2_96 = arith.constant 2 : index
      %c6_97 = arith.constant 6 : index
      %c4_98 = arith.constant 4 : index
      %171 = vector.load %arg10[%c2_96, %c6_97, %c4_98] : memref<4x26x26xf32, #tpu.memory_space<vmem>>, vector<1x16x16xf32>
      %172 = vector.shape_cast %171 : vector<1x16x16xf32> to vector<16x16xf32>
      %173 = vector.broadcast %170 : f32 to vector<16x16xf32>
      %174 = arith.mulf %173, %172 : vector<16x16xf32>
      %175 = arith.addf %169, %174 : vector<16x16xf32>
      %c25 = arith.constant 25 : index
      %176 = memref.load %arg3[%c25] : memref<36xf32, #tpu.memory_space<smem>>
      %c2_99 = arith.constant 2 : index
      %c6_100 = arith.constant 6 : index
      %c5_101 = arith.constant 5 : index
      %177 = vector.load %arg10[%c2_99, %c6_100, %c5_101] : memref<4x26x26xf32, #tpu.memory_space<vmem>>, vector<1x16x16xf32>
      %178 = vector.shape_cast %177 : vector<1x16x16xf32> to vector<16x16xf32>
      %179 = vector.broadcast %176 : f32 to vector<16x16xf32>
      %180 = arith.mulf %179, %178 : vector<16x16xf32>
      %181 = arith.addf %175, %180 : vector<16x16xf32>
      %c26 = arith.constant 26 : index
      %182 = memref.load %arg3[%c26] : memref<36xf32, #tpu.memory_space<smem>>
      %c2_102 = arith.constant 2 : index
      %c6_103 = arith.constant 6 : index
      %c6_104 = arith.constant 6 : index
      %183 = vector.load %arg10[%c2_102, %c6_103, %c6_104] : memref<4x26x26xf32, #tpu.memory_space<vmem>>, vector<1x16x16xf32>
      %184 = vector.shape_cast %183 : vector<1x16x16xf32> to vector<16x16xf32>
      %185 = vector.broadcast %182 : f32 to vector<16x16xf32>
      %186 = arith.mulf %185, %184 : vector<16x16xf32>
      %187 = arith.addf %181, %186 : vector<16x16xf32>
      %c0_105 = arith.constant 0 : index
      %c2_106 = arith.constant 2 : index
      %c0_107 = arith.constant 0 : index
      %c0_108 = arith.constant 0 : index
      %188 = vector.load %arg9[%c0_105, %c2_106, %c0_107, %c0_108] : memref<1x4x16x16xf32, #tpu.memory_space<vmem>>, vector<1x1x16x16xf32>
      %189 = vector.shape_cast %188 : vector<1x1x16x16xf32> to vector<16x16xf32>
      %190 = vector.shape_cast %187 : vector<16x16xf32> to vector<1x1x16x16xf32>
      tpu.vector_store %arg9[%c0_105, %c2_106, %c0_107, %c0_108], %190 {strides = array<i32>} : memref<1x4x16x16xf32, #tpu.memory_space<vmem>>, vector<1x1x16x16xf32>,
      %c3_109 = arith.constant 3 : index
      %191 = memref.load %arg4[%c3_109] : memref<4xf32, #tpu.memory_space<smem>>
      %192 = vector.broadcast %191 : f32 to vector<16x16xf32>
      %c27 = arith.constant 27 : index
      %193 = memref.load %arg3[%c27] : memref<36xf32, #tpu.memory_space<smem>>
      %c3_110 = arith.constant 3 : index
      %c4_111 = arith.constant 4 : index
      %c4_112 = arith.constant 4 : index
      %194 = vector.load %arg10[%c3_110, %c4_111, %c4_112] : memref<4x26x26xf32, #tpu.memory_space<vmem>>, vector<1x16x16xf32>
      %195 = vector.shape_cast %194 : vector<1x16x16xf32> to vector<16x16xf32>
      %196 = vector.broadcast %193 : f32 to vector<16x16xf32>
      %197 = arith.mulf %196, %195 : vector<16x16xf32>
      %198 = arith.addf %192, %197 : vector<16x16xf32>
      %c28 = arith.constant 28 : index
      %199 = memref.load %arg3[%c28] : memref<36xf32, #tpu.memory_space<smem>>
      %c3_113 = arith.constant 3 : index
      %c4_114 = arith.constant 4 : index
      %c5_115 = arith.constant 5 : index
      %200 = vector.load %arg10[%c3_113, %c4_114, %c5_115] : memref<4x26x26xf32, #tpu.memory_space<vmem>>, vector<1x16x16xf32>
      %201 = vector.shape_cast %200 : vector<1x16x16xf32> to vector<16x16xf32>
      %202 = vector.broadcast %199 : f32 to vector<16x16xf32>
      %203 = arith.mulf %202, %201 : vector<16x16xf32>
      %204 = arith.addf %198, %203 : vector<16x16xf32>
      %c29 = arith.constant 29 : index
      %205 = memref.load %arg3[%c29] : memref<36xf32, #tpu.memory_space<smem>>
      %c3_116 = arith.constant 3 : index
      %c4_117 = arith.constant 4 : index
      %c6_118 = arith.constant 6 : index
      %206 = vector.load %arg10[%c3_116, %c4_117, %c6_118] : memref<4x26x26xf32, #tpu.memory_space<vmem>>, vector<1x16x16xf32>
      %207 = vector.shape_cast %206 : vector<1x16x16xf32> to vector<16x16xf32>
      %208 = vector.broadcast %205 : f32 to vector<16x16xf32>
      %209 = arith.mulf %208, %207 : vector<16x16xf32>
      %210 = arith.addf %204, %209 : vector<16x16xf32>
      %c30 = arith.constant 30 : index
      %211 = memref.load %arg3[%c30] : memref<36xf32, #tpu.memory_space<smem>>
      %c3_119 = arith.constant 3 : index
      %c5_120 = arith.constant 5 : index
      %c4_121 = arith.constant 4 : index
      %212 = vector.load %arg10[%c3_119, %c5_120, %c4_121] : memref<4x26x26xf32, #tpu.memory_space<vmem>>, vector<1x16x16xf32>
      %213 = vector.shape_cast %212 : vector<1x16x16xf32> to vector<16x16xf32>
      %214 = vector.broadcast %211 : f32 to vector<16x16xf32>
      %215 = arith.mulf %214, %213 : vector<16x16xf32>
      %216 = arith.addf %210, %215 : vector<16x16xf32>
      %c31 = arith.constant 31 : index
      %217 = memref.load %arg3[%c31] : memref<36xf32, #tpu.memory_space<smem>>
      %c3_122 = arith.constant 3 : index
      %c5_123 = arith.constant 5 : index
      %c5_124 = arith.constant 5 : index
      %218 = vector.load %arg10[%c3_122, %c5_123, %c5_124] : memref<4x26x26xf32, #tpu.memory_space<vmem>>, vector<1x16x16xf32>
      %219 = vector.shape_cast %218 : vector<1x16x16xf32> to vector<16x16xf32>
      %220 = vector.broadcast %217 : f32 to vector<16x16xf32>
      %221 = arith.mulf %220, %219 : vector<16x16xf32>
      %222 = arith.addf %216, %221 : vector<16x16xf32>
      %c32 = arith.constant 32 : index
      %223 = memref.load %arg3[%c32] : memref<36xf32, #tpu.memory_space<smem>>
      %c3_125 = arith.constant 3 : index
      %c5_126 = arith.constant 5 : index
      %c6_127 = arith.constant 6 : index
      %224 = vector.load %arg10[%c3_125, %c5_126, %c6_127] : memref<4x26x26xf32, #tpu.memory_space<vmem>>, vector<1x16x16xf32>
      %225 = vector.shape_cast %224 : vector<1x16x16xf32> to vector<16x16xf32>
      %226 = vector.broadcast %223 : f32 to vector<16x16xf32>
      %227 = arith.mulf %226, %225 : vector<16x16xf32>
      %228 = arith.addf %222, %227 : vector<16x16xf32>
      %c33 = arith.constant 33 : index
      %229 = memref.load %arg3[%c33] : memref<36xf32, #tpu.memory_space<smem>>
      %c3_128 = arith.constant 3 : index
      %c6_129 = arith.constant 6 : index
      %c4_130 = arith.constant 4 : index
      %230 = vector.load %arg10[%c3_128, %c6_129, %c4_130] : memref<4x26x26xf32, #tpu.memory_space<vmem>>, vector<1x16x16xf32>
      %231 = vector.shape_cast %230 : vector<1x16x16xf32> to vector<16x16xf32>
      %232 = vector.broadcast %229 : f32 to vector<16x16xf32>
      %233 = arith.mulf %232, %231 : vector<16x16xf32>
      %234 = arith.addf %228, %233 : vector<16x16xf32>
      %c34 = arith.constant 34 : index
      %235 = memref.load %arg3[%c34] : memref<36xf32, #tpu.memory_space<smem>>
      %c3_131 = arith.constant 3 : index
      %c6_132 = arith.constant 6 : index
      %c5_133 = arith.constant 5 : index
      %236 = vector.load %arg10[%c3_131, %c6_132, %c5_133] : memref<4x26x26xf32, #tpu.memory_space<vmem>>, vector<1x16x16xf32>
      %237 = vector.shape_cast %236 : vector<1x16x16xf32> to vector<16x16xf32>
      %238 = vector.broadcast %235 : f32 to vector<16x16xf32>
      %239 = arith.mulf %238, %237 : vector<16x16xf32>
      %240 = arith.addf %234, %239 : vector<16x16xf32>
      %c35 = arith.constant 35 : index
      %241 = memref.load %arg3[%c35] : memref<36xf32, #tpu.memory_space<smem>>
      %c3_134 = arith.constant 3 : index
      %c6_135 = arith.constant 6 : index
      %c6_136 = arith.constant 6 : index
      %242 = vector.load %arg10[%c3_134, %c6_135, %c6_136] : memref<4x26x26xf32, #tpu.memory_space<vmem>>, vector<1x16x16xf32>
      %243 = vector.shape_cast %242 : vector<1x16x16xf32> to vector<16x16xf32>
      %244 = vector.broadcast %241 : f32 to vector<16x16xf32>
      %245 = arith.mulf %244, %243 : vector<16x16xf32>
      %246 = arith.addf %240, %245 : vector<16x16xf32>
      %c0_137 = arith.constant 0 : index
      %c3_138 = arith.constant 3 : index
      %c0_139 = arith.constant 0 : index
      %c0_140 = arith.constant 0 : index
      %247 = vector.load %arg9[%c0_137, %c3_138, %c0_139, %c0_140] : memref<1x4x16x16xf32, #tpu.memory_space<vmem>>, vector<1x1x16x16xf32>
      %248 = vector.shape_cast %247 : vector<1x1x16x16xf32> to vector<16x16xf32>
      %249 = vector.shape_cast %246 : vector<16x16xf32> to vector<1x1x16x16xf32>
      tpu.vector_store %arg9[%c0_137, %c3_138, %c0_139, %c0_140], %249 {strides = array<i32>} : memref<1x4x16x16xf32, #tpu.memory_space<vmem>>, vector<1x1x16x16xf32>,
    } else {
    }
    %c1_i32 = arith.constant 1 : i32
    %8 = arith.cmpi eq, %arg1, %c1_i32 : i32
    %9 = arith.extui %8 : i1 to i32
    %c0_i32_9 = arith.constant 0 : i32
    %10 = arith.cmpi ne, %9, %c0_i32_9 : i32
    scf.if %10 {
      %c0_11 = arith.constant 0 : index
      %14 = memref.load %arg6[%c0_11] : memref<4xf32, #tpu.memory_space<smem>>
      %15 = vector.broadcast %14 : f32 to vector<16x16xf32>
      %c0_12 = arith.constant 0 : index
      %16 = memref.load %arg5[%c0_12] : memref<44xf32, #tpu.memory_space<smem>>
      %c0_13 = arith.constant 0 : index
      %c5_14 = arith.constant 5 : index
      %c0_15 = arith.constant 0 : index
      %17 = vector.load %arg10[%c0_13, %c5_14, %c0_15] : memref<4x26x26xf32, #tpu.memory_space<vmem>>, vector<1x16x16xf32>
      %18 = vector.shape_cast %17 : vector<1x16x16xf32> to vector<16x16xf32>
      %19 = vector.broadcast %16 : f32 to vector<16x16xf32>
      %20 = arith.mulf %19, %18 : vector<16x16xf32>
      %21 = arith.addf %15, %20 : vector<16x16xf32>
      %c1 = arith.constant 1 : index
      %22 = memref.load %arg5[%c1] : memref<44xf32, #tpu.memory_space<smem>>
      %c0_16 = arith.constant 0 : index
      %c5_17 = arith.constant 5 : index
      %c1_18 = arith.constant 1 : index
      %23 = vector.load %arg10[%c0_16, %c5_17, %c1_18] : memref<4x26x26xf32, #tpu.memory_space<vmem>>, vector<1x16x16xf32>
      %24 = vector.shape_cast %23 : vector<1x16x16xf32> to vector<16x16xf32>
      %25 = vector.broadcast %22 : f32 to vector<16x16xf32>
      %26 = arith.mulf %25, %24 : vector<16x16xf32>
      %27 = arith.addf %21, %26 : vector<16x16xf32>
      %c2 = arith.constant 2 : index
      %28 = memref.load %arg5[%c2] : memref<44xf32, #tpu.memory_space<smem>>
      %c0_19 = arith.constant 0 : index
      %c5_20 = arith.constant 5 : index
      %c2_21 = arith.constant 2 : index
      %29 = vector.load %arg10[%c0_19, %c5_20, %c2_21] : memref<4x26x26xf32, #tpu.memory_space<vmem>>, vector<1x16x16xf32>
      %30 = vector.shape_cast %29 : vector<1x16x16xf32> to vector<16x16xf32>
      %31 = vector.broadcast %28 : f32 to vector<16x16xf32>
      %32 = arith.mulf %31, %30 : vector<16x16xf32>
      %33 = arith.addf %27, %32 : vector<16x16xf32>
      %c3 = arith.constant 3 : index
      %34 = memref.load %arg5[%c3] : memref<44xf32, #tpu.memory_space<smem>>
      %c0_22 = arith.constant 0 : index
      %c5_23 = arith.constant 5 : index
      %c3_24 = arith.constant 3 : index
      %35 = vector.load %arg10[%c0_22, %c5_23, %c3_24] : memref<4x26x26xf32, #tpu.memory_space<vmem>>, vector<1x16x16xf32>
      %36 = vector.shape_cast %35 : vector<1x16x16xf32> to vector<16x16xf32>
      %37 = vector.broadcast %34 : f32 to vector<16x16xf32>
      %38 = arith.mulf %37, %36 : vector<16x16xf32>
      %39 = arith.addf %33, %38 : vector<16x16xf32>
      %c4 = arith.constant 4 : index
      %40 = memref.load %arg5[%c4] : memref<44xf32, #tpu.memory_space<smem>>
      %c0_25 = arith.constant 0 : index
      %c5_26 = arith.constant 5 : index
      %c4_27 = arith.constant 4 : index
      %41 = vector.load %arg10[%c0_25, %c5_26, %c4_27] : memref<4x26x26xf32, #tpu.memory_space<vmem>>, vector<1x16x16xf32>
      %42 = vector.shape_cast %41 : vector<1x16x16xf32> to vector<16x16xf32>
      %43 = vector.broadcast %40 : f32 to vector<16x16xf32>
      %44 = arith.mulf %43, %42 : vector<16x16xf32>
      %45 = arith.addf %39, %44 : vector<16x16xf32>
      %c5_28 = arith.constant 5 : index
      %46 = memref.load %arg5[%c5_28] : memref<44xf32, #tpu.memory_space<smem>>
      %c0_29 = arith.constant 0 : index
      %c5_30 = arith.constant 5 : index
      %c5_31 = arith.constant 5 : index
      %47 = vector.load %arg10[%c0_29, %c5_30, %c5_31] : memref<4x26x26xf32, #tpu.memory_space<vmem>>, vector<1x16x16xf32>
      %48 = vector.shape_cast %47 : vector<1x16x16xf32> to vector<16x16xf32>
      %49 = vector.broadcast %46 : f32 to vector<16x16xf32>
      %50 = arith.mulf %49, %48 : vector<16x16xf32>
      %51 = arith.addf %45, %50 : vector<16x16xf32>
      %c6 = arith.constant 6 : index
      %52 = memref.load %arg5[%c6] : memref<44xf32, #tpu.memory_space<smem>>
      %c0_32 = arith.constant 0 : index
      %c5_33 = arith.constant 5 : index
      %c6_34 = arith.constant 6 : index
      %53 = vector.load %arg10[%c0_32, %c5_33, %c6_34] : memref<4x26x26xf32, #tpu.memory_space<vmem>>, vector<1x16x16xf32>
      %54 = vector.shape_cast %53 : vector<1x16x16xf32> to vector<16x16xf32>
      %55 = vector.broadcast %52 : f32 to vector<16x16xf32>
      %56 = arith.mulf %55, %54 : vector<16x16xf32>
      %57 = arith.addf %51, %56 : vector<16x16xf32>
      %c7 = arith.constant 7 : index
      %58 = memref.load %arg5[%c7] : memref<44xf32, #tpu.memory_space<smem>>
      %c0_35 = arith.constant 0 : index
      %c5_36 = arith.constant 5 : index
      %c7_37 = arith.constant 7 : index
      %59 = vector.load %arg10[%c0_35, %c5_36, %c7_37] : memref<4x26x26xf32, #tpu.memory_space<vmem>>, vector<1x16x16xf32>
      %60 = vector.shape_cast %59 : vector<1x16x16xf32> to vector<16x16xf32>
      %61 = vector.broadcast %58 : f32 to vector<16x16xf32>
      %62 = arith.mulf %61, %60 : vector<16x16xf32>
      %63 = arith.addf %57, %62 : vector<16x16xf32>
      %c8 = arith.constant 8 : index
      %64 = memref.load %arg5[%c8] : memref<44xf32, #tpu.memory_space<smem>>
      %c0_38 = arith.constant 0 : index
      %c5_39 = arith.constant 5 : index
      %c8_40 = arith.constant 8 : index
      %65 = vector.load %arg10[%c0_38, %c5_39, %c8_40] : memref<4x26x26xf32, #tpu.memory_space<vmem>>, vector<1x16x16xf32>
      %66 = vector.shape_cast %65 : vector<1x16x16xf32> to vector<16x16xf32>
      %67 = vector.broadcast %64 : f32 to vector<16x16xf32>
      %68 = arith.mulf %67, %66 : vector<16x16xf32>
      %69 = arith.addf %63, %68 : vector<16x16xf32>
      %c9 = arith.constant 9 : index
      %70 = memref.load %arg5[%c9] : memref<44xf32, #tpu.memory_space<smem>>
      %c0_41 = arith.constant 0 : index
      %c5_42 = arith.constant 5 : index
      %c9_43 = arith.constant 9 : index
      %71 = vector.load %arg10[%c0_41, %c5_42, %c9_43] : memref<4x26x26xf32, #tpu.memory_space<vmem>>, vector<1x16x16xf32>
      %72 = vector.shape_cast %71 : vector<1x16x16xf32> to vector<16x16xf32>
      %73 = vector.broadcast %70 : f32 to vector<16x16xf32>
      %74 = arith.mulf %73, %72 : vector<16x16xf32>
      %75 = arith.addf %69, %74 : vector<16x16xf32>
      %c10 = arith.constant 10 : index
      %76 = memref.load %arg5[%c10] : memref<44xf32, #tpu.memory_space<smem>>
      %c0_44 = arith.constant 0 : index
      %c5_45 = arith.constant 5 : index
      %c10_46 = arith.constant 10 : index
      %77 = vector.load %arg10[%c0_44, %c5_45, %c10_46] : memref<4x26x26xf32, #tpu.memory_space<vmem>>, vector<1x16x16xf32>
      %78 = vector.shape_cast %77 : vector<1x16x16xf32> to vector<16x16xf32>
      %79 = vector.broadcast %76 : f32 to vector<16x16xf32>
      %80 = arith.mulf %79, %78 : vector<16x16xf32>
      %81 = arith.addf %75, %80 : vector<16x16xf32>
      %c0_47 = arith.constant 0 : index
      %c0_48 = arith.constant 0 : index
      %c0_49 = arith.constant 0 : index
      %c0_50 = arith.constant 0 : index
      %82 = vector.load %arg9[%c0_47, %c0_48, %c0_49, %c0_50] : memref<1x4x16x16xf32, #tpu.memory_space<vmem>>, vector<1x1x16x16xf32>
      %83 = vector.shape_cast %82 : vector<1x1x16x16xf32> to vector<16x16xf32>
      %84 = vector.shape_cast %81 : vector<16x16xf32> to vector<1x1x16x16xf32>
      tpu.vector_store %arg9[%c0_47, %c0_48, %c0_49, %c0_50], %84 {strides = array<i32>} : memref<1x4x16x16xf32, #tpu.memory_space<vmem>>, vector<1x1x16x16xf32>,
      %c1_51 = arith.constant 1 : index
      %85 = memref.load %arg6[%c1_51] : memref<4xf32, #tpu.memory_space<smem>>
      %86 = vector.broadcast %85 : f32 to vector<16x16xf32>
      %c11 = arith.constant 11 : index
      %87 = memref.load %arg5[%c11] : memref<44xf32, #tpu.memory_space<smem>>
      %c1_52 = arith.constant 1 : index
      %c5_53 = arith.constant 5 : index
      %c0_54 = arith.constant 0 : index
      %88 = vector.load %arg10[%c1_52, %c5_53, %c0_54] : memref<4x26x26xf32, #tpu.memory_space<vmem>>, vector<1x16x16xf32>
      %89 = vector.shape_cast %88 : vector<1x16x16xf32> to vector<16x16xf32>
      %90 = vector.broadcast %87 : f32 to vector<16x16xf32>
      %91 = arith.mulf %90, %89 : vector<16x16xf32>
      %92 = arith.addf %86, %91 : vector<16x16xf32>
      %c12 = arith.constant 12 : index
      %93 = memref.load %arg5[%c12] : memref<44xf32, #tpu.memory_space<smem>>
      %c1_55 = arith.constant 1 : index
      %c5_56 = arith.constant 5 : index
      %c1_57 = arith.constant 1 : index
      %94 = vector.load %arg10[%c1_55, %c5_56, %c1_57] : memref<4x26x26xf32, #tpu.memory_space<vmem>>, vector<1x16x16xf32>
      %95 = vector.shape_cast %94 : vector<1x16x16xf32> to vector<16x16xf32>
      %96 = vector.broadcast %93 : f32 to vector<16x16xf32>
      %97 = arith.mulf %96, %95 : vector<16x16xf32>
      %98 = arith.addf %92, %97 : vector<16x16xf32>
      %c13 = arith.constant 13 : index
      %99 = memref.load %arg5[%c13] : memref<44xf32, #tpu.memory_space<smem>>
      %c1_58 = arith.constant 1 : index
      %c5_59 = arith.constant 5 : index
      %c2_60 = arith.constant 2 : index
      %100 = vector.load %arg10[%c1_58, %c5_59, %c2_60] : memref<4x26x26xf32, #tpu.memory_space<vmem>>, vector<1x16x16xf32>
      %101 = vector.shape_cast %100 : vector<1x16x16xf32> to vector<16x16xf32>
      %102 = vector.broadcast %99 : f32 to vector<16x16xf32>
      %103 = arith.mulf %102, %101 : vector<16x16xf32>
      %104 = arith.addf %98, %103 : vector<16x16xf32>
      %c14 = arith.constant 14 : index
      %105 = memref.load %arg5[%c14] : memref<44xf32, #tpu.memory_space<smem>>
      %c1_61 = arith.constant 1 : index
      %c5_62 = arith.constant 5 : index
      %c3_63 = arith.constant 3 : index
      %106 = vector.load %arg10[%c1_61, %c5_62, %c3_63] : memref<4x26x26xf32, #tpu.memory_space<vmem>>, vector<1x16x16xf32>
      %107 = vector.shape_cast %106 : vector<1x16x16xf32> to vector<16x16xf32>
      %108 = vector.broadcast %105 : f32 to vector<16x16xf32>
      %109 = arith.mulf %108, %107 : vector<16x16xf32>
      %110 = arith.addf %104, %109 : vector<16x16xf32>
      %c15 = arith.constant 15 : index
      %111 = memref.load %arg5[%c15] : memref<44xf32, #tpu.memory_space<smem>>
      %c1_64 = arith.constant 1 : index
      %c5_65 = arith.constant 5 : index
      %c4_66 = arith.constant 4 : index
      %112 = vector.load %arg10[%c1_64, %c5_65, %c4_66] : memref<4x26x26xf32, #tpu.memory_space<vmem>>, vector<1x16x16xf32>
      %113 = vector.shape_cast %112 : vector<1x16x16xf32> to vector<16x16xf32>
      %114 = vector.broadcast %111 : f32 to vector<16x16xf32>
      %115 = arith.mulf %114, %113 : vector<16x16xf32>
      %116 = arith.addf %110, %115 : vector<16x16xf32>
      %c16 = arith.constant 16 : index
      %117 = memref.load %arg5[%c16] : memref<44xf32, #tpu.memory_space<smem>>
      %c1_67 = arith.constant 1 : index
      %c5_68 = arith.constant 5 : index
      %c5_69 = arith.constant 5 : index
      %118 = vector.load %arg10[%c1_67, %c5_68, %c5_69] : memref<4x26x26xf32, #tpu.memory_space<vmem>>, vector<1x16x16xf32>
      %119 = vector.shape_cast %118 : vector<1x16x16xf32> to vector<16x16xf32>
      %120 = vector.broadcast %117 : f32 to vector<16x16xf32>
      %121 = arith.mulf %120, %119 : vector<16x16xf32>
      %122 = arith.addf %116, %121 : vector<16x16xf32>
      %c17 = arith.constant 17 : index
      %123 = memref.load %arg5[%c17] : memref<44xf32, #tpu.memory_space<smem>>
      %c1_70 = arith.constant 1 : index
      %c5_71 = arith.constant 5 : index
      %c6_72 = arith.constant 6 : index
      %124 = vector.load %arg10[%c1_70, %c5_71, %c6_72] : memref<4x26x26xf32, #tpu.memory_space<vmem>>, vector<1x16x16xf32>
      %125 = vector.shape_cast %124 : vector<1x16x16xf32> to vector<16x16xf32>
      %126 = vector.broadcast %123 : f32 to vector<16x16xf32>
      %127 = arith.mulf %126, %125 : vector<16x16xf32>
      %128 = arith.addf %122, %127 : vector<16x16xf32>
      %c18 = arith.constant 18 : index
      %129 = memref.load %arg5[%c18] : memref<44xf32, #tpu.memory_space<smem>>
      %c1_73 = arith.constant 1 : index
      %c5_74 = arith.constant 5 : index
      %c7_75 = arith.constant 7 : index
      %130 = vector.load %arg10[%c1_73, %c5_74, %c7_75] : memref<4x26x26xf32, #tpu.memory_space<vmem>>, vector<1x16x16xf32>
      %131 = vector.shape_cast %130 : vector<1x16x16xf32> to vector<16x16xf32>
      %132 = vector.broadcast %129 : f32 to vector<16x16xf32>
      %133 = arith.mulf %132, %131 : vector<16x16xf32>
      %134 = arith.addf %128, %133 : vector<16x16xf32>
      %c19 = arith.constant 19 : index
      %135 = memref.load %arg5[%c19] : memref<44xf32, #tpu.memory_space<smem>>
      %c1_76 = arith.constant 1 : index
      %c5_77 = arith.constant 5 : index
      %c8_78 = arith.constant 8 : index
      %136 = vector.load %arg10[%c1_76, %c5_77, %c8_78] : memref<4x26x26xf32, #tpu.memory_space<vmem>>, vector<1x16x16xf32>
      %137 = vector.shape_cast %136 : vector<1x16x16xf32> to vector<16x16xf32>
      %138 = vector.broadcast %135 : f32 to vector<16x16xf32>
      %139 = arith.mulf %138, %137 : vector<16x16xf32>
      %140 = arith.addf %134, %139 : vector<16x16xf32>
      %c20 = arith.constant 20 : index
      %141 = memref.load %arg5[%c20] : memref<44xf32, #tpu.memory_space<smem>>
      %c1_79 = arith.constant 1 : index
      %c5_80 = arith.constant 5 : index
      %c9_81 = arith.constant 9 : index
      %142 = vector.load %arg10[%c1_79, %c5_80, %c9_81] : memref<4x26x26xf32, #tpu.memory_space<vmem>>, vector<1x16x16xf32>
      %143 = vector.shape_cast %142 : vector<1x16x16xf32> to vector<16x16xf32>
      %144 = vector.broadcast %141 : f32 to vector<16x16xf32>
      %145 = arith.mulf %144, %143 : vector<16x16xf32>
      %146 = arith.addf %140, %145 : vector<16x16xf32>
      %c21 = arith.constant 21 : index
      %147 = memref.load %arg5[%c21] : memref<44xf32, #tpu.memory_space<smem>>
      %c1_82 = arith.constant 1 : index
      %c5_83 = arith.constant 5 : index
      %c10_84 = arith.constant 10 : index
      %148 = vector.load %arg10[%c1_82, %c5_83, %c10_84] : memref<4x26x26xf32, #tpu.memory_space<vmem>>, vector<1x16x16xf32>
      %149 = vector.shape_cast %148 : vector<1x16x16xf32> to vector<16x16xf32>
      %150 = vector.broadcast %147 : f32 to vector<16x16xf32>
      %151 = arith.mulf %150, %149 : vector<16x16xf32>
      %152 = arith.addf %146, %151 : vector<16x16xf32>
      %c0_85 = arith.constant 0 : index
      %c1_86 = arith.constant 1 : index
      %c0_87 = arith.constant 0 : index
      %c0_88 = arith.constant 0 : index
      %153 = vector.load %arg9[%c0_85, %c1_86, %c0_87, %c0_88] : memref<1x4x16x16xf32, #tpu.memory_space<vmem>>, vector<1x1x16x16xf32>
      %154 = vector.shape_cast %153 : vector<1x1x16x16xf32> to vector<16x16xf32>
      %155 = vector.shape_cast %152 : vector<16x16xf32> to vector<1x1x16x16xf32>
      tpu.vector_store %arg9[%c0_85, %c1_86, %c0_87, %c0_88], %155 {strides = array<i32>} : memref<1x4x16x16xf32, #tpu.memory_space<vmem>>, vector<1x1x16x16xf32>,
      %c2_89 = arith.constant 2 : index
      %156 = memref.load %arg6[%c2_89] : memref<4xf32, #tpu.memory_space<smem>>
      %157 = vector.broadcast %156 : f32 to vector<16x16xf32>
      %c22 = arith.constant 22 : index
      %158 = memref.load %arg5[%c22] : memref<44xf32, #tpu.memory_space<smem>>
      %c2_90 = arith.constant 2 : index
      %c5_91 = arith.constant 5 : index
      %c0_92 = arith.constant 0 : index
      %159 = vector.load %arg10[%c2_90, %c5_91, %c0_92] : memref<4x26x26xf32, #tpu.memory_space<vmem>>, vector<1x16x16xf32>
      %160 = vector.shape_cast %159 : vector<1x16x16xf32> to vector<16x16xf32>
      %161 = vector.broadcast %158 : f32 to vector<16x16xf32>
      %162 = arith.mulf %161, %160 : vector<16x16xf32>
      %163 = arith.addf %157, %162 : vector<16x16xf32>
      %c23 = arith.constant 23 : index
      %164 = memref.load %arg5[%c23] : memref<44xf32, #tpu.memory_space<smem>>
      %c2_93 = arith.constant 2 : index
      %c5_94 = arith.constant 5 : index
      %c1_95 = arith.constant 1 : index
      %165 = vector.load %arg10[%c2_93, %c5_94, %c1_95] : memref<4x26x26xf32, #tpu.memory_space<vmem>>, vector<1x16x16xf32>
      %166 = vector.shape_cast %165 : vector<1x16x16xf32> to vector<16x16xf32>
      %167 = vector.broadcast %164 : f32 to vector<16x16xf32>
      %168 = arith.mulf %167, %166 : vector<16x16xf32>
      %169 = arith.addf %163, %168 : vector<16x16xf32>
      %c24 = arith.constant 24 : index
      %170 = memref.load %arg5[%c24] : memref<44xf32, #tpu.memory_space<smem>>
      %c2_96 = arith.constant 2 : index
      %c5_97 = arith.constant 5 : index
      %c2_98 = arith.constant 2 : index
      %171 = vector.load %arg10[%c2_96, %c5_97, %c2_98] : memref<4x26x26xf32, #tpu.memory_space<vmem>>, vector<1x16x16xf32>
      %172 = vector.shape_cast %171 : vector<1x16x16xf32> to vector<16x16xf32>
      %173 = vector.broadcast %170 : f32 to vector<16x16xf32>
      %174 = arith.mulf %173, %172 : vector<16x16xf32>
      %175 = arith.addf %169, %174 : vector<16x16xf32>
      %c25 = arith.constant 25 : index
      %176 = memref.load %arg5[%c25] : memref<44xf32, #tpu.memory_space<smem>>
      %c2_99 = arith.constant 2 : index
      %c5_100 = arith.constant 5 : index
      %c3_101 = arith.constant 3 : index
      %177 = vector.load %arg10[%c2_99, %c5_100, %c3_101] : memref<4x26x26xf32, #tpu.memory_space<vmem>>, vector<1x16x16xf32>
      %178 = vector.shape_cast %177 : vector<1x16x16xf32> to vector<16x16xf32>
      %179 = vector.broadcast %176 : f32 to vector<16x16xf32>
      %180 = arith.mulf %179, %178 : vector<16x16xf32>
      %181 = arith.addf %175, %180 : vector<16x16xf32>
      %c26 = arith.constant 26 : index
      %182 = memref.load %arg5[%c26] : memref<44xf32, #tpu.memory_space<smem>>
      %c2_102 = arith.constant 2 : index
      %c5_103 = arith.constant 5 : index
      %c4_104 = arith.constant 4 : index
      %183 = vector.load %arg10[%c2_102, %c5_103, %c4_104] : memref<4x26x26xf32, #tpu.memory_space<vmem>>, vector<1x16x16xf32>
      %184 = vector.shape_cast %183 : vector<1x16x16xf32> to vector<16x16xf32>
      %185 = vector.broadcast %182 : f32 to vector<16x16xf32>
      %186 = arith.mulf %185, %184 : vector<16x16xf32>
      %187 = arith.addf %181, %186 : vector<16x16xf32>
      %c27 = arith.constant 27 : index
      %188 = memref.load %arg5[%c27] : memref<44xf32, #tpu.memory_space<smem>>
      %c2_105 = arith.constant 2 : index
      %c5_106 = arith.constant 5 : index
      %c5_107 = arith.constant 5 : index
      %189 = vector.load %arg10[%c2_105, %c5_106, %c5_107] : memref<4x26x26xf32, #tpu.memory_space<vmem>>, vector<1x16x16xf32>
      %190 = vector.shape_cast %189 : vector<1x16x16xf32> to vector<16x16xf32>
      %191 = vector.broadcast %188 : f32 to vector<16x16xf32>
      %192 = arith.mulf %191, %190 : vector<16x16xf32>
      %193 = arith.addf %187, %192 : vector<16x16xf32>
      %c28 = arith.constant 28 : index
      %194 = memref.load %arg5[%c28] : memref<44xf32, #tpu.memory_space<smem>>
      %c2_108 = arith.constant 2 : index
      %c5_109 = arith.constant 5 : index
      %c6_110 = arith.constant 6 : index
      %195 = vector.load %arg10[%c2_108, %c5_109, %c6_110] : memref<4x26x26xf32, #tpu.memory_space<vmem>>, vector<1x16x16xf32>
      %196 = vector.shape_cast %195 : vector<1x16x16xf32> to vector<16x16xf32>
      %197 = vector.broadcast %194 : f32 to vector<16x16xf32>
      %198 = arith.mulf %197, %196 : vector<16x16xf32>
      %199 = arith.addf %193, %198 : vector<16x16xf32>
      %c29 = arith.constant 29 : index
      %200 = memref.load %arg5[%c29] : memref<44xf32, #tpu.memory_space<smem>>
      %c2_111 = arith.constant 2 : index
      %c5_112 = arith.constant 5 : index
      %c7_113 = arith.constant 7 : index
      %201 = vector.load %arg10[%c2_111, %c5_112, %c7_113] : memref<4x26x26xf32, #tpu.memory_space<vmem>>, vector<1x16x16xf32>
      %202 = vector.shape_cast %201 : vector<1x16x16xf32> to vector<16x16xf32>
      %203 = vector.broadcast %200 : f32 to vector<16x16xf32>
      %204 = arith.mulf %203, %202 : vector<16x16xf32>
      %205 = arith.addf %199, %204 : vector<16x16xf32>
      %c30 = arith.constant 30 : index
      %206 = memref.load %arg5[%c30] : memref<44xf32, #tpu.memory_space<smem>>
      %c2_114 = arith.constant 2 : index
      %c5_115 = arith.constant 5 : index
      %c8_116 = arith.constant 8 : index
      %207 = vector.load %arg10[%c2_114, %c5_115, %c8_116] : memref<4x26x26xf32, #tpu.memory_space<vmem>>, vector<1x16x16xf32>
      %208 = vector.shape_cast %207 : vector<1x16x16xf32> to vector<16x16xf32>
      %209 = vector.broadcast %206 : f32 to vector<16x16xf32>
      %210 = arith.mulf %209, %208 : vector<16x16xf32>
      %211 = arith.addf %205, %210 : vector<16x16xf32>
      %c31 = arith.constant 31 : index
      %212 = memref.load %arg5[%c31] : memref<44xf32, #tpu.memory_space<smem>>
      %c2_117 = arith.constant 2 : index
      %c5_118 = arith.constant 5 : index
      %c9_119 = arith.constant 9 : index
      %213 = vector.load %arg10[%c2_117, %c5_118, %c9_119] : memref<4x26x26xf32, #tpu.memory_space<vmem>>, vector<1x16x16xf32>
      %214 = vector.shape_cast %213 : vector<1x16x16xf32> to vector<16x16xf32>
      %215 = vector.broadcast %212 : f32 to vector<16x16xf32>
      %216 = arith.mulf %215, %214 : vector<16x16xf32>
      %217 = arith.addf %211, %216 : vector<16x16xf32>
      %c32 = arith.constant 32 : index
      %218 = memref.load %arg5[%c32] : memref<44xf32, #tpu.memory_space<smem>>
      %c2_120 = arith.constant 2 : index
      %c5_121 = arith.constant 5 : index
      %c10_122 = arith.constant 10 : index
      %219 = vector.load %arg10[%c2_120, %c5_121, %c10_122] : memref<4x26x26xf32, #tpu.memory_space<vmem>>, vector<1x16x16xf32>
      %220 = vector.shape_cast %219 : vector<1x16x16xf32> to vector<16x16xf32>
      %221 = vector.broadcast %218 : f32 to vector<16x16xf32>
      %222 = arith.mulf %221, %220 : vector<16x16xf32>
      %223 = arith.addf %217, %222 : vector<16x16xf32>
      %c0_123 = arith.constant 0 : index
      %c2_124 = arith.constant 2 : index
      %c0_125 = arith.constant 0 : index
      %c0_126 = arith.constant 0 : index
      %224 = vector.load %arg9[%c0_123, %c2_124, %c0_125, %c0_126] : memref<1x4x16x16xf32, #tpu.memory_space<vmem>>, vector<1x1x16x16xf32>
      %225 = vector.shape_cast %224 : vector<1x1x16x16xf32> to vector<16x16xf32>
      %226 = vector.shape_cast %223 : vector<16x16xf32> to vector<1x1x16x16xf32>
      tpu.vector_store %arg9[%c0_123, %c2_124, %c0_125, %c0_126], %226 {strides = array<i32>} : memref<1x4x16x16xf32, #tpu.memory_space<vmem>>, vector<1x1x16x16xf32>,
      %c3_127 = arith.constant 3 : index
      %227 = memref.load %arg6[%c3_127] : memref<4xf32, #tpu.memory_space<smem>>
      %228 = vector.broadcast %227 : f32 to vector<16x16xf32>
      %c33 = arith.constant 33 : index
      %229 = memref.load %arg5[%c33] : memref<44xf32, #tpu.memory_space<smem>>
      %c3_128 = arith.constant 3 : index
      %c5_129 = arith.constant 5 : index
      %c0_130 = arith.constant 0 : index
      %230 = vector.load %arg10[%c3_128, %c5_129, %c0_130] : memref<4x26x26xf32, #tpu.memory_space<vmem>>, vector<1x16x16xf32>
      %231 = vector.shape_cast %230 : vector<1x16x16xf32> to vector<16x16xf32>
      %232 = vector.broadcast %229 : f32 to vector<16x16xf32>
      %233 = arith.mulf %232, %231 : vector<16x16xf32>
      %234 = arith.addf %228, %233 : vector<16x16xf32>
      %c34 = arith.constant 34 : index
      %235 = memref.load %arg5[%c34] : memref<44xf32, #tpu.memory_space<smem>>
      %c3_131 = arith.constant 3 : index
      %c5_132 = arith.constant 5 : index
      %c1_133 = arith.constant 1 : index
      %236 = vector.load %arg10[%c3_131, %c5_132, %c1_133] : memref<4x26x26xf32, #tpu.memory_space<vmem>>, vector<1x16x16xf32>
      %237 = vector.shape_cast %236 : vector<1x16x16xf32> to vector<16x16xf32>
      %238 = vector.broadcast %235 : f32 to vector<16x16xf32>
      %239 = arith.mulf %238, %237 : vector<16x16xf32>
      %240 = arith.addf %234, %239 : vector<16x16xf32>
      %c35 = arith.constant 35 : index
      %241 = memref.load %arg5[%c35] : memref<44xf32, #tpu.memory_space<smem>>
      %c3_134 = arith.constant 3 : index
      %c5_135 = arith.constant 5 : index
      %c2_136 = arith.constant 2 : index
      %242 = vector.load %arg10[%c3_134, %c5_135, %c2_136] : memref<4x26x26xf32, #tpu.memory_space<vmem>>, vector<1x16x16xf32>
      %243 = vector.shape_cast %242 : vector<1x16x16xf32> to vector<16x16xf32>
      %244 = vector.broadcast %241 : f32 to vector<16x16xf32>
      %245 = arith.mulf %244, %243 : vector<16x16xf32>
      %246 = arith.addf %240, %245 : vector<16x16xf32>
      %c36 = arith.constant 36 : index
      %247 = memref.load %arg5[%c36] : memref<44xf32, #tpu.memory_space<smem>>
      %c3_137 = arith.constant 3 : index
      %c5_138 = arith.constant 5 : index
      %c3_139 = arith.constant 3 : index
      %248 = vector.load %arg10[%c3_137, %c5_138, %c3_139] : memref<4x26x26xf32, #tpu.memory_space<vmem>>, vector<1x16x16xf32>
      %249 = vector.shape_cast %248 : vector<1x16x16xf32> to vector<16x16xf32>
      %250 = vector.broadcast %247 : f32 to vector<16x16xf32>
      %251 = arith.mulf %250, %249 : vector<16x16xf32>
      %252 = arith.addf %246, %251 : vector<16x16xf32>
      %c37 = arith.constant 37 : index
      %253 = memref.load %arg5[%c37] : memref<44xf32, #tpu.memory_space<smem>>
      %c3_140 = arith.constant 3 : index
      %c5_141 = arith.constant 5 : index
      %c4_142 = arith.constant 4 : index
      %254 = vector.load %arg10[%c3_140, %c5_141, %c4_142] : memref<4x26x26xf32, #tpu.memory_space<vmem>>, vector<1x16x16xf32>
      %255 = vector.shape_cast %254 : vector<1x16x16xf32> to vector<16x16xf32>
      %256 = vector.broadcast %253 : f32 to vector<16x16xf32>
      %257 = arith.mulf %256, %255 : vector<16x16xf32>
      %258 = arith.addf %252, %257 : vector<16x16xf32>
      %c38 = arith.constant 38 : index
      %259 = memref.load %arg5[%c38] : memref<44xf32, #tpu.memory_space<smem>>
      %c3_143 = arith.constant 3 : index
      %c5_144 = arith.constant 5 : index
      %c5_145 = arith.constant 5 : index
      %260 = vector.load %arg10[%c3_143, %c5_144, %c5_145] : memref<4x26x26xf32, #tpu.memory_space<vmem>>, vector<1x16x16xf32>
      %261 = vector.shape_cast %260 : vector<1x16x16xf32> to vector<16x16xf32>
      %262 = vector.broadcast %259 : f32 to vector<16x16xf32>
      %263 = arith.mulf %262, %261 : vector<16x16xf32>
      %264 = arith.addf %258, %263 : vector<16x16xf32>
      %c39 = arith.constant 39 : index
      %265 = memref.load %arg5[%c39] : memref<44xf32, #tpu.memory_space<smem>>
      %c3_146 = arith.constant 3 : index
      %c5_147 = arith.constant 5 : index
      %c6_148 = arith.constant 6 : index
      %266 = vector.load %arg10[%c3_146, %c5_147, %c6_148] : memref<4x26x26xf32, #tpu.memory_space<vmem>>, vector<1x16x16xf32>
      %267 = vector.shape_cast %266 : vector<1x16x16xf32> to vector<16x16xf32>
      %268 = vector.broadcast %265 : f32 to vector<16x16xf32>
      %269 = arith.mulf %268, %267 : vector<16x16xf32>
      %270 = arith.addf %264, %269 : vector<16x16xf32>
      %c40 = arith.constant 40 : index
      %271 = memref.load %arg5[%c40] : memref<44xf32, #tpu.memory_space<smem>>
      %c3_149 = arith.constant 3 : index
      %c5_150 = arith.constant 5 : index
      %c7_151 = arith.constant 7 : index
      %272 = vector.load %arg10[%c3_149, %c5_150, %c7_151] : memref<4x26x26xf32, #tpu.memory_space<vmem>>, vector<1x16x16xf32>
      %273 = vector.shape_cast %272 : vector<1x16x16xf32> to vector<16x16xf32>
      %274 = vector.broadcast %271 : f32 to vector<16x16xf32>
      %275 = arith.mulf %274, %273 : vector<16x16xf32>
      %276 = arith.addf %270, %275 : vector<16x16xf32>
      %c41 = arith.constant 41 : index
      %277 = memref.load %arg5[%c41] : memref<44xf32, #tpu.memory_space<smem>>
      %c3_152 = arith.constant 3 : index
      %c5_153 = arith.constant 5 : index
      %c8_154 = arith.constant 8 : index
      %278 = vector.load %arg10[%c3_152, %c5_153, %c8_154] : memref<4x26x26xf32, #tpu.memory_space<vmem>>, vector<1x16x16xf32>
      %279 = vector.shape_cast %278 : vector<1x16x16xf32> to vector<16x16xf32>
      %280 = vector.broadcast %277 : f32 to vector<16x16xf32>
      %281 = arith.mulf %280, %279 : vector<16x16xf32>
      %282 = arith.addf %276, %281 : vector<16x16xf32>
      %c42 = arith.constant 42 : index
      %283 = memref.load %arg5[%c42] : memref<44xf32, #tpu.memory_space<smem>>
      %c3_155 = arith.constant 3 : index
      %c5_156 = arith.constant 5 : index
      %c9_157 = arith.constant 9 : index
      %284 = vector.load %arg10[%c3_155, %c5_156, %c9_157] : memref<4x26x26xf32, #tpu.memory_space<vmem>>, vector<1x16x16xf32>
      %285 = vector.shape_cast %284 : vector<1x16x16xf32> to vector<16x16xf32>
      %286 = vector.broadcast %283 : f32 to vector<16x16xf32>
      %287 = arith.mulf %286, %285 : vector<16x16xf32>
      %288 = arith.addf %282, %287 : vector<16x16xf32>
      %c43 = arith.constant 43 : index
      %289 = memref.load %arg5[%c43] : memref<44xf32, #tpu.memory_space<smem>>
      %c3_158 = arith.constant 3 : index
      %c5_159 = arith.constant 5 : index
      %c10_160 = arith.constant 10 : index
      %290 = vector.load %arg10[%c3_158, %c5_159, %c10_160] : memref<4x26x26xf32, #tpu.memory_space<vmem>>, vector<1x16x16xf32>
      %291 = vector.shape_cast %290 : vector<1x16x16xf32> to vector<16x16xf32>
      %292 = vector.broadcast %289 : f32 to vector<16x16xf32>
      %293 = arith.mulf %292, %291 : vector<16x16xf32>
      %294 = arith.addf %288, %293 : vector<16x16xf32>
      %c0_161 = arith.constant 0 : index
      %c3_162 = arith.constant 3 : index
      %c0_163 = arith.constant 0 : index
      %c0_164 = arith.constant 0 : index
      %295 = vector.load %arg9[%c0_161, %c3_162, %c0_163, %c0_164] : memref<1x4x16x16xf32, #tpu.memory_space<vmem>>, vector<1x1x16x16xf32>
      %296 = vector.shape_cast %295 : vector<1x1x16x16xf32> to vector<16x16xf32>
      %297 = vector.shape_cast %294 : vector<16x16xf32> to vector<1x1x16x16xf32>
      tpu.vector_store %arg9[%c0_161, %c3_162, %c0_163, %c0_164], %297 {strides = array<i32>} : memref<1x4x16x16xf32, #tpu.memory_space<vmem>>, vector<1x1x16x16xf32>,
    } else {
    }
    %c2_i32 = arith.constant 2 : i32
    %11 = arith.cmpi eq, %arg1, %c2_i32 : i32
    %12 = arith.extui %11 : i1 to i32
    %c0_i32_10 = arith.constant 0 : i32
    %13 = arith.cmpi ne, %12, %c0_i32_10 : i32
    scf.if %13 {
      %c0_11 = arith.constant 0 : index
      %14 = memref.load %arg8[%c0_11] : memref<4xf32, #tpu.memory_space<smem>>
      %15 = vector.broadcast %14 : f32 to vector<16x16xf32>
      %c0_12 = arith.constant 0 : index
      %16 = memref.load %arg7[%c0_12] : memref<44xf32, #tpu.memory_space<smem>>
      %c0_13 = arith.constant 0 : index
      %c0_14 = arith.constant 0 : index
      %c5_15 = arith.constant 5 : index
      %17 = vector.load %arg10[%c0_13, %c0_14, %c5_15] : memref<4x26x26xf32, #tpu.memory_space<vmem>>, vector<1x16x16xf32>
      %18 = vector.shape_cast %17 : vector<1x16x16xf32> to vector<16x16xf32>
      %19 = vector.broadcast %16 : f32 to vector<16x16xf32>
      %20 = arith.mulf %19, %18 : vector<16x16xf32>
      %21 = arith.addf %15, %20 : vector<16x16xf32>
      %c1 = arith.constant 1 : index
      %22 = memref.load %arg7[%c1] : memref<44xf32, #tpu.memory_space<smem>>
      %c0_16 = arith.constant 0 : index
      %c1_17 = arith.constant 1 : index
      %c5_18 = arith.constant 5 : index
      %23 = vector.load %arg10[%c0_16, %c1_17, %c5_18] : memref<4x26x26xf32, #tpu.memory_space<vmem>>, vector<1x16x16xf32>
      %24 = vector.shape_cast %23 : vector<1x16x16xf32> to vector<16x16xf32>
      %25 = vector.broadcast %22 : f32 to vector<16x16xf32>
      %26 = arith.mulf %25, %24 : vector<16x16xf32>
      %27 = arith.addf %21, %26 : vector<16x16xf32>
      %c2 = arith.constant 2 : index
      %28 = memref.load %arg7[%c2] : memref<44xf32, #tpu.memory_space<smem>>
      %c0_19 = arith.constant 0 : index
      %c2_20 = arith.constant 2 : index
      %c5_21 = arith.constant 5 : index
      %29 = vector.load %arg10[%c0_19, %c2_20, %c5_21] : memref<4x26x26xf32, #tpu.memory_space<vmem>>, vector<1x16x16xf32>
      %30 = vector.shape_cast %29 : vector<1x16x16xf32> to vector<16x16xf32>
      %31 = vector.broadcast %28 : f32 to vector<16x16xf32>
      %32 = arith.mulf %31, %30 : vector<16x16xf32>
      %33 = arith.addf %27, %32 : vector<16x16xf32>
      %c3 = arith.constant 3 : index
      %34 = memref.load %arg7[%c3] : memref<44xf32, #tpu.memory_space<smem>>
      %c0_22 = arith.constant 0 : index
      %c3_23 = arith.constant 3 : index
      %c5_24 = arith.constant 5 : index
      %35 = vector.load %arg10[%c0_22, %c3_23, %c5_24] : memref<4x26x26xf32, #tpu.memory_space<vmem>>, vector<1x16x16xf32>
      %36 = vector.shape_cast %35 : vector<1x16x16xf32> to vector<16x16xf32>
      %37 = vector.broadcast %34 : f32 to vector<16x16xf32>
      %38 = arith.mulf %37, %36 : vector<16x16xf32>
      %39 = arith.addf %33, %38 : vector<16x16xf32>
      %c4 = arith.constant 4 : index
      %40 = memref.load %arg7[%c4] : memref<44xf32, #tpu.memory_space<smem>>
      %c0_25 = arith.constant 0 : index
      %c4_26 = arith.constant 4 : index
      %c5_27 = arith.constant 5 : index
      %41 = vector.load %arg10[%c0_25, %c4_26, %c5_27] : memref<4x26x26xf32, #tpu.memory_space<vmem>>, vector<1x16x16xf32>
      %42 = vector.shape_cast %41 : vector<1x16x16xf32> to vector<16x16xf32>
      %43 = vector.broadcast %40 : f32 to vector<16x16xf32>
      %44 = arith.mulf %43, %42 : vector<16x16xf32>
      %45 = arith.addf %39, %44 : vector<16x16xf32>
      %c5_28 = arith.constant 5 : index
      %46 = memref.load %arg7[%c5_28] : memref<44xf32, #tpu.memory_space<smem>>
      %c0_29 = arith.constant 0 : index
      %c5_30 = arith.constant 5 : index
      %c5_31 = arith.constant 5 : index
      %47 = vector.load %arg10[%c0_29, %c5_30, %c5_31] : memref<4x26x26xf32, #tpu.memory_space<vmem>>, vector<1x16x16xf32>
      %48 = vector.shape_cast %47 : vector<1x16x16xf32> to vector<16x16xf32>
      %49 = vector.broadcast %46 : f32 to vector<16x16xf32>
      %50 = arith.mulf %49, %48 : vector<16x16xf32>
      %51 = arith.addf %45, %50 : vector<16x16xf32>
      %c6 = arith.constant 6 : index
      %52 = memref.load %arg7[%c6] : memref<44xf32, #tpu.memory_space<smem>>
      %c0_32 = arith.constant 0 : index
      %c6_33 = arith.constant 6 : index
      %c5_34 = arith.constant 5 : index
      %53 = vector.load %arg10[%c0_32, %c6_33, %c5_34] : memref<4x26x26xf32, #tpu.memory_space<vmem>>, vector<1x16x16xf32>
      %54 = vector.shape_cast %53 : vector<1x16x16xf32> to vector<16x16xf32>
      %55 = vector.broadcast %52 : f32 to vector<16x16xf32>
      %56 = arith.mulf %55, %54 : vector<16x16xf32>
      %57 = arith.addf %51, %56 : vector<16x16xf32>
      %c7 = arith.constant 7 : index
      %58 = memref.load %arg7[%c7] : memref<44xf32, #tpu.memory_space<smem>>
      %c0_35 = arith.constant 0 : index
      %c7_36 = arith.constant 7 : index
      %c5_37 = arith.constant 5 : index
      %59 = vector.load %arg10[%c0_35, %c7_36, %c5_37] : memref<4x26x26xf32, #tpu.memory_space<vmem>>, vector<1x16x16xf32>
      %60 = vector.shape_cast %59 : vector<1x16x16xf32> to vector<16x16xf32>
      %61 = vector.broadcast %58 : f32 to vector<16x16xf32>
      %62 = arith.mulf %61, %60 : vector<16x16xf32>
      %63 = arith.addf %57, %62 : vector<16x16xf32>
      %c8 = arith.constant 8 : index
      %64 = memref.load %arg7[%c8] : memref<44xf32, #tpu.memory_space<smem>>
      %c0_38 = arith.constant 0 : index
      %c8_39 = arith.constant 8 : index
      %c5_40 = arith.constant 5 : index
      %65 = vector.load %arg10[%c0_38, %c8_39, %c5_40] : memref<4x26x26xf32, #tpu.memory_space<vmem>>, vector<1x16x16xf32>
      %66 = vector.shape_cast %65 : vector<1x16x16xf32> to vector<16x16xf32>
      %67 = vector.broadcast %64 : f32 to vector<16x16xf32>
      %68 = arith.mulf %67, %66 : vector<16x16xf32>
      %69 = arith.addf %63, %68 : vector<16x16xf32>
      %c9 = arith.constant 9 : index
      %70 = memref.load %arg7[%c9] : memref<44xf32, #tpu.memory_space<smem>>
      %c0_41 = arith.constant 0 : index
      %c9_42 = arith.constant 9 : index
      %c5_43 = arith.constant 5 : index
      %71 = vector.load %arg10[%c0_41, %c9_42, %c5_43] : memref<4x26x26xf32, #tpu.memory_space<vmem>>, vector<1x16x16xf32>
      %72 = vector.shape_cast %71 : vector<1x16x16xf32> to vector<16x16xf32>
      %73 = vector.broadcast %70 : f32 to vector<16x16xf32>
      %74 = arith.mulf %73, %72 : vector<16x16xf32>
      %75 = arith.addf %69, %74 : vector<16x16xf32>
      %c10 = arith.constant 10 : index
      %76 = memref.load %arg7[%c10] : memref<44xf32, #tpu.memory_space<smem>>
      %c0_44 = arith.constant 0 : index
      %c10_45 = arith.constant 10 : index
      %c5_46 = arith.constant 5 : index
      %77 = vector.load %arg10[%c0_44, %c10_45, %c5_46] : memref<4x26x26xf32, #tpu.memory_space<vmem>>, vector<1x16x16xf32>
      %78 = vector.shape_cast %77 : vector<1x16x16xf32> to vector<16x16xf32>
      %79 = vector.broadcast %76 : f32 to vector<16x16xf32>
      %80 = arith.mulf %79, %78 : vector<16x16xf32>
      %81 = arith.addf %75, %80 : vector<16x16xf32>
      %c0_47 = arith.constant 0 : index
      %c0_48 = arith.constant 0 : index
      %c0_49 = arith.constant 0 : index
      %c0_50 = arith.constant 0 : index
      %82 = vector.load %arg9[%c0_47, %c0_48, %c0_49, %c0_50] : memref<1x4x16x16xf32, #tpu.memory_space<vmem>>, vector<1x1x16x16xf32>
      %83 = vector.shape_cast %82 : vector<1x1x16x16xf32> to vector<16x16xf32>
      %84 = vector.shape_cast %81 : vector<16x16xf32> to vector<1x1x16x16xf32>
      tpu.vector_store %arg9[%c0_47, %c0_48, %c0_49, %c0_50], %84 {strides = array<i32>} : memref<1x4x16x16xf32, #tpu.memory_space<vmem>>, vector<1x1x16x16xf32>,
      %c1_51 = arith.constant 1 : index
      %85 = memref.load %arg8[%c1_51] : memref<4xf32, #tpu.memory_space<smem>>
      %86 = vector.broadcast %85 : f32 to vector<16x16xf32>
      %c11 = arith.constant 11 : index
      %87 = memref.load %arg7[%c11] : memref<44xf32, #tpu.memory_space<smem>>
      %c1_52 = arith.constant 1 : index
      %c0_53 = arith.constant 0 : index
      %c5_54 = arith.constant 5 : index
      %88 = vector.load %arg10[%c1_52, %c0_53, %c5_54] : memref<4x26x26xf32, #tpu.memory_space<vmem>>, vector<1x16x16xf32>
      %89 = vector.shape_cast %88 : vector<1x16x16xf32> to vector<16x16xf32>
      %90 = vector.broadcast %87 : f32 to vector<16x16xf32>
      %91 = arith.mulf %90, %89 : vector<16x16xf32>
      %92 = arith.addf %86, %91 : vector<16x16xf32>
      %c12 = arith.constant 12 : index
      %93 = memref.load %arg7[%c12] : memref<44xf32, #tpu.memory_space<smem>>
      %c1_55 = arith.constant 1 : index
      %c1_56 = arith.constant 1 : index
      %c5_57 = arith.constant 5 : index
      %94 = vector.load %arg10[%c1_55, %c1_56, %c5_57] : memref<4x26x26xf32, #tpu.memory_space<vmem>>, vector<1x16x16xf32>
      %95 = vector.shape_cast %94 : vector<1x16x16xf32> to vector<16x16xf32>
      %96 = vector.broadcast %93 : f32 to vector<16x16xf32>
      %97 = arith.mulf %96, %95 : vector<16x16xf32>
      %98 = arith.addf %92, %97 : vector<16x16xf32>
      %c13 = arith.constant 13 : index
      %99 = memref.load %arg7[%c13] : memref<44xf32, #tpu.memory_space<smem>>
      %c1_58 = arith.constant 1 : index
      %c2_59 = arith.constant 2 : index
      %c5_60 = arith.constant 5 : index
      %100 = vector.load %arg10[%c1_58, %c2_59, %c5_60] : memref<4x26x26xf32, #tpu.memory_space<vmem>>, vector<1x16x16xf32>
      %101 = vector.shape_cast %100 : vector<1x16x16xf32> to vector<16x16xf32>
      %102 = vector.broadcast %99 : f32 to vector<16x16xf32>
      %103 = arith.mulf %102, %101 : vector<16x16xf32>
      %104 = arith.addf %98, %103 : vector<16x16xf32>
      %c14 = arith.constant 14 : index
      %105 = memref.load %arg7[%c14] : memref<44xf32, #tpu.memory_space<smem>>
      %c1_61 = arith.constant 1 : index
      %c3_62 = arith.constant 3 : index
      %c5_63 = arith.constant 5 : index
      %106 = vector.load %arg10[%c1_61, %c3_62, %c5_63] : memref<4x26x26xf32, #tpu.memory_space<vmem>>, vector<1x16x16xf32>
      %107 = vector.shape_cast %106 : vector<1x16x16xf32> to vector<16x16xf32>
      %108 = vector.broadcast %105 : f32 to vector<16x16xf32>
      %109 = arith.mulf %108, %107 : vector<16x16xf32>
      %110 = arith.addf %104, %109 : vector<16x16xf32>
      %c15 = arith.constant 15 : index
      %111 = memref.load %arg7[%c15] : memref<44xf32, #tpu.memory_space<smem>>
      %c1_64 = arith.constant 1 : index
      %c4_65 = arith.constant 4 : index
      %c5_66 = arith.constant 5 : index
      %112 = vector.load %arg10[%c1_64, %c4_65, %c5_66] : memref<4x26x26xf32, #tpu.memory_space<vmem>>, vector<1x16x16xf32>
      %113 = vector.shape_cast %112 : vector<1x16x16xf32> to vector<16x16xf32>
      %114 = vector.broadcast %111 : f32 to vector<16x16xf32>
      %115 = arith.mulf %114, %113 : vector<16x16xf32>
      %116 = arith.addf %110, %115 : vector<16x16xf32>
      %c16 = arith.constant 16 : index
      %117 = memref.load %arg7[%c16] : memref<44xf32, #tpu.memory_space<smem>>
      %c1_67 = arith.constant 1 : index
      %c5_68 = arith.constant 5 : index
      %c5_69 = arith.constant 5 : index
      %118 = vector.load %arg10[%c1_67, %c5_68, %c5_69] : memref<4x26x26xf32, #tpu.memory_space<vmem>>, vector<1x16x16xf32>
      %119 = vector.shape_cast %118 : vector<1x16x16xf32> to vector<16x16xf32>
      %120 = vector.broadcast %117 : f32 to vector<16x16xf32>
      %121 = arith.mulf %120, %119 : vector<16x16xf32>
      %122 = arith.addf %116, %121 : vector<16x16xf32>
      %c17 = arith.constant 17 : index
      %123 = memref.load %arg7[%c17] : memref<44xf32, #tpu.memory_space<smem>>
      %c1_70 = arith.constant 1 : index
      %c6_71 = arith.constant 6 : index
      %c5_72 = arith.constant 5 : index
      %124 = vector.load %arg10[%c1_70, %c6_71, %c5_72] : memref<4x26x26xf32, #tpu.memory_space<vmem>>, vector<1x16x16xf32>
      %125 = vector.shape_cast %124 : vector<1x16x16xf32> to vector<16x16xf32>
      %126 = vector.broadcast %123 : f32 to vector<16x16xf32>
      %127 = arith.mulf %126, %125 : vector<16x16xf32>
      %128 = arith.addf %122, %127 : vector<16x16xf32>
      %c18 = arith.constant 18 : index
      %129 = memref.load %arg7[%c18] : memref<44xf32, #tpu.memory_space<smem>>
      %c1_73 = arith.constant 1 : index
      %c7_74 = arith.constant 7 : index
      %c5_75 = arith.constant 5 : index
      %130 = vector.load %arg10[%c1_73, %c7_74, %c5_75] : memref<4x26x26xf32, #tpu.memory_space<vmem>>, vector<1x16x16xf32>
      %131 = vector.shape_cast %130 : vector<1x16x16xf32> to vector<16x16xf32>
      %132 = vector.broadcast %129 : f32 to vector<16x16xf32>
      %133 = arith.mulf %132, %131 : vector<16x16xf32>
      %134 = arith.addf %128, %133 : vector<16x16xf32>
      %c19 = arith.constant 19 : index
      %135 = memref.load %arg7[%c19] : memref<44xf32, #tpu.memory_space<smem>>
      %c1_76 = arith.constant 1 : index
      %c8_77 = arith.constant 8 : index
      %c5_78 = arith.constant 5 : index
      %136 = vector.load %arg10[%c1_76, %c8_77, %c5_78] : memref<4x26x26xf32, #tpu.memory_space<vmem>>, vector<1x16x16xf32>
      %137 = vector.shape_cast %136 : vector<1x16x16xf32> to vector<16x16xf32>
      %138 = vector.broadcast %135 : f32 to vector<16x16xf32>
      %139 = arith.mulf %138, %137 : vector<16x16xf32>
      %140 = arith.addf %134, %139 : vector<16x16xf32>
      %c20 = arith.constant 20 : index
      %141 = memref.load %arg7[%c20] : memref<44xf32, #tpu.memory_space<smem>>
      %c1_79 = arith.constant 1 : index
      %c9_80 = arith.constant 9 : index
      %c5_81 = arith.constant 5 : index
      %142 = vector.load %arg10[%c1_79, %c9_80, %c5_81] : memref<4x26x26xf32, #tpu.memory_space<vmem>>, vector<1x16x16xf32>
      %143 = vector.shape_cast %142 : vector<1x16x16xf32> to vector<16x16xf32>
      %144 = vector.broadcast %141 : f32 to vector<16x16xf32>
      %145 = arith.mulf %144, %143 : vector<16x16xf32>
      %146 = arith.addf %140, %145 : vector<16x16xf32>
      %c21 = arith.constant 21 : index
      %147 = memref.load %arg7[%c21] : memref<44xf32, #tpu.memory_space<smem>>
      %c1_82 = arith.constant 1 : index
      %c10_83 = arith.constant 10 : index
      %c5_84 = arith.constant 5 : index
      %148 = vector.load %arg10[%c1_82, %c10_83, %c5_84] : memref<4x26x26xf32, #tpu.memory_space<vmem>>, vector<1x16x16xf32>
      %149 = vector.shape_cast %148 : vector<1x16x16xf32> to vector<16x16xf32>
      %150 = vector.broadcast %147 : f32 to vector<16x16xf32>
      %151 = arith.mulf %150, %149 : vector<16x16xf32>
      %152 = arith.addf %146, %151 : vector<16x16xf32>
      %c0_85 = arith.constant 0 : index
      %c1_86 = arith.constant 1 : index
      %c0_87 = arith.constant 0 : index
      %c0_88 = arith.constant 0 : index
      %153 = vector.load %arg9[%c0_85, %c1_86, %c0_87, %c0_88] : memref<1x4x16x16xf32, #tpu.memory_space<vmem>>, vector<1x1x16x16xf32>
      %154 = vector.shape_cast %153 : vector<1x1x16x16xf32> to vector<16x16xf32>
      %155 = vector.shape_cast %152 : vector<16x16xf32> to vector<1x1x16x16xf32>
      tpu.vector_store %arg9[%c0_85, %c1_86, %c0_87, %c0_88], %155 {strides = array<i32>} : memref<1x4x16x16xf32, #tpu.memory_space<vmem>>, vector<1x1x16x16xf32>,
      %c2_89 = arith.constant 2 : index
      %156 = memref.load %arg8[%c2_89] : memref<4xf32, #tpu.memory_space<smem>>
      %157 = vector.broadcast %156 : f32 to vector<16x16xf32>
      %c22 = arith.constant 22 : index
      %158 = memref.load %arg7[%c22] : memref<44xf32, #tpu.memory_space<smem>>
      %c2_90 = arith.constant 2 : index
      %c0_91 = arith.constant 0 : index
      %c5_92 = arith.constant 5 : index
      %159 = vector.load %arg10[%c2_90, %c0_91, %c5_92] : memref<4x26x26xf32, #tpu.memory_space<vmem>>, vector<1x16x16xf32>
      %160 = vector.shape_cast %159 : vector<1x16x16xf32> to vector<16x16xf32>
      %161 = vector.broadcast %158 : f32 to vector<16x16xf32>
      %162 = arith.mulf %161, %160 : vector<16x16xf32>
      %163 = arith.addf %157, %162 : vector<16x16xf32>
      %c23 = arith.constant 23 : index
      %164 = memref.load %arg7[%c23] : memref<44xf32, #tpu.memory_space<smem>>
      %c2_93 = arith.constant 2 : index
      %c1_94 = arith.constant 1 : index
      %c5_95 = arith.constant 5 : index
      %165 = vector.load %arg10[%c2_93, %c1_94, %c5_95] : memref<4x26x26xf32, #tpu.memory_space<vmem>>, vector<1x16x16xf32>
      %166 = vector.shape_cast %165 : vector<1x16x16xf32> to vector<16x16xf32>
      %167 = vector.broadcast %164 : f32 to vector<16x16xf32>
      %168 = arith.mulf %167, %166 : vector<16x16xf32>
      %169 = arith.addf %163, %168 : vector<16x16xf32>
      %c24 = arith.constant 24 : index
      %170 = memref.load %arg7[%c24] : memref<44xf32, #tpu.memory_space<smem>>
      %c2_96 = arith.constant 2 : index
      %c2_97 = arith.constant 2 : index
      %c5_98 = arith.constant 5 : index
      %171 = vector.load %arg10[%c2_96, %c2_97, %c5_98] : memref<4x26x26xf32, #tpu.memory_space<vmem>>, vector<1x16x16xf32>
      %172 = vector.shape_cast %171 : vector<1x16x16xf32> to vector<16x16xf32>
      %173 = vector.broadcast %170 : f32 to vector<16x16xf32>
      %174 = arith.mulf %173, %172 : vector<16x16xf32>
      %175 = arith.addf %169, %174 : vector<16x16xf32>
      %c25 = arith.constant 25 : index
      %176 = memref.load %arg7[%c25] : memref<44xf32, #tpu.memory_space<smem>>
      %c2_99 = arith.constant 2 : index
      %c3_100 = arith.constant 3 : index
      %c5_101 = arith.constant 5 : index
      %177 = vector.load %arg10[%c2_99, %c3_100, %c5_101] : memref<4x26x26xf32, #tpu.memory_space<vmem>>, vector<1x16x16xf32>
      %178 = vector.shape_cast %177 : vector<1x16x16xf32> to vector<16x16xf32>
      %179 = vector.broadcast %176 : f32 to vector<16x16xf32>
      %180 = arith.mulf %179, %178 : vector<16x16xf32>
      %181 = arith.addf %175, %180 : vector<16x16xf32>
      %c26 = arith.constant 26 : index
      %182 = memref.load %arg7[%c26] : memref<44xf32, #tpu.memory_space<smem>>
      %c2_102 = arith.constant 2 : index
      %c4_103 = arith.constant 4 : index
      %c5_104 = arith.constant 5 : index
      %183 = vector.load %arg10[%c2_102, %c4_103, %c5_104] : memref<4x26x26xf32, #tpu.memory_space<vmem>>, vector<1x16x16xf32>
      %184 = vector.shape_cast %183 : vector<1x16x16xf32> to vector<16x16xf32>
      %185 = vector.broadcast %182 : f32 to vector<16x16xf32>
      %186 = arith.mulf %185, %184 : vector<16x16xf32>
      %187 = arith.addf %181, %186 : vector<16x16xf32>
      %c27 = arith.constant 27 : index
      %188 = memref.load %arg7[%c27] : memref<44xf32, #tpu.memory_space<smem>>
      %c2_105 = arith.constant 2 : index
      %c5_106 = arith.constant 5 : index
      %c5_107 = arith.constant 5 : index
      %189 = vector.load %arg10[%c2_105, %c5_106, %c5_107] : memref<4x26x26xf32, #tpu.memory_space<vmem>>, vector<1x16x16xf32>
      %190 = vector.shape_cast %189 : vector<1x16x16xf32> to vector<16x16xf32>
      %191 = vector.broadcast %188 : f32 to vector<16x16xf32>
      %192 = arith.mulf %191, %190 : vector<16x16xf32>
      %193 = arith.addf %187, %192 : vector<16x16xf32>
      %c28 = arith.constant 28 : index
      %194 = memref.load %arg7[%c28] : memref<44xf32, #tpu.memory_space<smem>>
      %c2_108 = arith.constant 2 : index
      %c6_109 = arith.constant 6 : index
      %c5_110 = arith.constant 5 : index
      %195 = vector.load %arg10[%c2_108, %c6_109, %c5_110] : memref<4x26x26xf32, #tpu.memory_space<vmem>>, vector<1x16x16xf32>
      %196 = vector.shape_cast %195 : vector<1x16x16xf32> to vector<16x16xf32>
      %197 = vector.broadcast %194 : f32 to vector<16x16xf32>
      %198 = arith.mulf %197, %196 : vector<16x16xf32>
      %199 = arith.addf %193, %198 : vector<16x16xf32>
      %c29 = arith.constant 29 : index
      %200 = memref.load %arg7[%c29] : memref<44xf32, #tpu.memory_space<smem>>
      %c2_111 = arith.constant 2 : index
      %c7_112 = arith.constant 7 : index
      %c5_113 = arith.constant 5 : index
      %201 = vector.load %arg10[%c2_111, %c7_112, %c5_113] : memref<4x26x26xf32, #tpu.memory_space<vmem>>, vector<1x16x16xf32>
      %202 = vector.shape_cast %201 : vector<1x16x16xf32> to vector<16x16xf32>
      %203 = vector.broadcast %200 : f32 to vector<16x16xf32>
      %204 = arith.mulf %203, %202 : vector<16x16xf32>
      %205 = arith.addf %199, %204 : vector<16x16xf32>
      %c30 = arith.constant 30 : index
      %206 = memref.load %arg7[%c30] : memref<44xf32, #tpu.memory_space<smem>>
      %c2_114 = arith.constant 2 : index
      %c8_115 = arith.constant 8 : index
      %c5_116 = arith.constant 5 : index
      %207 = vector.load %arg10[%c2_114, %c8_115, %c5_116] : memref<4x26x26xf32, #tpu.memory_space<vmem>>, vector<1x16x16xf32>
      %208 = vector.shape_cast %207 : vector<1x16x16xf32> to vector<16x16xf32>
      %209 = vector.broadcast %206 : f32 to vector<16x16xf32>
      %210 = arith.mulf %209, %208 : vector<16x16xf32>
      %211 = arith.addf %205, %210 : vector<16x16xf32>
      %c31 = arith.constant 31 : index
      %212 = memref.load %arg7[%c31] : memref<44xf32, #tpu.memory_space<smem>>
      %c2_117 = arith.constant 2 : index
      %c9_118 = arith.constant 9 : index
      %c5_119 = arith.constant 5 : index
      %213 = vector.load %arg10[%c2_117, %c9_118, %c5_119] : memref<4x26x26xf32, #tpu.memory_space<vmem>>, vector<1x16x16xf32>
      %214 = vector.shape_cast %213 : vector<1x16x16xf32> to vector<16x16xf32>
      %215 = vector.broadcast %212 : f32 to vector<16x16xf32>
      %216 = arith.mulf %215, %214 : vector<16x16xf32>
      %217 = arith.addf %211, %216 : vector<16x16xf32>
      %c32 = arith.constant 32 : index
      %218 = memref.load %arg7[%c32] : memref<44xf32, #tpu.memory_space<smem>>
      %c2_120 = arith.constant 2 : index
      %c10_121 = arith.constant 10 : index
      %c5_122 = arith.constant 5 : index
      %219 = vector.load %arg10[%c2_120, %c10_121, %c5_122] : memref<4x26x26xf32, #tpu.memory_space<vmem>>, vector<1x16x16xf32>
      %220 = vector.shape_cast %219 : vector<1x16x16xf32> to vector<16x16xf32>
      %221 = vector.broadcast %218 : f32 to vector<16x16xf32>
      %222 = arith.mulf %221, %220 : vector<16x16xf32>
      %223 = arith.addf %217, %222 : vector<16x16xf32>
      %c0_123 = arith.constant 0 : index
      %c2_124 = arith.constant 2 : index
      %c0_125 = arith.constant 0 : index
      %c0_126 = arith.constant 0 : index
      %224 = vector.load %arg9[%c0_123, %c2_124, %c0_125, %c0_126] : memref<1x4x16x16xf32, #tpu.memory_space<vmem>>, vector<1x1x16x16xf32>
      %225 = vector.shape_cast %224 : vector<1x1x16x16xf32> to vector<16x16xf32>
      %226 = vector.shape_cast %223 : vector<16x16xf32> to vector<1x1x16x16xf32>
      tpu.vector_store %arg9[%c0_123, %c2_124, %c0_125, %c0_126], %226 {strides = array<i32>} : memref<1x4x16x16xf32, #tpu.memory_space<vmem>>, vector<1x1x16x16xf32>,
      %c3_127 = arith.constant 3 : index
      %227 = memref.load %arg8[%c3_127] : memref<4xf32, #tpu.memory_space<smem>>
      %228 = vector.broadcast %227 : f32 to vector<16x16xf32>
      %c33 = arith.constant 33 : index
      %229 = memref.load %arg7[%c33] : memref<44xf32, #tpu.memory_space<smem>>
      %c3_128 = arith.constant 3 : index
      %c0_129 = arith.constant 0 : index
      %c5_130 = arith.constant 5 : index
      %230 = vector.load %arg10[%c3_128, %c0_129, %c5_130] : memref<4x26x26xf32, #tpu.memory_space<vmem>>, vector<1x16x16xf32>
      %231 = vector.shape_cast %230 : vector<1x16x16xf32> to vector<16x16xf32>
      %232 = vector.broadcast %229 : f32 to vector<16x16xf32>
      %233 = arith.mulf %232, %231 : vector<16x16xf32>
      %234 = arith.addf %228, %233 : vector<16x16xf32>
      %c34 = arith.constant 34 : index
      %235 = memref.load %arg7[%c34] : memref<44xf32, #tpu.memory_space<smem>>
      %c3_131 = arith.constant 3 : index
      %c1_132 = arith.constant 1 : index
      %c5_133 = arith.constant 5 : index
      %236 = vector.load %arg10[%c3_131, %c1_132, %c5_133] : memref<4x26x26xf32, #tpu.memory_space<vmem>>, vector<1x16x16xf32>
      %237 = vector.shape_cast %236 : vector<1x16x16xf32> to vector<16x16xf32>
      %238 = vector.broadcast %235 : f32 to vector<16x16xf32>
      %239 = arith.mulf %238, %237 : vector<16x16xf32>
      %240 = arith.addf %234, %239 : vector<16x16xf32>
      %c35 = arith.constant 35 : index
      %241 = memref.load %arg7[%c35] : memref<44xf32, #tpu.memory_space<smem>>
      %c3_134 = arith.constant 3 : index
      %c2_135 = arith.constant 2 : index
      %c5_136 = arith.constant 5 : index
      %242 = vector.load %arg10[%c3_134, %c2_135, %c5_136] : memref<4x26x26xf32, #tpu.memory_space<vmem>>, vector<1x16x16xf32>
      %243 = vector.shape_cast %242 : vector<1x16x16xf32> to vector<16x16xf32>
      %244 = vector.broadcast %241 : f32 to vector<16x16xf32>
      %245 = arith.mulf %244, %243 : vector<16x16xf32>
      %246 = arith.addf %240, %245 : vector<16x16xf32>
      %c36 = arith.constant 36 : index
      %247 = memref.load %arg7[%c36] : memref<44xf32, #tpu.memory_space<smem>>
      %c3_137 = arith.constant 3 : index
      %c3_138 = arith.constant 3 : index
      %c5_139 = arith.constant 5 : index
      %248 = vector.load %arg10[%c3_137, %c3_138, %c5_139] : memref<4x26x26xf32, #tpu.memory_space<vmem>>, vector<1x16x16xf32>
      %249 = vector.shape_cast %248 : vector<1x16x16xf32> to vector<16x16xf32>
      %250 = vector.broadcast %247 : f32 to vector<16x16xf32>
      %251 = arith.mulf %250, %249 : vector<16x16xf32>
      %252 = arith.addf %246, %251 : vector<16x16xf32>
      %c37 = arith.constant 37 : index
      %253 = memref.load %arg7[%c37] : memref<44xf32, #tpu.memory_space<smem>>
      %c3_140 = arith.constant 3 : index
      %c4_141 = arith.constant 4 : index
      %c5_142 = arith.constant 5 : index
      %254 = vector.load %arg10[%c3_140, %c4_141, %c5_142] : memref<4x26x26xf32, #tpu.memory_space<vmem>>, vector<1x16x16xf32>
      %255 = vector.shape_cast %254 : vector<1x16x16xf32> to vector<16x16xf32>
      %256 = vector.broadcast %253 : f32 to vector<16x16xf32>
      %257 = arith.mulf %256, %255 : vector<16x16xf32>
      %258 = arith.addf %252, %257 : vector<16x16xf32>
      %c38 = arith.constant 38 : index
      %259 = memref.load %arg7[%c38] : memref<44xf32, #tpu.memory_space<smem>>
      %c3_143 = arith.constant 3 : index
      %c5_144 = arith.constant 5 : index
      %c5_145 = arith.constant 5 : index
      %260 = vector.load %arg10[%c3_143, %c5_144, %c5_145] : memref<4x26x26xf32, #tpu.memory_space<vmem>>, vector<1x16x16xf32>
      %261 = vector.shape_cast %260 : vector<1x16x16xf32> to vector<16x16xf32>
      %262 = vector.broadcast %259 : f32 to vector<16x16xf32>
      %263 = arith.mulf %262, %261 : vector<16x16xf32>
      %264 = arith.addf %258, %263 : vector<16x16xf32>
      %c39 = arith.constant 39 : index
      %265 = memref.load %arg7[%c39] : memref<44xf32, #tpu.memory_space<smem>>
      %c3_146 = arith.constant 3 : index
      %c6_147 = arith.constant 6 : index
      %c5_148 = arith.constant 5 : index
      %266 = vector.load %arg10[%c3_146, %c6_147, %c5_148] : memref<4x26x26xf32, #tpu.memory_space<vmem>>, vector<1x16x16xf32>
      %267 = vector.shape_cast %266 : vector<1x16x16xf32> to vector<16x16xf32>
      %268 = vector.broadcast %265 : f32 to vector<16x16xf32>
      %269 = arith.mulf %268, %267 : vector<16x16xf32>
      %270 = arith.addf %264, %269 : vector<16x16xf32>
      %c40 = arith.constant 40 : index
      %271 = memref.load %arg7[%c40] : memref<44xf32, #tpu.memory_space<smem>>
      %c3_149 = arith.constant 3 : index
      %c7_150 = arith.constant 7 : index
      %c5_151 = arith.constant 5 : index
      %272 = vector.load %arg10[%c3_149, %c7_150, %c5_151] : memref<4x26x26xf32, #tpu.memory_space<vmem>>, vector<1x16x16xf32>
      %273 = vector.shape_cast %272 : vector<1x16x16xf32> to vector<16x16xf32>
      %274 = vector.broadcast %271 : f32 to vector<16x16xf32>
      %275 = arith.mulf %274, %273 : vector<16x16xf32>
      %276 = arith.addf %270, %275 : vector<16x16xf32>
      %c41 = arith.constant 41 : index
      %277 = memref.load %arg7[%c41] : memref<44xf32, #tpu.memory_space<smem>>
      %c3_152 = arith.constant 3 : index
      %c8_153 = arith.constant 8 : index
      %c5_154 = arith.constant 5 : index
      %278 = vector.load %arg10[%c3_152, %c8_153, %c5_154] : memref<4x26x26xf32, #tpu.memory_space<vmem>>, vector<1x16x16xf32>
      %279 = vector.shape_cast %278 : vector<1x16x16xf32> to vector<16x16xf32>
      %280 = vector.broadcast %277 : f32 to vector<16x16xf32>
      %281 = arith.mulf %280, %279 : vector<16x16xf32>
      %282 = arith.addf %276, %281 : vector<16x16xf32>
      %c42 = arith.constant 42 : index
      %283 = memref.load %arg7[%c42] : memref<44xf32, #tpu.memory_space<smem>>
      %c3_155 = arith.constant 3 : index
      %c9_156 = arith.constant 9 : index
      %c5_157 = arith.constant 5 : index
      %284 = vector.load %arg10[%c3_155, %c9_156, %c5_157] : memref<4x26x26xf32, #tpu.memory_space<vmem>>, vector<1x16x16xf32>
      %285 = vector.shape_cast %284 : vector<1x16x16xf32> to vector<16x16xf32>
      %286 = vector.broadcast %283 : f32 to vector<16x16xf32>
      %287 = arith.mulf %286, %285 : vector<16x16xf32>
      %288 = arith.addf %282, %287 : vector<16x16xf32>
      %c43 = arith.constant 43 : index
      %289 = memref.load %arg7[%c43] : memref<44xf32, #tpu.memory_space<smem>>
      %c3_158 = arith.constant 3 : index
      %c10_159 = arith.constant 10 : index
      %c5_160 = arith.constant 5 : index
      %290 = vector.load %arg10[%c3_158, %c10_159, %c5_160] : memref<4x26x26xf32, #tpu.memory_space<vmem>>, vector<1x16x16xf32>
      %291 = vector.shape_cast %290 : vector<1x16x16xf32> to vector<16x16xf32>
      %292 = vector.broadcast %289 : f32 to vector<16x16xf32>
      %293 = arith.mulf %292, %291 : vector<16x16xf32>
      %294 = arith.addf %288, %293 : vector<16x16xf32>
      %c0_161 = arith.constant 0 : index
      %c3_162 = arith.constant 3 : index
      %c0_163 = arith.constant 0 : index
      %c0_164 = arith.constant 0 : index
      %295 = vector.load %arg9[%c0_161, %c3_162, %c0_163, %c0_164] : memref<1x4x16x16xf32, #tpu.memory_space<vmem>>, vector<1x1x16x16xf32>
      %296 = vector.shape_cast %295 : vector<1x1x16x16xf32> to vector<16x16xf32>
      %297 = vector.shape_cast %294 : vector<16x16xf32> to vector<1x1x16x16xf32>
      tpu.vector_store %arg9[%c0_161, %c3_162, %c0_163, %c0_164], %297 {strides = array<i32>} : memref<1x4x16x16xf32, #tpu.memory_space<vmem>>, vector<1x1x16x16xf32>,
    } else {
    }
    return
  }
  func.func @transform_0(%arg0: i32, %arg1: i32) -> (i32, i32, i32, i32) {
    %c5_i32 = arith.constant 5 : i32
    %0 = arith.addi %c5_i32, %arg1 : i32
    %c0_i32 = arith.constant 0 : i32
    %c0_i32_0 = arith.constant 0 : i32
    %c0_i32_1 = arith.constant 0 : i32
    return %arg0, %0, %c0_i32, %c0_i32_0 : i32, i32, i32, i32
  }
  func.func @transform_1(%arg0: i32, %arg1: i32) -> i32 {
    %c0_i32 = arith.constant 0 : i32
    %c0_i32_0 = arith.constant 0 : i32
    return %c0_i32 : i32
  }
  func.func @transform_2(%arg0: i32, %arg1: i32) -> i32 {
    %c0_i32 = arith.constant 0 : i32
    %c0_i32_0 = arith.constant 0 : i32
    return %c0_i32 : i32
  }
  func.func @transform_3(%arg0: i32, %arg1: i32) -> i32 {
    %c0_i32 = arith.constant 0 : i32
    %c0_i32_0 = arith.constant 0 : i32
    return %c0_i32 : i32
  }
  func.func @transform_4(%arg0: i32, %arg1: i32) -> i32 {
    %c0_i32 = arith.constant 0 : i32
    %c0_i32_0 = arith.constant 0 : i32
    return %c0_i32 : i32
  }
  func.func @transform_5(%arg0: i32, %arg1: i32) -> i32 {
    %c0_i32 = arith.constant 0 : i32
    %c0_i32_0 = arith.constant 0 : i32
    return %c0_i32 : i32
  }
  func.func @transform_6(%arg0: i32, %arg1: i32) -> i32 {
    %c0_i32 = arith.constant 0 : i32
    %c0_i32_0 = arith.constant 0 : i32
    return %c0_i32 : i32
  }
  func.func @transform_7(%arg0: i32, %arg1: i32) -> (i32, i32, i32, i32) {
    %c5_i32 = arith.constant 5 : i32
    %0 = arith.addi %c5_i32, %arg1 : i32
    %c0_i32 = arith.constant 0 : i32
    %c0_i32_0 = arith.constant 0 : i32
    %c0_i32_1 = arith.constant 0 : i32
    return %arg0, %0, %c0_i32, %c0_i32_0 : i32, i32, i32, i32
  }
}

</mosaic_0001>

<bundles_post_ra>
// kernel: inception_dwconv2d.1
= control target key start
LH: loop header
LB: loop body
LE: loop exit
PB: predicated region body
PF: predicated region fallthrough
CT: control target
= control target key end

     0   :  { %s3550_s0 = inlined_call_operand.vmem [shape: f32[2,32,16,16], index: 0, kind: input, shape index: {}, may-alias: {0,7}]   ;;  %s3551_s1 = inlined_call_operand.vmem [shape: f32[36], index: 1, kind: input, shape index: {}]   ;;  %s3552_s2 = inlined_call_operand.vmem [shape: f32[4], index: 2, kind: input, shape index: {}]   ;;  %s3553_s3 = inlined_call_operand.vmem [shape: f32[44], index: 3, kind: input, shape index: {}]   ;;  %s3554_s4 = inlined_call_operand.vmem [shape: f32[4], index: 4, kind: input, shape index: {}]   ;;  %s3555_s5 = inlined_call_operand.vmem [shape: f32[44], index: 5, kind: input, shape index: {}]   ;;  %s3556_s6 = inlined_call_operand.vmem [shape: f32[4], index: 6, kind: input, shape index: {}]   ;;  %s3557_s7 = inlined_call_operand.vmem [shape: f32[2,32,16,16], index: 7, kind: output, shape index: {}, may-alias: {0,7}]  }
   0x1   :  { %3563 = sst [smem:[#allocation17_spill]] %s3550_s0 }
   0x2   :  { %3564 = sst [smem:[#allocation18_spill]] %s3551_s1 }
   0x3   :  { %12 = vsyncpa [#allocation4], 0 }
   0x4   :  { %13 = vsyncpa [#allocation6], 0 }
   0x5   :  { %14 = vsyncpa [#allocation9], 0 }
   0x6   :  { %15 = vsyncpa [#allocation12], 0  ;;  %s2669_s24 = smov 0   ;;  %s2671_s25 = smov 0  }
   0x7   :  { %s2673_s26 = smov 0   ;;  %s2675_s27 = smov 0  }
   0x8   :  { %s2677_s28 = smov 0  }
   0x9 LB: > { %s248_s8 = sshll.u32 %s3552_s2, 4  ;;  %s2162_s9 = sadd.s32 4294967295, %s2605_s28   ;;  %s2605_s28 = sphi %s2677_s28, %s21_s28   ;;  %s2601_s27 = sphi %s2675_s27, %s3577_s27   ;;  %s2597_s26 = sphi %s2673_s26, %s3576_s26   ;;  %s2593_s25 = sphi %s2671_s25, %s3575_s25   ;;  %s2589_s24 = sphi %s2669_s24, %s3574_s24   ;;  %s249_s8 = int_to_ptr.vmem [resolvable:$true] %s248_s8 }
   0xa   : > { %p2164_p0 = scmp.ge.s32.totalorder %s2605_s28, 1  ;;  %p224_p1 = scmp.lt.s32.totalorder %s2605_s28, 7 }
   0xb   : > { %p2700_p2 = scmp.eq.s32.totalorder %s2162_s9, 0  ;;  %s270_s14 = sshll.u32 %s3554_s4, 4  ;;  %s271_s14 = int_to_ptr.vmem [resolvable:$true] %s270_s14 }
   0xc   : > { %p2704_p3 = pnand %p2164_p0, %p224_p1  ;;  %s2461_s16 = scalar_lea.vmem %s249_s8, 16 }
   0xd   : > { %s3565_s10 = scalar_select %p2700_p2, 1, 0 }
   0xe   : > { %s3566_s11 = scalar_select %p2704_p3, 1, 0 }
   0xf   : > { %p2368_p4 = pneg %p2704_p3  ;;  %p2462_p6 = scmp.ne.s32.totalorder %s249_s8, %s2461_s16 }
  0x10   : > { %p2469_p10 = scmp.lt.s32.totalorder %s249_s8, %s249_s8  ;;  %p2470_p11 = scmp.lt.s32.totalorder %s2461_s16, %s2461_s16 }
  0x11   : > { %p2715_p5 = pnand %p2700_p2, %p2368_p4 }
  0x12   : > { %p2471_p12 = por %p2470_p11, %p2469_p10 }
  0x13   : > { %p2721_p7 = pneg %p2715_p5 }
  0x15   : > { %p2464_p8 = pnand %p2721_p7, %p2462_p6 }
  0x17   : > { %p2465_p9 = pneg %p2464_p8 }
  0x19   : > { %p2472_p13 = pnand %p2471_p12, %p2465_p9 }
  0x1b   : > { %2475 = shalt.err (!%p2472_p13)
}
  0x1c   : > { %s2607_s18 = smov [#allocation5]   ;;  %s2476_s19 = scalar_lea.vmem %s271_s14, 16 }
  0x1d   : > { %2374 = dma.vmem_to_smem (!%p2715_p5), %s249_s8, 16, %s2607_s18, [#allocation6]  }
  0x1e   : > { %p2477_p0 = scmp.ne.s32.totalorder %s271_s14, %s2476_s19  ;;  %p2484_p2 = scmp.lt.s32.totalorder %s271_s14, %s271_s14 }
  0x1f   : > { %p2485_p3 = scmp.lt.s32.totalorder %s2476_s19, %s2476_s19 }
  0x20   : > { %p2479_p1 = pnand %p2477_p0, %p2721_p7 }
  0x21   : > { %p2486_p6 = por %p2485_p3, %p2484_p2 }
  0x22   : > { %p2480_p4 = pneg %p2479_p1 }
  0x24   : > { %p2487_p8 = pnand %p2486_p6, %p2480_p4 }
  0x26   : > { %2490 = shalt.err (!%p2487_p8)
}
  0x27   : > { %s2608_s20 = smov [#allocation8]   ;;  %s30_s21 = sadd.s32 1, %s2597_s26 }
  0x28   : > { %2380 = dma.vmem_to_smem (!%p2715_p5), %s271_s14, 16, %s2608_s20, [#allocation9]  }
  0x29   : > { %p31_p9 = scmp.ge.s32.totalorder %s30_s21, 3  ;;  %s33_s22 = sadd.s32 1, %s2601_s27 }
  0x2a   : > { %s3569_s1 = sld [smem:[#allocation18_spill]]  ;;  %s259_s12 = sshll.u32 %s3553_s3, 4  ;;  %s260_s12 = int_to_ptr.vmem [resolvable:$true] %s259_s12 }
  0x2b   : > { %s3579_s21 = smov (%p31_p9, %s30_s21), 0  ;;  %s3581_s22 = smov (!%p31_p9, %s33_s22), %s2601_s27 }
  0x2c   : > { %p35_p2 = scmp.ge.s32.totalorder %s3581_s22, 2 }
  0x30   : > { %s237_s30 = sshll.u32 %s3569_s1, 4  ;;  %s238_s30 = int_to_ptr.vmem [resolvable:$true] %s237_s30 }
  0x31   : > { %s2491_s13 = scalar_lea.vmem %s238_s30, 16  ;;  %p2499_p12 = scmp.lt.s32.totalorder %s238_s30, %s238_s30 }
  0x32   : > { %p2492_p3 = scmp.ne.s32.totalorder %s238_s30, %s2491_s13  ;;  %p2500_p13 = scmp.lt.s32.totalorder %s2491_s13, %s2491_s13 }
  0x34   : > { %p2494_p10 = pnand %p2492_p3, %p2721_p7  ;;  %p2501_p0 = por %p2500_p13, %p2499_p12 }
  0x36   : > { %p2495_p11 = pneg %p2494_p10 }
  0x38   : > { %p2502_p1 = pnand %p2501_p0, %p2495_p11 }
  0x3a   : > { %2505 = shalt.err (!%p2502_p1)
}
  0x3b   : > { %s2609_s14 = smov [#allocation3]   ;;  %s3583_s22 = smov (%p35_p2, %s3581_s22), 0 }
  0x3c   : > { %2371 = dma.vmem_to_smem (!%p2715_p5), %s238_s30, 16, %s2609_s14, [#allocation4]  }
  0x3d   : > { %s281_s19 = sshll.u32 %s3555_s5, 4  ;;  %s2506_s20 = scalar_lea.vmem %s260_s12, 16  ;;  %s282_s19 = int_to_ptr.vmem [resolvable:$true] %s281_s19 }
  0x3e   : > { %p2507_p4 = scmp.ne.s32.totalorder %s260_s12, %s2506_s20  ;;  %p2514_p9 = scmp.lt.s32.totalorder %s260_s12, %s260_s12 }
  0x3f   : > { %p2515_p3 = scmp.lt.s32.totalorder %s2506_s20, %s2506_s20 }
  0x40   : > { %p2509_p6 = pnand %p2507_p4, %p2721_p7 }
  0x41   : > { %p2516_p10 = por %p2515_p3, %p2514_p9 }
  0x42   : > { %p2510_p8 = pneg %p2509_p6 }
  0x44   : > { %p2517_p11 = pnand %p2516_p10, %p2510_p8 }
  0x46   : > { %2520 = shalt.err (!%p2517_p11)
}
  0x47   : > { %s2610_s23 = smov [#allocation7]   ;;  %s2521_s29 = scalar_lea.vmem %s282_s19, 16 }
  0x48   : > { %2377 = dma.vmem_to_smem (!%p2715_p5), %s260_s12, 16, %s2610_s23, [#allocation6]  }
  0x49   : > { %p2522_p2 = scmp.ne.s32.totalorder %s282_s19, %s2521_s29  ;;  %p2529_p0 = scmp.lt.s32.totalorder %s282_s19, %s282_s19 }
  0x4a   : > { %p2530_p1 = scmp.lt.s32.totalorder %s2521_s29, %s2521_s29 }
  0x4b   : > { %p2524_p12 = pnand %p2522_p2, %p2721_p7 }
  0x4c   : > { %p2531_p4 = por %p2530_p1, %p2529_p0 }
  0x4d   : > { %p2525_p13 = pneg %p2524_p12 }
  0x4f   : > { %p2532_p6 = pnand %p2531_p4, %p2525_p13 }
  0x51   : > { %2535 = shalt.err (!%p2532_p6)
}
  0x52   : > { %s2611_s30 = smov [#allocation10]   ;;  %s292_s12 = sshll.u32 %s3556_s6, 4  ;;  %s293_s12 = int_to_ptr.vmem [resolvable:$true] %s292_s12 }
  0x53   : > { %2383 = dma.vmem_to_smem (!%p2715_p5), %s282_s19, 16, %s2611_s30, [#allocation9]  }
  0x54   : > { %s2536_s13 = scalar_lea.vmem %s293_s12, 16  ;;  %p2544_p10 = scmp.lt.s32.totalorder %s293_s12, %s293_s12 }
  0x55   : > { %p2537_p8 = scmp.ne.s32.totalorder %s293_s12, %s2536_s13  ;;  %p2545_p11 = scmp.lt.s32.totalorder %s2536_s13, %s2536_s13 }
  0x57   : > { %p2539_p9 = pnand %p2537_p8, %p2721_p7  ;;  %p2546_p2 = por %p2545_p11, %p2544_p10 }
  0x59   : > { %p2540_p3 = pneg %p2539_p9 }
  0x5b   : > { %p2547_p12 = pnand %p2546_p2, %p2540_p3 }
  0x5d   : > { %2550 = shalt.err (!%p2547_p12)
}
  0x5e   : > { %s2612_s14 = smov [#allocation11]   ;;  %p3570_p13 = scmp.ne.s32.totalorder %s3566_s11, 0 }
  0x5f   : > { %2386 = dma.vmem_to_smem (!%p2715_p5), %s293_s12, 16, %s2612_s14, [#allocation12]  }
  0x60   : > { %321 = sbr.rel (%p3570_p13) target bundleno = 1049 (0x419), region = 48  ;;  %p3571_p0 = scmp.ne.s32.totalorder (!%p3570_p13), %s3565_s10, 0 }
  0x67   : > { %2572 = dma.done.wait (%p3571_p0), [#allocation4], 16  }
  0x68   : > { %2574 = vsyncadd (%p3571_p0), [#allocation4], 4294967280 }
  0x69   : > { %2576 = dma.done.wait (%p3571_p0), [#allocation6], 32  }
  0x6a   : > { %2578 = vsyncadd (%p3571_p0), [#allocation6], 4294967264 }
  0x6b   : > { %2580 = dma.done.wait (%p3571_p0), [#allocation9], 32  }
  0x6c   : > { %2582 = vsyncadd (%p3571_p0), [#allocation9], 4294967264 }
  0x6d   : > { %2584 = dma.done.wait (%p3571_p0), [#allocation12], 16  }
  0x6e   : > { %2586 = vsyncadd (%p3571_p0), [#allocation12], 4294967280 }
  0x6f   : > { %347 = sfence }
  0x70   : > { %s2340_s11 = sshll.u32 %s2589_s24, 2  ;;  %p388_p5 = scmp.lt.s32.totalorder %s2593_s25, 1  ;;  %vm412_vm0 = vcmask 211968   ;;  %vm416_vm1 = vcmask 205824   ;;  %v2613_v0 = vmov 0.0   ;;  %vm470_vm2 = vcmask 171048  }
  0x71   : > { %s2341_s15 = sadd.s32 20, %s2340_s11  ;;  %417 = vst.msk [vmem:[#allocation2 + $0x18] sm:$0x3] %vm416_vm1, %v2613_v0  ;;  %421 = vst.msk [vmem:[#allocation2 + $0x38] sm:$0x3] %vm416_vm1, %v2613_v0  ;;  %s3572_s0 = sld [smem:[#allocation17_spill]] }
  0x72   : > { %418 = vst.msk [vmem:[#allocation2 + $0x20] sm:$0xff] %vm412_vm0, %v2613_v0  ;;  %419 = vst.msk [vmem:[#allocation2 + $0x28] sm:$0xff] %vm412_vm0, %v2613_v0  ;;  %s3585_s25 = smov (!%p388_p5, %s2593_s25), 1  ;;  %p390_p7 = scmp.lt.s32.totalorder %s2341_s15, 31 }
  0x73   : > { %425 = vst.msk [vmem:[#allocation2 + $0x58] sm:$0x3] %vm416_vm1, %v2613_v0  ;;  %429 = vst.msk [vmem:[#allocation2 + $0x78] sm:$0x3] %vm416_vm1, %v2613_v0  ;;  %s2181_s10 = sshll.u32 %s3585_s25, 6  ;;  %s2614_s9 = smov 5  }
  0x74   : > { %413 = vst.msk [vmem:[#allocation2] sm:$0xff] %vm412_vm0, %v2613_v0  ;;  %414 = vst.msk [vmem:[#allocation2 + $0x8] sm:$0xff] %vm412_vm0, %v2613_v0  ;;  %s3587_s15 = smov (!%p390_p7, %s2341_s15), 31  ;;  %p2187_p1 = scmp.ne.s32.totalorder %s2589_s24, 0 }
  0x75   : > { %415 = vst.msk [vmem:[#allocation2 + $0x10] sm:$0xff] %vm412_vm0, %v2613_v0  ;;  %420 = vst.msk [vmem:[#allocation2 + $0x30] sm:$0xff] %vm412_vm0, %v2613_v0  ;;  %s2180_s17 = sshll.u32 %s3587_s15, 1  ;;  %s2198_s25 = sld [smem:[#allocation3 + $0xa]] (!%p2187_p1)  ;;  %vm601_vm3 = vcmask (!%p2187_p1), 130048  }
  0x76   : > { %422 = vst.msk [vmem:[#allocation2 + $0x40] sm:$0xff] %vm412_vm0, %v2613_v0  ;;  %423 = vst.msk [vmem:[#allocation2 + $0x48] sm:$0xff] %vm412_vm0, %v2613_v0  ;;  %s394_s16 = sadd.s32 %s2181_s10, %s2180_s17  ;;  %s2188_s12 = sld [smem:[#allocation3 + $0x1]] (!%p2187_p1) }
  0x77   : > { %424 = vst.msk [vmem:[#allocation2 + $0x50] sm:$0xff] %vm412_vm0, %v2613_v0  ;;  %426 = vst.msk [vmem:[#allocation2 + $0x60] sm:$0xff] %vm412_vm0, %v2613_v0  ;;  %s2182_s18 = sshll.u32 %s394_s16, 3  ;;  %s2210_s13 = sld [smem:[#allocation3 + $0x13]] (!%p2187_p1) }
  0x78   : > { %427 = vst.msk [vmem:[#allocation2 + $0x68] sm:$0xff] %vm412_vm0, %v2613_v0  ;;  %428 = vst.msk [vmem:[#allocation2 + $0x70] sm:$0xff] %vm412_vm0, %v2613_v0  ;;  %s396_s23 = scalar_lea.vmem %s3572_s0, %s2182_s18  ;;  %s2809_s8 = scalar_lea.vmem %s3557_s7, %s2182_s18 }
  0x79   : > { %v432_v1 = vld [vmem:[%s396_s23 + $0x10] sm:$0xff]  ;;  %v430_v2 = vld [vmem:[%s396_s23] sm:$0xff]  ;;  %v433_v3 = vld [vmem:[%s396_s23 + $0x18] sm:$0xff]  ;;  %s2222_s14 = sld [smem:[#allocation3 + $0x1c]] (!%p2187_p1)  ;;  %s2615_s11 = smov (!%p2187_p1), 127  }
  0x7a   : > { %450 = vrot.lane.b32.xlu1 %v432_v1, %s2614_s9  ;;  %446 = vrot.lane.b32.xlu0 %v430_v2, %s2614_s9  ;;  %v431_v4 = vld [vmem:[%s396_s23 + $0x8] sm:$0xff]  ;;  %v434_v6 = vld [vmem:[%s396_s23 + $0x20] sm:$0xff]  ;;  %s2189_s15 = sld [smem:[#allocation3 + $0x2]] (!%p2187_p1)  ;;  %s2199_s10 = sld [smem:[#allocation3 + $0xb]] (!%p2187_p1) }
  0x7b   : > { %v435_v5 = vld [vmem:[%s396_s23 + $0x28] sm:$0xff]  ;;  %v437_v7 = vld [vmem:[%s396_s23 + $0x38] sm:$0xff]  ;;  %v436_v8 = vld [vmem:[%s396_s23 + $0x30] sm:$0xff]  ;;  %v616_v20 = vstv (!%p2187_p1), %s2198_s25  ;;  %s2211_s17 = sld [smem:[#allocation3 + $0x14]] (!%p2187_p1)  ;;  %s2223_s16 = sld [smem:[#allocation3 + $0x1d]] (!%p2187_p1) }
  0x7c   : > { %v494_v23 = vstv (!%p2187_p1), %s2188_s12  ;;  %s2616_s18 = smov (!%p2187_p1), 126   ;;  %s2191_s19 = sld [smem:[#allocation3 + $0x4]] (!%p2187_p1) }
  0x7d   : > { %v738_v28 = vstv (!%p2187_p1), %s2210_s13  ;;  %s2201_s20 = sld [smem:[#allocation3 + $0xd]] (!%p2187_p1)  ;;  %s2213_s23 = sld [smem:[#allocation3 + $0x16]] (!%p2187_p1) }
  0x7e   : > { %452 = vrot.lane.b32.xlu1 %v433_v3, %s2614_s9  ;;  %448 = vrot.lane.b32.xlu0 %v431_v4, %s2614_s9  ;;  %s2225_s29 = sld [smem:[#allocation3 + $0x1f]] (!%p2187_p1)  ;;  %s2192_s30 = sld [smem:[#allocation3 + $0x5]] (!%p2187_p1) }
  0x7f   : > { %v860_v33 = vstv (!%p2187_p1), %s2222_s14  ;;  %s2214_s25 = sld [smem:[#allocation3 + $0x17]] (!%p2187_p1)  ;;  %s2226_s12 = sld [smem:[#allocation3 + $0x20]] (!%p2187_p1) }
  0x80   : > { %v508_v37 = vstv (!%p2187_p1), %s2189_s15  ;;  %v630_v40 = vstv (!%p2187_p1), %s2199_s10  ;;  %s2194_s13 = sld [smem:[#allocation3 + $0x7]] (!%p2187_p1)  ;;  %s2204_s14 = sld [smem:[#allocation3 + $0x10]] (!%p2187_p1) }
  0x81   : > { %v752_v43 = vstv (!%p2187_p1), %s2211_s17  ;;  %v874_v46 = vstv (!%p2187_p1), %s2223_s16  ;;  %s2216_s15 = sld [smem:[#allocation3 + $0x19]] (!%p2187_p1)  ;;  %s2228_s10 = sld [smem:[#allocation3 + $0x22]] (!%p2187_p1) }
  0x82   : > { %456 = vrot.lane.b32.xlu1 %v435_v5, %s2614_s9  ;;  %454 = vrot.lane.b32.xlu0 %v434_v6, %s2614_s9  ;;  %v530_v50 = vstv (!%p2187_p1), %s2191_s19  ;;  %s2195_s17 = sld [smem:[#allocation3 + $0x8]] (!%p2187_p1)  ;;  %s2205_s16 = sld [smem:[#allocation3 + $0x11]] (!%p2187_p1) }
  0x83   : > { %v652_v55 = vstv (!%p2187_p1), %s2201_s20  ;;  %v774_v60 = vstv (!%p2187_p1), %s2213_s23  ;;  %s2217_s19 = sld [smem:[#allocation3 + $0x1a]] (!%p2187_p1)  ;;  %s2229_s20 = sld [smem:[#allocation3 + $0x23]] (!%p2187_p1) }
  0x84   : > { %v896_v1 = vstv (!%p2187_p1), %s2225_s29  ;;  %v544_v5 = vstv (!%p2187_p1), %s2192_s30  ;;  %s2964_s23 = sld [smem:[#allocation3]] (!%p2187_p1)  ;;  %s2196_s29 = sld [smem:[#allocation5 + $0x1]] (!%p2187_p1) }
  0x85   : > { %s2966_s30 = sld [smem:[#allocation5]] (!%p2187_p1) }
  0x86   : > { %460 = vrot.lane.b32.xlu1 %v437_v7, %s2614_s9  ;;  %458 = vrot.lane.b32.xlu0 %v436_v8, %s2614_s9  ;;  %s2202_s9 = sld [smem:[#allocation3 + $0xe]] (!%p2187_p1) }
  0x8c   : > { %v666_v8 = vstv (!%p2187_p1), %s2202_s9  ;;  %s2209_s9 = sld [smem:[#allocation3 + $0x12]] (!%p2187_p1) }
  0xec   : > { %v451_v9 = vpop.permute.xlu1 %450  ;;  %v447_v10 = vpop.permute.xlu0 %446 }
  0xed   : > { %473 = vst.msk [vmem:[#allocation2 + $0x25] sm:$0xff] %vm470_vm2, %v451_v9  ;;  %471 = vst.msk [vmem:[#allocation2 + $0x5] sm:$0xff] %vm470_vm2, %v447_v10 }
  0xf0   : > { %v453_v11 = vpop.permute.xlu1 %452  ;;  %v449_v12 = vpop.permute.xlu0 %448 }
  0xf1   : > { %474 = vst.msk [vmem:[#allocation2 + $0x2d] sm:$0xff] %vm470_vm2, %v453_v11  ;;  %472 = vst.msk [vmem:[#allocation2 + $0xd] sm:$0xff] %vm470_vm2, %v449_v12  ;;  %v788_v11 = vstv (!%p2187_p1), %s2214_s25  ;;  %s2208_s25 = sld [smem:[#allocation5 + $0x2]] (!%p2187_p1) }
  0xf3   : > { %482 = sbr.rel (%p2187_p1) target bundleno = 573 (0x23d), region = 76 }
  0xf4   : > { %v457_v13 = vpop.permute.xlu1 %456  ;;  %v455_v14 = vpop.permute.xlu0 %454  ;;  %v2820_v17 = vld [vmem:[#allocation2 + $0x24] sm:$0xff] (!%p2187_p1) }
  0xf5   : > { %476 = vst.msk [vmem:[#allocation2 + $0x4d] sm:$0xff] %vm470_vm2, %v457_v13  ;;  %475 = vst.msk [vmem:[#allocation2 + $0x45] sm:$0xff] %vm470_vm2, %v455_v14  ;;  %v2822_v18 = vld [vmem:[#allocation2 + $0x4] sm:$0xff] (!%p2187_p1)  ;;  %v617_v21 = vmul.f32 (!%p2187_p1), %v616_v20, %v2820_v17  ;;  %v631_v42 = vmul.f32 (!%p2187_p1), %v630_v40, %v2820_v17  ;;  %v910_v14 = vstv (!%p2187_p1), %s2226_s12  ;;  %s2221_s12 = sld [smem:[#allocation3 + $0x1b]] (!%p2187_p1) }
  0xf6   : > { %v495_v24 = vmul.f32 (!%p2187_p1), %v494_v23, %v2822_v18  ;;  %v509_v39 = vmul.f32 (!%p2187_p1), %v508_v37, %v2822_v18  ;;  %v2868_v51 = vld [vmem:[#allocation2 + $0x5] sm:$0xff] (!%p2187_p1) }
  0xf7   : > { %621 = vrot.lane.b32.xlu1 (!%p2187_p1), %v617_v21, %s2615_s11  ;;  %v531_v53 = vmul.f32 (!%p2187_p1), %v530_v50, %v2868_v51  ;;  %v2876_v56 = vld [vmem:[#allocation2 + $0x25] sm:$0xff] (!%p2187_p1)  ;;  %v545_v7 = vmul.f32 (!%p2187_p1), %v544_v5, %v2868_v51  ;;  %v566_v21 = vstv (!%p2187_p1), %s2194_s13  ;;  %s2190_s13 = sld [smem:[#allocation3 + $0x3]] (!%p2187_p1) }
  0xf8   : > { %v461_v15 = vpop.permute.xlu1 %460  ;;  %v459_v16 = vpop.permute.xlu0 %458  ;;  %v2824_v19 = vld [vmem:[#allocation2 + $0x2c] sm:$0xff] (!%p2187_p1)  ;;  %499 = vrot.lane.b32.xlu0 (!%p2187_p1), %v495_v24, %s2615_s11  ;;  %v653_v58 = vmul.f32 (!%p2187_p1), %v652_v55, %v2876_v56  ;;  %v667_v10 = vmul.f32 (!%p2187_p1), %v666_v8, %v2876_v56 }
  0xf9   : > { %478 = vst.msk [vmem:[#allocation2 + $0x6d] sm:$0xff] %vm470_vm2, %v461_v15  ;;  %477 = vst.msk [vmem:[#allocation2 + $0x65] sm:$0xff] %vm470_vm2, %v459_v16  ;;  %v2827_v22 = vld [vmem:[#allocation2 + $0xc] sm:$0xff] (!%p2187_p1)  ;;  %v618_v25 = vmul.f32 (!%p2187_p1), %v616_v20, %v2824_v19  ;;  %v632_v41 = vmul.f32 (!%p2187_p1), %v630_v40, %v2824_v19 }
  0xfa   : > { %v496_v26 = vmul.f32 %v494_v23, %v2827_v22  ;;  %v510_v38 = vmul.f32 %v508_v37, %v2827_v22  ;;  %v2866_v49 = vld [vmem:[#allocation2 + $0xd] sm:$0xff] }
  0xfb   : > { %623 = vrot.lane.b32.xlu1 %v618_v25, %s2615_s11  ;;  %v532_v52 = vmul.f32 %v530_v50, %v2866_v49  ;;  %v2874_v54 = vld [vmem:[#allocation2 + $0x2d] sm:$0xff]  ;;  %v546_v6 = vmul.f32 %v544_v5, %v2866_v49 }
  0xfc   : > { %v2834_v27 = vld [vmem:[#allocation2 + $0x4c] sm:$0xff]  ;;  %v2836_v29 = vld [vmem:[#allocation2 + $0x44] sm:$0xff]  ;;  %501 = vrot.lane.b32.xlu0 %v496_v26, %s2615_s11  ;;  %v654_v57 = vmul.f32 %v652_v55, %v2874_v54  ;;  %v668_v9 = vmul.f32 %v666_v8, %v2874_v54 }
  0xfd   : > { %v740_v30 = vmul.f32 %v738_v28, %v2834_v27  ;;  %v739_v31 = vmul.f32 %v738_v28, %v2836_v29  ;;  %v754_v44 = vmul.f32 %v752_v43, %v2834_v27  ;;  %v753_v45 = vmul.f32 %v752_v43, %v2836_v29  ;;  %v2882_v59 = vld [vmem:[#allocation2 + $0x4d] sm:$0xff]  ;;  %v2884_v61 = vld [vmem:[#allocation2 + $0x45] sm:$0xff] }
  0xfe   : > { %v776_v62 = vmul.f32 %v774_v60, %v2882_v59  ;;  %v775_v63 = vmul.f32 %v774_v60, %v2884_v61  ;;  %v790_v12 = vmul.f32 %v788_v11, %v2882_v59  ;;  %v789_v13 = vmul.f32 %v788_v11, %v2884_v61  ;;  %v2914_v20 = vld [vmem:[#allocation2 + $0xe] sm:$0xff]  ;;  %v2916_v23 = vld [vmem:[#allocation2 + $0x6] sm:$0xff] }
  0xff   : > { %745 = vrot.lane.b32.xlu1 %v740_v30, %s2615_s11  ;;  %v568_v24 = vmul.f32 %v566_v21, %v2914_v20  ;;  %v567_v25 = vmul.f32 %v566_v21, %v2916_v23  ;;  %v2922_v26 = vld [vmem:[#allocation2 + $0x2e] sm:$0xff]  ;;  %v688_v28 = vstv %s2204_s14  ;;  %v2924_v30 = vld [vmem:[#allocation2 + $0x26] sm:$0xff]  ;;  %s2200_s14 = sld [smem:[#allocation3 + $0xc]] }
 0x100   : > { %v2842_v32 = vld [vmem:[#allocation2 + $0x6c] sm:$0xff]  ;;  %v2844_v34 = vld [vmem:[#allocation2 + $0x64] sm:$0xff]  ;;  %743 = vrot.lane.b32.xlu0 %v739_v31, %s2615_s11  ;;  %v690_v31 = vmul.f32 %v688_v28, %v2922_v26 }
 0x101   : > { %v862_v35 = vmul.f32 %v860_v33, %v2842_v32  ;;  %v861_v36 = vmul.f32 %v860_v33, %v2844_v34  ;;  %v876_v47 = vmul.f32 %v874_v46, %v2842_v32  ;;  %v875_v48 = vmul.f32 %v874_v46, %v2844_v34  ;;  %v2890_v0 = vld [vmem:[#allocation2 + $0x6d] sm:$0xff]  ;;  %v2892_v2 = vld [vmem:[#allocation2 + $0x65] sm:$0xff] }
 0x102   : > { %v898_v3 = vmul.f32 %v896_v1, %v2890_v0  ;;  %v897_v4 = vmul.f32 %v896_v1, %v2892_v2  ;;  %v912_v15 = vmul.f32 %v910_v14, %v2890_v0  ;;  %v911_v16 = vmul.f32 %v910_v14, %v2892_v2  ;;  %v2932_v37 = vld [vmem:[#allocation2 + $0x46] sm:$0xff]  ;;  %v2938_v40 = vld [vmem:[#allocation2 + $0x6e] sm:$0xff] }
 0x103   : > { %867 = vrot.lane.b32.xlu1 %v862_v35, %s2615_s11  ;;  %v689_v33 = vmul.f32 %v688_v28, %v2924_v30  ;;  %v2930_v35 = vld [vmem:[#allocation2 + $0x4e] sm:$0xff]  ;;  %v488_v1 = vstv %s2964_s23 }
 0x104   : > { %865 = vrot.lane.b32.xlu0 %v861_v36, %s2615_s11  ;;  %v810_v36 = vstv %s2216_s15  ;;  %v489_v5 = vmul.f32 %v488_v1, %v2822_v18  ;;  %v854_v18 = vstv %s2221_s12  ;;  %s2212_s15 = sld [smem:[#allocation3 + $0x15]] }
 0x107   : > { %515 = vrot.lane.b32.xlu1 %v510_v38, %s2616_s18  ;;  %v812_v38 = vmul.f32 %v810_v36, %v2930_v35 }
 0x108   : > { %513 = vrot.lane.b32.xlu0 %v509_v39, %s2616_s18  ;;  %v811_v39 = vmul.f32 %v810_v36, %v2932_v37 }
 0x10b   : > { %637 = vrot.lane.b32.xlu1 %v632_v41, %s2616_s18  ;;  %v932_v41 = vstv %s2228_s10  ;;  %s2224_s10 = sld [smem:[#allocation3 + $0x1e]] }
 0x10c   : > { %635 = vrot.lane.b32.xlu0 %v631_v42, %s2616_s18  ;;  %v2940_v42 = vld [vmem:[#allocation2 + $0x66] sm:$0xff]  ;;  %v934_v43 = vmul.f32 %v932_v41, %v2938_v40 }
 0x10f   : > { %759 = vrot.lane.b32.xlu1 %v754_v44, %s2616_s18  ;;  %v933_v44 = vmul.f32 %v932_v41, %v2940_v42 }
 0x110   : > { %757 = vrot.lane.b32.xlu0 %v753_v45, %s2616_s18  ;;  %v580_v45 = vstv %s2195_s17  ;;  %s2193_s17 = sld [smem:[#allocation3 + $0x6]] }
 0x111   : > { %v582_v46 = vmul.f32 %v580_v45, %v2914_v20 }
 0x113   : > { %881 = vrot.lane.b32.xlu1 %v876_v47, %s2616_s18  ;;  %v581_v47 = vmul.f32 %v580_v45, %v2916_v23 }
 0x114   : > { %879 = vrot.lane.b32.xlu0 %v875_v48, %s2616_s18  ;;  %v702_v48 = vstv %s2205_s16  ;;  %s2203_s16 = sld [smem:[#allocation3 + $0xf]] }
 0x115   : > { %v704_v50 = vmul.f32 %v702_v48, %v2922_v26 }
 0x117   : > { %537 = vrot.lane.b32.xlu1 %v532_v52, %s2615_s11  ;;  %v703_v52 = vmul.f32 %v702_v48, %v2924_v30  ;;  %v524_v48 = vstv %s2190_s13 }
 0x118   : > { %535 = vrot.lane.b32.xlu0 %v531_v53, %s2615_s11  ;;  %v824_v53 = vstv %s2217_s19  ;;  %s2215_s19 = sld [smem:[#allocation3 + $0x18]] }
 0x119   : > { %v826_v55 = vmul.f32 %v824_v53, %v2930_v35 }
 0x11b   : > { %659 = vrot.lane.b32.xlu1 %v654_v57, %s2615_s11  ;;  %v825_v57 = vmul.f32 %v824_v53, %v2932_v37 }
 0x11c   : > { %657 = vrot.lane.b32.xlu0 %v653_v58, %s2615_s11  ;;  %v946_v58 = vstv %s2229_s20  ;;  %s2988_s20 = sld [smem:[#allocation3 + $0x21]] }
 0x11d   : > { %v948_v60 = vmul.f32 %v946_v58, %v2938_v40 }
 0x11f   : > { %781 = vrot.lane.b32.xlu1 %v776_v62, %s2615_s11  ;;  %v947_v62 = vmul.f32 %v946_v58, %v2940_v42 }
 0x120   : > { %779 = vrot.lane.b32.xlu0 %v775_v63, %s2615_s11 }
 0x123   : > { %903 = vrot.lane.b32.xlu1 %v898_v3, %s2615_s11 }
 0x124   : > { %901 = vrot.lane.b32.xlu0 %v897_v4, %s2615_s11  ;;  %v605_v4 = vstv %s2196_s29 }
 0x127   : > { %551 = vrot.lane.b32.xlu1 %v546_v6, %s2616_s18  ;;  %v484_v6 = vstv %s2966_s30 }
 0x128   : > { %549 = vrot.lane.b32.xlu0 %v545_v7, %s2616_s18 }
 0x12b   : > { %673 = vrot.lane.b32.xlu1 %v668_v9, %s2616_s18  ;;  %v491_v9 = vadd.f32 %v489_v5, %v484_v6 }
 0x12c   : > { %671 = vrot.lane.b32.xlu0 %v667_v10, %s2616_s18  ;;  %v732_v10 = vstv %s2209_s9 }
 0x12d   : > { %v733_v21 = vmul.f32 %v732_v10, %v2836_v29 }
 0x12f   : > { %795 = vrot.lane.b32.xlu1 %v790_v12, %s2616_s18 }
 0x130   : > { %793 = vrot.lane.b32.xlu0 %v789_v13, %s2616_s18 }
 0x133   : > { %917 = vrot.lane.b32.xlu1 %v912_v15, %s2616_s18  ;;  %v734_v15 = vmul.f32 %v732_v10, %v2834_v27 }
 0x134   : > { %915 = vrot.lane.b32.xlu0 %v911_v16, %s2616_s18 }
 0x137   : > { %573 = vrot.lane.b32.xlu1 %v568_v24, %s2615_s11 }
 0x138   : > { %571 = vrot.lane.b32.xlu0 %v567_v25, %s2615_s11 }
 0x13b   : > { %695 = vrot.lane.b32.xlu1 %v690_v31, %s2615_s11 }
 0x13c   : > { %693 = vrot.lane.b32.xlu0 %v689_v33, %s2615_s11 }
 0x13f   : > { %817 = vrot.lane.b32.xlu1 %v812_v38, %s2615_s11  ;;  %v855_v38 = vmul.f32 %v854_v18, %v2844_v34 }
 0x140   : > { %815 = vrot.lane.b32.xlu0 %v811_v39, %s2615_s11  ;;  %v490_v39 = vmul.f32 %v488_v1, %v2827_v22  ;;  %v525_v22 = vmul.f32 %v524_v48, %v2868_v51 }
 0x143   : > { %939 = vrot.lane.b32.xlu1 %v934_v43, %s2615_s11 }
 0x144   : > { %937 = vrot.lane.b32.xlu0 %v933_v44, %s2615_s11  ;;  %s2197_s11 = sld [smem:[#allocation3 + $0x9]] }
 0x147   : > { %587 = vrot.lane.b32.xlu1 %v582_v46, %s2616_s18  ;;  %v492_v46 = vadd.f32 %v490_v39, %v484_v6  ;;  %v768_v6 = vstv %s2212_s15 }
 0x148   : > { %585 = vrot.lane.b32.xlu0 %v581_v47, %s2616_s18  ;;  %v770_v10 = vmul.f32 %v768_v6, %v2882_v59 }
 0x14a   : > { %v610_v63 = vstv %s2197_s11  ;;  %s2617_s11 = smov 124  }
 0x14b   : > { %709 = vrot.lane.b32.xlu1 %v704_v50, %s2616_s18  ;;  %v611_v3 = vmul.f32 %v610_v63, %v2820_v17  ;;  %v612_v8 = vmul.f32 %v610_v63, %v2824_v19  ;;  %v727_v17 = vstv %s2208_s25  ;;  %v856_v19 = vmul.f32 %v854_v18, %v2842_v32 }
 0x14c   : > { %707 = vrot.lane.b32.xlu0 %v703_v52, %s2616_s18  ;;  %v736_v31 = vadd.f32 %v734_v15, %v727_v17  ;;  %v735_v33 = vadd.f32 %v733_v21, %v727_v17 }
 0x14d   : > { %v613_v7 = vadd.f32 %v611_v3, %v605_v4  ;;  %v614_v14 = vadd.f32 %v612_v8, %v605_v4 }
 0x14f   : > { %831 = vrot.lane.b32.xlu1 %v826_v55, %s2616_s18  ;;  %v526_v55 = vmul.f32 %v524_v48, %v2866_v49 }
 0x150   : > { %829 = vrot.lane.b32.xlu0 %v825_v57, %s2616_s18  ;;  %v646_v57 = vstv %s2200_s14 }
 0x151   : > { %v648_v1 = vmul.f32 %v646_v57, %v2874_v54  ;;  %v647_v5 = vmul.f32 %v646_v57, %v2876_v56  ;;  %v804_v57 = vstv %s2215_s19 }
 0x153   : > { %953 = vrot.lane.b32.xlu1 %v948_v60, %s2616_s18 }
 0x154   : > { %951 = vrot.lane.b32.xlu0 %v947_v62, %s2616_s18  ;;  %s2220_s18 = sld [smem:[#allocation5 + $0x3]] }
 0x15a   : > { %v849_v36 = vstv %s2220_s18 }
 0x15b   : > { %v858_v44 = vadd.f32 %v856_v19, %v849_v36  ;;  %v857_v45 = vadd.f32 %v855_v38, %v849_v36 }
 0x169   : > { %v622_v11 = vpop.permute.xlu1 %621 }
 0x16a   : > { %v627_v12 = vadd.f32 %v622_v11, %v613_v7  ;;  %v500_v13 = vpop.permute.xlu0 %499 }
 0x16b   : > { %v505_v16 = vadd.f32 %v500_v13, %v491_v9  ;;  %v769_v13 = vmul.f32 %v768_v6, %v2884_v61  ;;  %v805_v6 = vmul.f32 %v804_v57, %v2932_v37 }
 0x16d   : > { %v624_v24 = vpop.permute.xlu1 %623 }
 0x16e   : > { %v628_v25 = vadd.f32 %v624_v24, %v614_v14  ;;  %v502_v28 = vpop.permute.xlu0 %501  ;;  %v890_v14 = vstv %s2224_s10 }
 0x16f   : > { %v506_v53 = vadd.f32 %v502_v28, %v492_v46  ;;  %v892_v21 = vmul.f32 %v890_v14, %v2890_v0  ;;  %v891_v24 = vmul.f32 %v890_v14, %v2892_v2  ;;  %v682_v46 = vstv %s2203_s16 }
 0x171   : > { %v746_v41 = vpop.permute.xlu1 %745 }
 0x172   : > { %v750_v27 = vadd.f32 %v746_v41, %v736_v31  ;;  %v744_v43 = vpop.permute.xlu0 %743 }
 0x173   : > { %v749_v29 = vadd.f32 %v744_v43, %v735_v33 }
 0x175   : > { %v868_v47 = vpop.permute.xlu1 %867 }
 0x176   : > { %v872_v50 = vadd.f32 %v868_v47, %v858_v44  ;;  %v866_v52 = vpop.permute.xlu0 %865 }
 0x177   : > { %v871_v32 = vadd.f32 %v866_v52, %v857_v45 }
 0x179   : > { %v516_v34 = vpop.permute.xlu1 %515 }
 0x17a   : > { %v520_v58 = vadd.f32 %v516_v34, %v506_v53  ;;  %v514_v60 = vpop.permute.xlu0 %513  ;;  %v684_v53 = vmul.f32 %v682_v46, %v2922_v26  ;;  %v926_v26 = vstv %s2988_s20 }
 0x17b   : > { %v519_v62 = vadd.f32 %v514_v60, %v505_v16  ;;  %v927_v14 = vmul.f32 %v926_v26, %v2940_v42 }
 0x17c   : > { %v528_v63 = vadd.f32 %v526_v55, %v520_v58 }
 0x17d   : > { %v638_v3 = vpop.permute.xlu1 %637  ;;  %v527_v4 = vadd.f32 %v525_v22, %v519_v62 }
 0x17e   : > { %v642_v7 = vadd.f32 %v638_v3, %v628_v25  ;;  %v636_v8 = vpop.permute.xlu0 %635 }
 0x17f   : > { %v641_v9 = vadd.f32 %v636_v8, %v627_v12 }
 0x180   : > { %v650_v49 = vadd.f32 %v648_v1, %v642_v7  ;;  %v806_v1 = vmul.f32 %v804_v57, %v2930_v35 }
 0x181   : > { %v760_v51 = vpop.permute.xlu1 %759  ;;  %v649_v11 = vadd.f32 %v647_v5, %v641_v9 }
 0x182   : > { %v764_v15 = vadd.f32 %v760_v51, %v750_v27  ;;  %v758_v16 = vpop.permute.xlu0 %757  ;;  %v560_v27 = vstv %s2193_s17 }
 0x183   : > { %v763_v17 = vadd.f32 %v758_v16, %v749_v29  ;;  %v562_v2 = vmul.f32 %v560_v27, %v2914_v20  ;;  %v561_v45 = vmul.f32 %v560_v27, %v2916_v23  ;;  %v683_v20 = vmul.f32 %v682_v46, %v2924_v30 }
 0x184   : > { %v772_v54 = vadd.f32 %v770_v10, %v764_v15  ;;  %v928_v30 = vmul.f32 %v926_v26, %v2938_v40 }
 0x185   : > { %v882_v18 = vpop.permute.xlu1 %881  ;;  %v771_v56 = vadd.f32 %v769_v13, %v763_v17 }
 0x186   : > { %v886_v25 = vadd.f32 %v882_v18, %v872_v50  ;;  %v880_v12 = vpop.permute.xlu0 %879 }
 0x187   : > { %v885_v28 = vadd.f32 %v880_v12, %v871_v32 }
 0x188   : > { %v894_v31 = vadd.f32 %v892_v21, %v886_v25 }
 0x189   : > { %v538_v59 = vpop.permute.xlu1 %537  ;;  %v893_v19 = vadd.f32 %v891_v24, %v885_v28 }
 0x18a   : > { %v536_v33 = vpop.permute.xlu0 %535  ;;  %v542_v43 = vadd.f32 %v538_v59, %v528_v63 }
 0x18b   : > { %v541_v44 = vadd.f32 %v536_v33, %v527_v4 }
 0x18d   : > { %v660_v36 = vpop.permute.xlu1 %659 }
 0x18e   : > { %v658_v61 = vpop.permute.xlu0 %657  ;;  %v664_v52 = vadd.f32 %v660_v36, %v650_v49 }
 0x18f   : > { %v663_v55 = vadd.f32 %v658_v61, %v649_v11 }
 0x191   : > { %v782_v38 = vpop.permute.xlu1 %781 }
 0x192   : > { %v780_v39 = vpop.permute.xlu0 %779  ;;  %v786_v62 = vadd.f32 %v782_v38, %v772_v54 }
 0x193   : > { %v785_v3 = vadd.f32 %v780_v39, %v771_v56 }
 0x195   : > { %v904_v41 = vpop.permute.xlu1 %903 }
 0x196   : > { %v902_v0 = vpop.permute.xlu0 %901  ;;  %v908_v49 = vadd.f32 %v904_v41, %v894_v31 }
 0x197   : > { %v907_v51 = vadd.f32 %v902_v0, %v893_v19 }
 0x199   : > { %v552_v29 = vpop.permute.xlu1 %551 }
 0x19a   : > { %v556_v47 = vadd.f32 %v552_v29, %v542_v43  ;;  %v550_v48 = vpop.permute.xlu0 %549 }
 0x19b   : > { %v555_v50 = vadd.f32 %v550_v48, %v541_v44 }
 0x19c   : > { %v564_v32 = vadd.f32 %v562_v2, %v556_v47 }
 0x19d   : > { %v674_v34 = vpop.permute.xlu1 %673  ;;  %v563_v22 = vadd.f32 %v561_v45, %v555_v50 }
 0x19e   : > { %v678_v58 = vadd.f32 %v674_v34, %v664_v52  ;;  %v672_v60 = vpop.permute.xlu0 %671 }
 0x19f   : > { %v677_v23 = vadd.f32 %v672_v60, %v663_v55 }
 0x1a0   : > { %v686_v63 = vadd.f32 %v684_v53, %v678_v58 }
 0x1a1   : > { %v796_v4 = vpop.permute.xlu1 %795  ;;  %v685_v5 = vadd.f32 %v683_v20, %v677_v23 }
 0x1a2   : > { %v800_v7 = vadd.f32 %v796_v4, %v786_v62  ;;  %v794_v8 = vpop.permute.xlu0 %793 }
 0x1a3   : > { %v799_v9 = vadd.f32 %v794_v8, %v785_v3 }
 0x1a4   : > { %v808_v10 = vadd.f32 %v806_v1, %v800_v7 }
 0x1a5   : > { %v918_v11 = vpop.permute.xlu1 %917  ;;  %v807_v13 = vadd.f32 %v805_v6, %v799_v9 }
 0x1a6   : > { %v922_v15 = vadd.f32 %v918_v11, %v908_v49  ;;  %v916_v35 = vpop.permute.xlu0 %915 }
 0x1a7   : > { %v921_v16 = vadd.f32 %v916_v35, %v907_v51 }
 0x1a8   : > { %v930_v17 = vadd.f32 %v928_v30, %v922_v15 }
 0x1a9   : > { %v574_v54 = vpop.permute.xlu1 %573  ;;  %v929_v21 = vadd.f32 %v927_v14, %v921_v16 }
 0x1aa   : > { %v572_v37 = vpop.permute.xlu0 %571  ;;  %v578_v31 = vadd.f32 %v574_v54, %v564_v32 }
 0x1ab   : > { %v577_v40 = vadd.f32 %v572_v37, %v563_v22 }
 0x1ad   : > { %v696_v18 = vpop.permute.xlu1 %695 }
 0x1ae   : > { %v694_v56 = vpop.permute.xlu0 %693  ;;  %v700_v42 = vadd.f32 %v696_v18, %v686_v63 }
 0x1af   : > { %v699_v61 = vadd.f32 %v694_v56, %v685_v5 }
 0x1b1   : > { %v818_v24 = vpop.permute.xlu1 %817 }
 0x1b2   : > { %v816_v25 = vpop.permute.xlu0 %815  ;;  %v822_v0 = vadd.f32 %v818_v24, %v808_v10 }
 0x1b3   : > { %v821_v43 = vadd.f32 %v816_v25, %v807_v13 }
 0x1b5   : > { %v940_v12 = vpop.permute.xlu1 %939 }
 0x1b6   : > { %v938_v28 = vpop.permute.xlu0 %937  ;;  %v944_v46 = vadd.f32 %v940_v12, %v930_v17 }
 0x1b7   : > { %v943_v47 = vadd.f32 %v938_v28, %v929_v21 }
 0x1b9   : > { %v588_v59 = vpop.permute.xlu1 %587 }
 0x1ba   : > { %v592_v19 = vadd.f32 %v588_v59, %v578_v31  ;;  %v586_v33 = vpop.permute.xlu0 %585 }
 0x1bb   : > { %v591_v36 = vadd.f32 %v586_v33, %v577_v40 }
 0x1bc   : > { %597 = vrot.lane.b32.xlu1 %v592_v19, %s2617_s11 }
 0x1bd   : > { %595 = vrot.lane.b32.xlu0 %v591_v36, %s2617_s11  ;;  %v710_v38 = vpop.permute.xlu1 %709 }
 0x1be   : > { %v714_v39 = vadd.f32 %v710_v38, %v700_v42  ;;  %v708_v41 = vpop.permute.xlu0 %707 }
 0x1bf   : > { %v713_v27 = vadd.f32 %v708_v41, %v699_v61 }
 0x1c0   : > { %719 = vrot.lane.b32.xlu1 %v714_v39, %s2617_s11 }
 0x1c1   : > { %717 = vrot.lane.b32.xlu0 %v713_v27, %s2617_s11  ;;  %v832_v2 = vpop.permute.xlu1 %831 }
 0x1c2   : > { %v836_v44 = vadd.f32 %v832_v2, %v822_v0  ;;  %v830_v29 = vpop.permute.xlu0 %829 }
 0x1c3   : > { %v835_v45 = vadd.f32 %v830_v29, %v821_v43 }
 0x1c4   : > { %841 = vrot.lane.b32.xlu1 %v836_v44, %s2617_s11 }
 0x1c5   : > { %839 = vrot.lane.b32.xlu0 %v835_v45, %s2617_s11  ;;  %v954_v48 = vpop.permute.xlu1 %953 }
 0x1c6   : > { %v958_v50 = vadd.f32 %v954_v48, %v944_v46  ;;  %v952_v52 = vpop.permute.xlu0 %951 }
 0x1c7   : > { %v957_v32 = vadd.f32 %v952_v52, %v943_v47 }
 0x1c8   : > { %963 = vrot.lane.b32.xlu1 %v958_v50, %s2617_s11 }
 0x1c9   : > { %961 = vrot.lane.b32.xlu0 %v957_v32, %s2617_s11 }
 0x22e   : > { %v598_v53 = vpop.permute.xlu1 %597 }
 0x22f   : > { %603 = vst.msk [vmem:[%s2809_s8 + $0x8] sm:$0xff] %vm601_vm3, %v598_v53  ;;  %v596_v55 = vpop.permute.xlu0 %595 }
 0x230   : > { %602 = vst.msk [vmem:[%s2809_s8] sm:$0xff] %vm601_vm3, %v596_v55 }
 0x232   : > { %v720_v34 = vpop.permute.xlu1 %719 }
 0x233   : > { %2207 = vst.msk [vmem:[%s2809_s8 + $0x18] sm:$0xff] %vm601_vm3, %v720_v34  ;;  %v718_v22 = vpop.permute.xlu0 %717 }
 0x234   : > { %2206 = vst.msk [vmem:[%s2809_s8 + $0x10] sm:$0xff] %vm601_vm3, %v718_v22 }
 0x236   : > { %v842_v20 = vpop.permute.xlu1 %841 }
 0x237   : > { %2219 = vst.msk [vmem:[%s2809_s8 + $0x28] sm:$0xff] %vm601_vm3, %v842_v20  ;;  %v840_v57 = vpop.permute.xlu0 %839 }
 0x238   : > { %2218 = vst.msk [vmem:[%s2809_s8 + $0x20] sm:$0xff] %vm601_vm3, %v840_v57 }
 0x23a   : > { %v964_v58 = vpop.permute.xlu1 %963 }
 0x23b   : > { %2231 = vst.msk [vmem:[%s2809_s8 + $0x38] sm:$0xff] %vm601_vm3, %v964_v58  ;;  %v962_v60 = vpop.permute.xlu0 %961 }
 0x23c   : > { %2230 = vst.msk [vmem:[%s2809_s8 + $0x30] sm:$0xff] %vm601_vm3, %v962_v60 }
 0x23d PF: > { %p2232_p4 = scmp.ne.s32.totalorder %s2589_s24, 1 }
 0x23e   : > { %s2234_s23 = sld [smem:[#allocation7 + $0x2]] (!%p2232_p4)  ;;  %s2233_s29 = sld [smem:[#allocation7 + $0x1]] (!%p2232_p4)  ;;  %v3014_v23 = vld [vmem:[#allocation2 + $0x5] sm:$0xff] (!%p2232_p4)  ;;  %v3016_v62 = vld [vmem:[#allocation2 + $0xd] sm:$0xff] (!%p2232_p4)  ;;  %vm1124_vm4 = vcmask (!%p2232_p4), 130048  }
 0x23f   : > { %973 = sbr.rel (%p2232_p4) target bundleno = 857 (0x359), region = 80  ;;  %s2235_s30 = sld [smem:[#allocation7 + $0x3]] (!%p2232_p4)  ;;  %v3056_v31 = vld [vmem:[#allocation2 + $0x2d] sm:$0xff] (!%p2232_p4)  ;;  %v3058_v59 = vld [vmem:[#allocation2 + $0x25] sm:$0xff] (!%p2232_p4) }
 0x240   : > { %s2236_s9 = sld [smem:[#allocation7 + $0x4]] (!%p2232_p4)  ;;  %s2618_s25 = smov (!%p2232_p4), 126  }
 0x241   : > { %s2619_s12 = smov (!%p2232_p4), 127   ;;  %s2237_s18 = sld [smem:[#allocation7 + $0x5]] (!%p2232_p4) }
 0x242   : > { %s2238_s13 = sld [smem:[#allocation7 + $0x6]] (!%p2232_p4)  ;;  %s2620_s14 = smov (!%p2232_p4), 125  }
 0x243   : > { %s2239_s15 = sld [smem:[#allocation7 + $0x7]] (!%p2232_p4)  ;;  %s2621_s10 = smov (!%p2232_p4), 124  }
 0x244   : > { %v999_v63 = vstv (!%p2232_p4), %s2234_s23  ;;  %v985_v3 = vstv (!%p2232_p4), %s2233_s29  ;;  %s2240_s17 = sld [smem:[#allocation7 + $0x8]] (!%p2232_p4)  ;;  %s2622_s16 = smov (!%p2232_p4), 123  }
 0x245   : > { %v1000_v1 = vmul.f32 (!%p2232_p4), %v999_v63, %v3014_v23  ;;  %v986_v4 = vmul.f32 (!%p2232_p4), %v985_v3, %v3014_v23  ;;  %v1001_v5 = vmul.f32 (!%p2232_p4), %v999_v63, %v3016_v62  ;;  %v987_v6 = vmul.f32 (!%p2232_p4), %v985_v3, %v3016_v62  ;;  %s2241_s19 = sld [smem:[#allocation7 + $0x9]] (!%p2232_p4)  ;;  %s2623_s20 = smov (!%p2232_p4), 122   ;;  %v3100_v63 = vld [vmem:[#allocation2 + $0x4d] sm:$0xff] (!%p2232_p4)  ;;  %v3102_v3 = vld [vmem:[#allocation2 + $0x45] sm:$0xff] (!%p2232_p4) }
 0x246   : > { %v1013_v26 = vstv %s2235_s30  ;;  %v1027_v9 = vstv %s2236_s9  ;;  %s2242_s11 = sld [smem:[#allocation7 + $0xa]]  ;;  %s2624_s23 = smov 121  }
 0x247   : > { %1004 = vrot.lane.b32.xlu1 %v1000_v1, %s2618_s25  ;;  %990 = vrot.lane.b32.xlu0 %v986_v4, %s2619_s12  ;;  %v1015_v7 = vmul.f32 %v1013_v26, %v3016_v62  ;;  %v1014_v8 = vmul.f32 %v1013_v26, %v3014_v23  ;;  %v1029_v49 = vmul.f32 %v1027_v9, %v3016_v62  ;;  %v1041_v30 = vstv %s2237_s18  ;;  %s2245_s29 = sld [smem:[#allocation7 + $0xc]]  ;;  %s2625_s30 = smov 120  }
 0x248   : > { %v1028_v10 = vmul.f32 %v1027_v9, %v3014_v23  ;;  %v1043_v51 = vmul.f32 %v1041_v30, %v3016_v62  ;;  %v1042_v11 = vmul.f32 %v1041_v30, %v3014_v23  ;;  %v1055_v13 = vstv %s2238_s13  ;;  %s2246_s9 = sld [smem:[#allocation7 + $0xd]]  ;;  %s2626_s18 = smov 119  }
 0x249   : > { %v1057_v14 = vmul.f32 %v1055_v13, %v3016_v62  ;;  %v1056_v15 = vmul.f32 %v1055_v13, %v3014_v23  ;;  %v1069_v35 = vstv %s2239_s15  ;;  %s2247_s13 = sld [smem:[#allocation7 + $0xe]]  ;;  %s2627_s15 = smov 118  }
 0x24a   : > { %v1071_v16 = vmul.f32 %v1069_v35, %v3016_v62  ;;  %v1070_v17 = vmul.f32 %v1069_v35, %v3014_v23  ;;  %v1083_v54 = vstv %s2240_s17  ;;  %s2248_s17 = sld [smem:[#allocation7 + $0xf]] }
 0x24b   : > { %1006 = vrot.lane.b32.xlu1 %v1001_v5, %s2618_s25  ;;  %992 = vrot.lane.b32.xlu0 %v987_v6, %s2619_s12  ;;  %v1085_v21 = vmul.f32 %v1083_v54, %v3016_v62  ;;  %v1084_v37 = vmul.f32 %v1083_v54, %v3014_v23  ;;  %v1097_v18 = vstv %s2241_s19  ;;  %s2249_s19 = sld [smem:[#allocation7 + $0x10]]  ;;  %v3108_v6 = vld [vmem:[#allocation2 + $0x6d] sm:$0xff] }
 0x24c   : > { %v1099_v56 = vmul.f32 %v1097_v18, %v3016_v62  ;;  %v1098_v24 = vmul.f32 %v1097_v18, %v3014_v23  ;;  %v1111_v25 = vstv %s2242_s11  ;;  %s2250_s11 = sld [smem:[#allocation7 + $0x11]] }
 0x24d   : > { %v1113_v12 = vmul.f32 %v1111_v25, %v3016_v62  ;;  %v1112_v28 = vmul.f32 %v1111_v25, %v3014_v23  ;;  %v1139_v40 = vstv %s2245_s29  ;;  %s2251_s29 = sld [smem:[#allocation7 + $0x12]] }
 0x24e   : > { %v1141_v19 = vmul.f32 %v1139_v40, %v3056_v31  ;;  %v1140_v33 = vmul.f32 %v1139_v40, %v3058_v59  ;;  %v1153_v36 = vstv %s2246_s9  ;;  %s2252_s9 = sld [smem:[#allocation7 + $0x13]] }
 0x24f   : > { %1020 = vrot.lane.b32.xlu1 %v1015_v7, %s2620_s14  ;;  %1018 = vrot.lane.b32.xlu0 %v1014_v8, %s2620_s14  ;;  %v1155_v42 = vmul.f32 %v1153_v36, %v3056_v31  ;;  %v1154_v61 = vmul.f32 %v1153_v36, %v3058_v59  ;;  %v1167_v38 = vstv %s2247_s13  ;;  %s2253_s13 = sld [smem:[#allocation7 + $0x14]]  ;;  %v3110_v7 = vld [vmem:[#allocation2 + $0x65] sm:$0xff] }
 0x250   : > { %v1169_v39 = vmul.f32 %v1167_v38, %v3056_v31  ;;  %v1168_v41 = vmul.f32 %v1167_v38, %v3058_v59  ;;  %v1181_v27 = vstv %s2248_s17  ;;  %s2254_s17 = sld [smem:[#allocation7 + $0x15]] }
 0x251   : > { %v1183_v0 = vmul.f32 %v1181_v27, %v3056_v31  ;;  %v1182_v43 = vmul.f32 %v1181_v27, %v3058_v59  ;;  %v1195_v2 = vstv %s2249_s19  ;;  %s2259_s19 = sld [smem:[#allocation7 + $0x17]] }
 0x252   : > { %v1197_v44 = vmul.f32 %v1195_v2, %v3056_v31  ;;  %v1196_v29 = vmul.f32 %v1195_v2, %v3058_v59  ;;  %v1209_v45 = vstv %s2250_s11  ;;  %s2273_s11 = sld [smem:[#allocation7 + $0x22]] }
 0x253   : > { %1034 = vrot.lane.b32.xlu1 %v1029_v49, %s2621_s10  ;;  %1032 = vrot.lane.b32.xlu0 %v1028_v10, %s2621_s10  ;;  %v1211_v46 = vmul.f32 %v1209_v45, %v3056_v31  ;;  %v1210_v47 = vmul.f32 %v1209_v45, %v3058_v59  ;;  %v1223_v48 = vstv %s2251_s29  ;;  %s2260_s29 = sld [smem:[#allocation7 + $0x18]] }
 0x254   : > { %v1225_v50 = vmul.f32 %v1223_v48, %v3056_v31  ;;  %v1224_v52 = vmul.f32 %v1223_v48, %v3058_v59  ;;  %v1237_v32 = vstv %s2252_s9  ;;  %s2274_s9 = sld [smem:[#allocation7 + $0x23]] }
 0x255   : > { %v1239_v53 = vmul.f32 %v1237_v32, %v3056_v31  ;;  %v1238_v55 = vmul.f32 %v1237_v32, %v3058_v59  ;;  %v1251_v34 = vstv %s2253_s13  ;;  %s2261_s13 = sld [smem:[#allocation7 + $0x19]] }
 0x256   : > { %v1253_v22 = vmul.f32 %v1251_v34, %v3056_v31  ;;  %v1252_v20 = vmul.f32 %v1251_v34, %v3058_v59  ;;  %v1265_v57 = vstv %s2254_s17  ;;  %s2275_s17 = sld [smem:[#allocation7 + $0x24]] }
 0x257   : > { %1048 = vrot.lane.b32.xlu1 %v1043_v51, %s2622_s16  ;;  %1046 = vrot.lane.b32.xlu0 %v1042_v11, %s2622_s16  ;;  %v1267_v58 = vmul.f32 %v1265_v57, %v3056_v31  ;;  %v1266_v60 = vmul.f32 %v1265_v57, %v3058_v59  ;;  %v1293_v1 = vstv %s2259_s19  ;;  %s2262_s19 = sld [smem:[#allocation7 + $0x1a]] }
 0x258   : > { %v1295_v4 = vmul.f32 %v1293_v1, %v3100_v63  ;;  %v1294_v5 = vmul.f32 %v1293_v1, %v3102_v3  ;;  %v1447_v26 = vstv %s2273_s11  ;;  %s2263_s11 = sld [smem:[#allocation7 + $0x1b]] }
 0x259   : > { %v1449_v8 = vmul.f32 %v1447_v26, %v3108_v6  ;;  %v1448_v9 = vmul.f32 %v1447_v26, %v3110_v7  ;;  %v1307_v49 = vstv %s2260_s29  ;;  %s2264_s29 = sld [smem:[#allocation7 + $0x1c]] }
 0x25a   : > { %v1309_v10 = vmul.f32 %v1307_v49, %v3100_v63  ;;  %v1308_v30 = vmul.f32 %v1307_v49, %v3102_v3  ;;  %v1461_v51 = vstv %s2274_s9  ;;  %s976_s9 = sld [smem:[#allocation7]] }
 0x25b   : > { %1062 = vrot.lane.b32.xlu1 %v1057_v14, %s2623_s20  ;;  %1060 = vrot.lane.b32.xlu0 %v1056_v15, %s2623_s20  ;;  %v1463_v11 = vmul.f32 %v1461_v51, %v3108_v6  ;;  %v1462_v13 = vmul.f32 %v1461_v51, %v3110_v7  ;;  %v1321_v14 = vstv %s2261_s13  ;;  %s2265_s13 = sld [smem:[#allocation7 + $0x1d]] }
 0x25c   : > { %v1323_v15 = vmul.f32 %v1321_v14, %v3100_v63  ;;  %v1322_v35 = vmul.f32 %v1321_v14, %v3102_v3 }
 0x25f   : > { %1076 = vrot.lane.b32.xlu1 %v1071_v16, %s2624_s23  ;;  %1074 = vrot.lane.b32.xlu0 %v1070_v17, %s2624_s23  ;;  %v1475_v16 = vstv %s2275_s17  ;;  %s974_s17 = sld [smem:[#allocation8]] }
 0x260   : > { %v1477_v17 = vmul.f32 %v1475_v16, %v3108_v6  ;;  %v1476_v54 = vmul.f32 %v1475_v16, %v3110_v7  ;;  %v979_v2 = vstv %s976_s9 }
 0x263   : > { %1090 = vrot.lane.b32.xlu1 %v1085_v21, %s2625_s30  ;;  %1088 = vrot.lane.b32.xlu0 %v1084_v37, %s2625_s30  ;;  %v1335_v21 = vstv %s2262_s19  ;;  %s2266_s19 = sld [smem:[#allocation7 + $0x1e]] }
 0x264   : > { %v1337_v37 = vmul.f32 %v1335_v21, %v3100_v63  ;;  %v1336_v18 = vmul.f32 %v1335_v21, %v3102_v3 }
 0x267   : > { %1104 = vrot.lane.b32.xlu1 %v1099_v56, %s2626_s18  ;;  %1102 = vrot.lane.b32.xlu0 %v1098_v24, %s2626_s18 }
 0x26b   : > { %1118 = vrot.lane.b32.xlu1 %v1113_v12, %s2627_s15  ;;  %1116 = vrot.lane.b32.xlu0 %v1112_v28, %s2627_s15  ;;  %v1349_v12 = vstv %s2263_s11  ;;  %s3186_s11 = sld [smem:[#allocation7 + $0x2b]] }
 0x26c   : > { %v1351_v28 = vmul.f32 %v1349_v12, %v3100_v63  ;;  %v1350_v40 = vmul.f32 %v1349_v12, %v3102_v3 }
 0x26f   : > { %1146 = vrot.lane.b32.xlu1 %v1141_v19, %s2619_s12  ;;  %1144 = vrot.lane.b32.xlu0 %v1140_v33, %s2619_s12 }
 0x273   : > { %1160 = vrot.lane.b32.xlu1 %v1155_v42, %s2618_s25  ;;  %1158 = vrot.lane.b32.xlu0 %v1154_v61, %s2618_s25  ;;  %v1363_v42 = vstv %s2264_s29  ;;  %s2272_s29 = sld [smem:[#allocation7 + $0x21]] }
 0x277   : > { %1174 = vrot.lane.b32.xlu1 %v1169_v39, %s2620_s14  ;;  %1172 = vrot.lane.b32.xlu0 %v1168_v41, %s2620_s14  ;;  %v1365_v39 = vmul.f32 %v1363_v42, %v3100_v63  ;;  %v1364_v41 = vmul.f32 %v1363_v42, %v3102_v3 }
 0x27b   : > { %1188 = vrot.lane.b32.xlu1 %v1183_v0, %s2621_s10  ;;  %1186 = vrot.lane.b32.xlu0 %v1182_v43, %s2621_s10 }
 0x27f   : > { %1202 = vrot.lane.b32.xlu1 %v1197_v44, %s2622_s16  ;;  %1200 = vrot.lane.b32.xlu0 %v1196_v29, %s2622_s16  ;;  %v981_v29 = vmul.f32 %v979_v2, %v3016_v62 }
 0x283   : > { %1216 = vrot.lane.b32.xlu1 %v1211_v46, %s2623_s20  ;;  %1214 = vrot.lane.b32.xlu0 %v1210_v47, %s2623_s20  ;;  %v1377_v46 = vstv %s2265_s13 }
 0x284   : > { %v1379_v32 = vmul.f32 %v1377_v46, %v3100_v63  ;;  %v1378_v62 = vmul.f32 %v1377_v46, %v3102_v3 }
 0x287   : > { %1230 = vrot.lane.b32.xlu1 %v1225_v50, %s2624_s23  ;;  %1228 = vrot.lane.b32.xlu0 %v1224_v52, %s2624_s23  ;;  %v975_v50 = vstv %s974_s17  ;;  %v980_v52 = vmul.f32 %v979_v2, %v3014_v23 }
 0x28b   : > { %1244 = vrot.lane.b32.xlu1 %v1239_v53, %s2625_s30  ;;  %1242 = vrot.lane.b32.xlu0 %v1238_v55, %s2625_s30  ;;  %v983_v53 = vadd.f32 %v981_v29, %v975_v50  ;;  %v1573_v29 = vstv %s3186_s11 }
 0x28f   : > { %1258 = vrot.lane.b32.xlu1 %v1253_v22, %s2626_s18  ;;  %1256 = vrot.lane.b32.xlu0 %v1252_v20, %s2626_s18  ;;  %v982_v20 = vadd.f32 %v980_v52, %v975_v50  ;;  %v1575_v52 = vmul.f32 %v1573_v29, %v3108_v6 }
 0x293   : > { %1272 = vrot.lane.b32.xlu1 %v1267_v58, %s2627_s15  ;;  %1270 = vrot.lane.b32.xlu0 %v1266_v60, %s2627_s15  ;;  %v1391_v60 = vstv %s2266_s19 }
 0x294   : > { %v1393_v26 = vmul.f32 %v1391_v60, %v3100_v63 }
 0x297   : > { %1300 = vrot.lane.b32.xlu1 %v1295_v4, %s2619_s12  ;;  %1298 = vrot.lane.b32.xlu0 %v1294_v5, %s2619_s12 }
 0x29b   : > { %1454 = vrot.lane.b32.xlu1 %v1449_v8, %s2619_s12  ;;  %1452 = vrot.lane.b32.xlu0 %v1448_v9, %s2619_s12  ;;  %s2276_s12 = sld [smem:[#allocation7 + $0x25]]  ;;  %v1392_v9 = vmul.f32 %v1391_v60, %v3102_v3 }
 0x29f   : > { %1314 = vrot.lane.b32.xlu1 %v1309_v10, %s2618_s25  ;;  %1312 = vrot.lane.b32.xlu0 %v1308_v30, %s2618_s25 }
 0x2a1   : > { %v1489_v56 = vstv %s2276_s12  ;;  %s3166_s12 = sld [smem:[#allocation7 + $0x1f]] }
 0x2a2   : > { %v1491_v24 = vmul.f32 %v1489_v56, %v3108_v6  ;;  %v1490_v25 = vmul.f32 %v1489_v56, %v3110_v7 }
 0x2a3   : > { %1468 = vrot.lane.b32.xlu1 %v1463_v11, %s2618_s25  ;;  %1466 = vrot.lane.b32.xlu0 %v1462_v13, %s2618_s25  ;;  %s2277_s25 = sld [smem:[#allocation7 + $0x26]] }
 0x2a7   : > { %1328 = vrot.lane.b32.xlu1 %v1323_v15, %s2620_s14  ;;  %1326 = vrot.lane.b32.xlu0 %v1322_v35, %s2620_s14  ;;  %v1405_v15 = vstv %s3166_s12 }
 0x2a8   : > { %v1406_v56 = vmul.f32 %v1405_v15, %v3102_v3 }
 0x2a9   : > { %v1503_v19 = vstv %s2277_s25  ;;  %s2257_s25 = sld [smem:[#allocation8 + $0x2]] }
 0x2aa   : > { %v1505_v33 = vmul.f32 %v1503_v19, %v3108_v6  ;;  %v1504_v36 = vmul.f32 %v1503_v19, %v3110_v7 }
 0x2ab   : > { %1482 = vrot.lane.b32.xlu1 %v1477_v17, %s2620_s14  ;;  %1480 = vrot.lane.b32.xlu0 %v1476_v54, %s2620_s14  ;;  %s2278_s14 = sld [smem:[#allocation7 + $0x27]] }
 0x2af   : > { %1342 = vrot.lane.b32.xlu1 %v1337_v37, %s2621_s10  ;;  %1340 = vrot.lane.b32.xlu0 %v1336_v18, %s2621_s10  ;;  %v1407_v37 = vmul.f32 %v1405_v15, %v3100_v63 }
 0x2b1   : > { %v1517_v27 = vstv %s2278_s14  ;;  %s2271_s14 = sld [smem:[#allocation8 + $0x3]] }
 0x2b2   : > { %v1519_v44 = vmul.f32 %v1517_v27, %v3108_v6  ;;  %v1518_v45 = vmul.f32 %v1517_v27, %v3110_v7 }
 0x2b3   : > { %1496 = vrot.lane.b32.xlu1 %v1491_v24, %s2621_s10  ;;  %1494 = vrot.lane.b32.xlu0 %v1490_v25, %s2621_s10  ;;  %s2279_s10 = sld [smem:[#allocation7 + $0x28]] }
 0x2b7   : > { %1356 = vrot.lane.b32.xlu1 %v1351_v28, %s2622_s16  ;;  %1354 = vrot.lane.b32.xlu0 %v1350_v40, %s2622_s16 }
 0x2b9   : > { %v1005_v61 = vpop.permute.xlu1 %1004  ;;  %v991_v38 = vpop.permute.xlu0 %990  ;;  %v1531_v55 = vstv %s2279_s10 }
 0x2ba   : > { %v1533_v57 = vmul.f32 %v1531_v55, %v3108_v6  ;;  %v1532_v23 = vmul.f32 %v1531_v55, %v3110_v7  ;;  %v996_v5 = vadd.f32 %v991_v38, %v982_v20 }
 0x2bb   : > { %1510 = vrot.lane.b32.xlu1 %v1505_v33, %s2622_s16  ;;  %1508 = vrot.lane.b32.xlu0 %v1504_v36, %s2622_s16  ;;  %s2280_s16 = sld [smem:[#allocation7 + $0x29]] }
 0x2bc   : > { %v1010_v51 = vadd.f32 %v1005_v61, %v996_v5 }
 0x2bd   : > { %v1007_v0 = vpop.permute.xlu1 %1006  ;;  %v993_v43 = vpop.permute.xlu0 %992 }
 0x2be   : > { %v997_v58 = vadd.f32 %v993_v43, %v983_v53 }
 0x2bf   : > { %1370 = vrot.lane.b32.xlu1 %v1365_v39, %s2623_s20  ;;  %1368 = vrot.lane.b32.xlu0 %v1364_v41, %s2623_s20 }
 0x2c0   : > { %v1011_v8 = vadd.f32 %v1007_v0, %v997_v58 }
 0x2c1   : > { %v1021_v47 = vpop.permute.xlu1 %1020  ;;  %v1019_v48 = vpop.permute.xlu0 %1018  ;;  %v1545_v49 = vstv %s2280_s16 }
 0x2c2   : > { %v1547_v11 = vmul.f32 %v1545_v49, %v3108_v6  ;;  %v1025_v13 = vadd.f32 %v1021_v47, %v1011_v8  ;;  %v1546_v14 = vmul.f32 %v1545_v49, %v3110_v7  ;;  %v1024_v35 = vadd.f32 %v1019_v48, %v1010_v51 }
 0x2c3   : > { %1524 = vrot.lane.b32.xlu1 %v1519_v44, %s2623_s20  ;;  %1522 = vrot.lane.b32.xlu0 %v1518_v45, %s2623_s20  ;;  %s3172_s20 = sld [smem:[#allocation7 + $0x2a]] }
 0x2c5   : > { %v1035_v34 = vpop.permute.xlu1 %1034  ;;  %v1033_v22 = vpop.permute.xlu0 %1032 }
 0x2c6   : > { %v1039_v17 = vadd.f32 %v1035_v34, %v1025_v13  ;;  %v1038_v21 = vadd.f32 %v1033_v22, %v1024_v35 }
 0x2c7   : > { %1384 = vrot.lane.b32.xlu1 %v1379_v32, %s2624_s23  ;;  %1382 = vrot.lane.b32.xlu0 %v1378_v62, %s2624_s23  ;;  %v1574_v32 = vmul.f32 %v1573_v29, %v3110_v7 }
 0x2c9   : > { %v1049_v1 = vpop.permute.xlu1 %1048  ;;  %v1047_v4 = vpop.permute.xlu0 %1046  ;;  %v1559_v24 = vstv %s3172_s20 }
 0x2ca   : > { %v1053_v18 = vadd.f32 %v1049_v1, %v1039_v17  ;;  %v1052_v25 = vadd.f32 %v1047_v4, %v1038_v21  ;;  %v1561_v33 = vmul.f32 %v1559_v24, %v3108_v6  ;;  %v1560_v42 = vmul.f32 %v1559_v24, %v3110_v7 }
 0x2cb   : > { %1538 = vrot.lane.b32.xlu1 %v1533_v57, %s2624_s23  ;;  %1536 = vrot.lane.b32.xlu0 %v1532_v23, %s2624_s23  ;;  %s3179_s23 = sld [smem:[#allocation7 + $0x20]] }
 0x2cd   : > { %v1063_v10 = vpop.permute.xlu1 %1062  ;;  %v1061_v30 = vpop.permute.xlu0 %1060 }
 0x2ce   : > { %v1067_v28 = vadd.f32 %v1063_v10, %v1053_v18  ;;  %v1066_v19 = vadd.f32 %v1061_v30, %v1052_v25 }
 0x2cf   : > { %1398 = vrot.lane.b32.xlu1 %v1393_v26, %s2625_s30  ;;  %1396 = vrot.lane.b32.xlu0 %v1392_v9, %s2625_s30 }
 0x2d1   : > { %v1077_v16 = vpop.permute.xlu1 %1076  ;;  %v1075_v54 = vpop.permute.xlu0 %1074  ;;  %v1419_v61 = vstv %s3179_s23 }
 0x2d2   : > { %v1081_v36 = vadd.f32 %v1077_v16, %v1067_v28  ;;  %v1080_v38 = vadd.f32 %v1075_v54, %v1066_v19  ;;  %v1421_v43 = vmul.f32 %v1419_v61, %v3100_v63  ;;  %v1420_v44 = vmul.f32 %v1419_v61, %v3102_v3 }
 0x2d3   : > { %1552 = vrot.lane.b32.xlu1 %v1547_v11, %s2625_s30  ;;  %1550 = vrot.lane.b32.xlu0 %v1546_v14, %s2625_s30  ;;  %s2244_s30 = sld [smem:[#allocation7 + $0xb]] }
 0x2d5   : > { %v1091_v12 = vpop.permute.xlu1 %1090  ;;  %v1089_v40 = vpop.permute.xlu0 %1088 }
 0x2d6   : > { %v1095_v41 = vadd.f32 %v1091_v12, %v1081_v36  ;;  %v1094_v0 = vadd.f32 %v1089_v40, %v1080_v38 }
 0x2d7   : > { %1412 = vrot.lane.b32.xlu1 %v1407_v37, %s2626_s18  ;;  %1410 = vrot.lane.b32.xlu0 %v1406_v56, %s2626_s18 }
 0x2d9   : > { %v1105_v39 = vpop.permute.xlu1 %1104  ;;  %v1103_v27 = vpop.permute.xlu0 %1102  ;;  %v1133_v22 = vstv %s2244_s30 }
 0x2da   : > { %v1109_v2 = vadd.f32 %v1105_v39, %v1095_v41  ;;  %v1108_v45 = vadd.f32 %v1103_v27, %v1094_v0  ;;  %v1135_v58 = vmul.f32 %v1133_v22, %v3056_v31  ;;  %v1134_v60 = vmul.f32 %v1133_v22, %v3058_v59 }
 0x2db   : > { %1566 = vrot.lane.b32.xlu1 %v1561_v33, %s2626_s18  ;;  %1564 = vrot.lane.b32.xlu0 %v1560_v42, %s2626_s18  ;;  %s2243_s18 = sld [smem:[#allocation8 + $0x1]] }
 0x2dd   : > { %v1119_v46 = vpop.permute.xlu1 %1118  ;;  %v1117_v48 = vpop.permute.xlu0 %1116 }
 0x2de   : > { %v1123_v47 = vadd.f32 %v1119_v46, %v1109_v2  ;;  %v1122_v50 = vadd.f32 %v1117_v48, %v1108_v45 }
 0x2df   : > { %1426 = vrot.lane.b32.xlu1 %v1421_v43, %s2627_s15  ;;  %1424 = vrot.lane.b32.xlu0 %v1420_v44, %s2627_s15 }
 0x2e0   : > { %1126 = vst.msk [vmem:[%s2809_s8 + $0x8] sm:$0xff] %vm1124_vm4, %v1123_v47  ;;  %1125 = vst.msk [vmem:[%s2809_s8] sm:$0xff] %vm1124_vm4, %v1122_v50 }
 0x2e1   : > { %v1147_v53 = vpop.permute.xlu1 %1146  ;;  %v1145_v62 = vpop.permute.xlu0 %1144  ;;  %v1128_v23 = vstv %s2243_s18 }
 0x2e2   : > { %v1137_v5 = vadd.f32 %v1135_v58, %v1128_v23  ;;  %v1136_v26 = vadd.f32 %v1134_v60, %v1128_v23 }
 0x2e3   : > { %1580 = vrot.lane.b32.xlu1 %v1575_v52, %s2627_s15  ;;  %1578 = vrot.lane.b32.xlu0 %v1574_v32, %s2627_s15  ;;  %s2258_s15 = sld [smem:[#allocation7 + $0x16]] }
 0x2e4   : > { %v1151_v49 = vadd.f32 %v1147_v53, %v1137_v5  ;;  %v1150_v10 = vadd.f32 %v1145_v62, %v1136_v26  ;;  %v1282_v5 = vstv %s2257_s25 }
 0x2e5   : > { %v1161_v55 = vpop.permute.xlu1 %1160  ;;  %v1159_v34 = vpop.permute.xlu0 %1158 }
 0x2e6   : > { %v1165_v51 = vadd.f32 %v1161_v55, %v1151_v49  ;;  %v1164_v13 = vadd.f32 %v1159_v34, %v1150_v10 }
 0x2e9   : > { %v1175_v20 = vpop.permute.xlu1 %1174  ;;  %v1173_v57 = vpop.permute.xlu0 %1172  ;;  %v1287_v23 = vstv %s2258_s15 }
 0x2ea   : > { %v1179_v14 = vadd.f32 %v1175_v20, %v1165_v51  ;;  %v1178_v15 = vadd.f32 %v1173_v57, %v1164_v13  ;;  %v1288_v26 = vmul.f32 %v1287_v23, %v3102_v3 }
 0x2ec   : > { %v1290_v51 = vadd.f32 %v1288_v26, %v1282_v5 }
 0x2ed   : > { %v1189_v1 = vpop.permute.xlu1 %1188  ;;  %v1187_v4 = vpop.permute.xlu0 %1186 }
 0x2ee   : > { %v1193_v16 = vadd.f32 %v1189_v1, %v1179_v14  ;;  %v1192_v17 = vadd.f32 %v1187_v4, %v1178_v15  ;;  %v1289_v4 = vmul.f32 %v1287_v23, %v3100_v63 }
 0x2f0   : > { %v1291_v10 = vadd.f32 %v1289_v4, %v1282_v5 }
 0x2f1   : > { %v1203_v8 = vpop.permute.xlu1 %1202  ;;  %v1201_v9 = vpop.permute.xlu0 %1200 }
 0x2f2   : > { %v1207_v54 = vadd.f32 %v1203_v8, %v1193_v16  ;;  %v1206_v59 = vadd.f32 %v1201_v9, %v1192_v17  ;;  %v1441_v8 = vstv %s2272_s29 }
 0x2f3   : > { %v1442_v13 = vmul.f32 %v1441_v8, %v3110_v7 }
 0x2f5   : > { %v1217_v30 = vpop.permute.xlu1 %1216  ;;  %v1215_v11 = vpop.permute.xlu0 %1214 }
 0x2f6   : > { %v1221_v37 = vadd.f32 %v1217_v30, %v1207_v54  ;;  %v1220_v56 = vadd.f32 %v1215_v11, %v1206_v59  ;;  %v1443_v30 = vmul.f32 %v1441_v8, %v3108_v6  ;;  %v1436_v11 = vstv %s2271_s14 }
 0x2f7   : > { %v1444_v17 = vadd.f32 %v1442_v13, %v1436_v11 }
 0x2f8   : > { %v1445_v16 = vadd.f32 %v1443_v30, %v1436_v11 }
 0x2f9   : > { %v1231_v35 = vpop.permute.xlu1 %1230  ;;  %v1229_v31 = vpop.permute.xlu0 %1228 }
 0x2fa   : > { %v1235_v24 = vadd.f32 %v1231_v35, %v1221_v37  ;;  %v1234_v25 = vadd.f32 %v1229_v31, %v1220_v56 }
 0x2fd   : > { %v1245_v21 = vpop.permute.xlu1 %1244  ;;  %v1243_v18 = vpop.permute.xlu0 %1242 }
 0x2fe   : > { %v1249_v28 = vadd.f32 %v1245_v21, %v1235_v24  ;;  %v1248_v19 = vadd.f32 %v1243_v18, %v1234_v25 }
 0x301   : > { %v1259_v12 = vpop.permute.xlu1 %1258  ;;  %v1257_v40 = vpop.permute.xlu0 %1256 }
 0x302   : > { %v1263_v33 = vadd.f32 %v1259_v12, %v1249_v28  ;;  %v1262_v36 = vadd.f32 %v1257_v40, %v1248_v19 }
 0x305   : > { %v1273_v42 = vpop.permute.xlu1 %1272  ;;  %v1271_v38 = vpop.permute.xlu0 %1270 }
 0x306   : > { %v1277_v61 = vadd.f32 %v1273_v42, %v1263_v33  ;;  %v1276_v39 = vadd.f32 %v1271_v38, %v1262_v36 }
 0x308   : > { %2256 = vst.msk [vmem:[%s2809_s8 + $0x18] sm:$0xff] %vm1124_vm4, %v1277_v61  ;;  %2255 = vst.msk [vmem:[%s2809_s8 + $0x10] sm:$0xff] %vm1124_vm4, %v1276_v39 }
 0x309   : > { %v1301_v41 = vpop.permute.xlu1 %1300  ;;  %v1299_v27 = vpop.permute.xlu0 %1298 }
 0x30a   : > { %v1305_v35 = vadd.f32 %v1301_v41, %v1291_v10  ;;  %v1304_v31 = vadd.f32 %v1299_v27, %v1290_v51 }
 0x30d   : > { %v1455_v0 = vpop.permute.xlu1 %1454  ;;  %v1453_v43 = vpop.permute.xlu0 %1452 }
 0x30e   : > { %v1459_v21 = vadd.f32 %v1455_v0, %v1445_v16  ;;  %v1458_v18 = vadd.f32 %v1453_v43, %v1444_v17 }
 0x311   : > { %v1315_v2 = vpop.permute.xlu1 %1314  ;;  %v1313_v44 = vpop.permute.xlu0 %1312 }
 0x312   : > { %v1319_v54 = vadd.f32 %v1315_v2, %v1305_v35  ;;  %v1318_v3 = vadd.f32 %v1313_v44, %v1304_v31 }
 0x315   : > { %v1469_v29 = vpop.permute.xlu1 %1468  ;;  %v1467_v45 = vpop.permute.xlu0 %1466 }
 0x316   : > { %v1473_v6 = vadd.f32 %v1469_v29, %v1459_v21  ;;  %v1472_v28 = vadd.f32 %v1467_v45, %v1458_v18 }
 0x319   : > { %v1329_v46 = vpop.permute.xlu1 %1328  ;;  %v1327_v47 = vpop.permute.xlu0 %1326 }
 0x31a   : > { %v1333_v37 = vadd.f32 %v1329_v46, %v1319_v54  ;;  %v1332_v56 = vadd.f32 %v1327_v47, %v1318_v3 }
 0x31d   : > { %v1483_v48 = vpop.permute.xlu1 %1482  ;;  %v1481_v50 = vpop.permute.xlu0 %1480 }
 0x31e   : > { %v1487_v40 = vadd.f32 %v1483_v48, %v1473_v6  ;;  %v1486_v33 = vadd.f32 %v1481_v50, %v1472_v28 }
 0x321   : > { %v1343_v52 = vpop.permute.xlu1 %1342  ;;  %v1341_v32 = vpop.permute.xlu0 %1340 }
 0x322   : > { %v1347_v25 = vadd.f32 %v1343_v52, %v1333_v37  ;;  %v1346_v7 = vadd.f32 %v1341_v32, %v1332_v56 }
 0x325   : > { %v1497_v53 = vpop.permute.xlu1 %1496  ;;  %v1495_v62 = vpop.permute.xlu0 %1494 }
 0x326   : > { %v1501_v61 = vadd.f32 %v1497_v53, %v1487_v40  ;;  %v1500_v41 = vadd.f32 %v1495_v62, %v1486_v33 }
 0x329   : > { %v1357_v55 = vpop.permute.xlu1 %1356  ;;  %v1355_v34 = vpop.permute.xlu0 %1354 }
 0x32a   : > { %v1361_v19 = vadd.f32 %v1357_v55, %v1347_v25  ;;  %v1360_v36 = vadd.f32 %v1355_v34, %v1346_v7 }
 0x32d   : > { %v1511_v22 = vpop.permute.xlu1 %1510  ;;  %v1509_v20 = vpop.permute.xlu0 %1508 }
 0x32e   : > { %v1515_v0 = vadd.f32 %v1511_v22, %v1501_v61  ;;  %v1514_v43 = vadd.f32 %v1509_v20, %v1500_v41 }
 0x331   : > { %v1371_v57 = vpop.permute.xlu1 %1370  ;;  %v1369_v58 = vpop.permute.xlu0 %1368 }
 0x332   : > { %v1375_v38 = vadd.f32 %v1371_v57, %v1361_v19  ;;  %v1374_v27 = vadd.f32 %v1369_v58, %v1360_v36 }
 0x335   : > { %v1525_v60 = vpop.permute.xlu1 %1524  ;;  %v1523_v1 = vpop.permute.xlu0 %1522 }
 0x336   : > { %v1529_v29 = vadd.f32 %v1525_v60, %v1515_v0  ;;  %v1528_v48 = vadd.f32 %v1523_v1, %v1514_v43 }
 0x339   : > { %v1385_v9 = vpop.permute.xlu1 %1384  ;;  %v1383_v49 = vpop.permute.xlu0 %1382 }
 0x33a   : > { %v1389_v2 = vadd.f32 %v1385_v9, %v1375_v38  ;;  %v1388_v44 = vadd.f32 %v1383_v49, %v1374_v27 }
 0x33d   : > { %v1539_v14 = vpop.permute.xlu1 %1538  ;;  %v1537_v15 = vpop.permute.xlu0 %1536 }
 0x33e   : > { %v1543_v50 = vadd.f32 %v1539_v14, %v1529_v29  ;;  %v1542_v55 = vadd.f32 %v1537_v15, %v1528_v48 }
 0x341   : > { %v1399_v63 = vpop.permute.xlu1 %1398  ;;  %v1397_v59 = vpop.permute.xlu0 %1396 }
 0x342   : > { %v1403_v47 = vadd.f32 %v1399_v63, %v1389_v2  ;;  %v1402_v52 = vadd.f32 %v1397_v59, %v1388_v44 }
 0x345   : > { %v1553_v24 = vpop.permute.xlu1 %1552  ;;  %v1551_v12 = vpop.permute.xlu0 %1550 }
 0x346   : > { %v1557_v34 = vadd.f32 %v1553_v24, %v1543_v50  ;;  %v1556_v20 = vadd.f32 %v1551_v12, %v1542_v55 }
 0x349   : > { %v1413_v42 = vpop.permute.xlu1 %1412  ;;  %v1411_v39 = vpop.permute.xlu0 %1410 }
 0x34a   : > { %v1417_v32 = vadd.f32 %v1413_v42, %v1403_v47  ;;  %v1416_v53 = vadd.f32 %v1411_v39, %v1402_v52 }
 0x34d   : > { %v1567_v46 = vpop.permute.xlu1 %1566  ;;  %v1565_v45 = vpop.permute.xlu0 %1564 }
 0x34e   : > { %v1571_v23 = vadd.f32 %v1567_v46, %v1557_v34  ;;  %v1570_v60 = vadd.f32 %v1565_v45, %v1556_v20 }
 0x351   : > { %v1427_v62 = vpop.permute.xlu1 %1426  ;;  %v1425_v57 = vpop.permute.xlu0 %1424 }
 0x352   : > { %v1431_v22 = vadd.f32 %v1427_v62, %v1417_v32  ;;  %v1430_v58 = vadd.f32 %v1425_v57, %v1416_v53 }
 0x354   : > { %2270 = vst.msk [vmem:[%s2809_s8 + $0x28] sm:$0xff] %vm1124_vm4, %v1431_v22  ;;  %2269 = vst.msk [vmem:[%s2809_s8 + $0x20] sm:$0xff] %vm1124_vm4, %v1430_v58 }
 0x355   : > { %v1581_v1 = vpop.permute.xlu1 %1580  ;;  %v1579_v5 = vpop.permute.xlu0 %1578 }
 0x356   : > { %v1585_v4 = vadd.f32 %v1581_v1, %v1571_v23  ;;  %v1584_v26 = vadd.f32 %v1579_v5, %v1570_v60 }
 0x358   : > { %2284 = vst.msk [vmem:[%s2809_s8 + $0x38] sm:$0xff] %vm1124_vm4, %v1585_v4  ;;  %2283 = vst.msk [vmem:[%s2809_s8 + $0x30] sm:$0xff] %vm1124_vm4, %v1584_v26 }
 0x359 PF: > { %p2285_p6 = scmp.ne.s32.totalorder %s2589_s24, 2 }
 0x35a   : > { %s3227_s9 = sld [smem:[#allocation11 + $0x1]] (!%p2285_p6)  ;;  %s2297_s13 = sld [smem:[#allocation10 + $0xb]] (!%p2285_p6)  ;;  %v1698_v8 = vld [vmem:[#allocation2 + $0x20] sm:$0xff] (!%p2285_p6)  ;;  %v1699_v49 = vld [vmem:[#allocation2 + $0x28] sm:$0xff] (!%p2285_p6)  ;;  %v1763_v32 = vld [vmem:[#allocation2 + $0x30] sm:$0xff] (!%p2285_p6)  ;;  %vm1691_vm5 = vcmask (!%p2285_p6), 130048  }
 0x35b   : > { %1592 = sbr.rel (%p2285_p6) target bundleno = 1049 (0x419), region = 84  ;;  %s3229_s17 = sld [smem:[#allocation10 + $0xc]] (!%p2285_p6)  ;;  %v1706_v9 = vld [vmem:[#allocation2 + $0x21] sm:$0xff] (!%p2285_p6)  ;;  %v3247_v14 = vld [vmem:[#allocation2 + $0x29] sm:$0xff] (!%p2285_p6)  ;;  %v1771_v23 = vld [vmem:[#allocation2 + $0x31] sm:$0xff] (!%p2285_p6) }
 0x35c   : > { %s3231_s10 = sld [smem:[#allocation10 + $0xd]] (!%p2285_p6)  ;;  %s3233_s19 = sld [smem:[#allocation10 + $0xe]] (!%p2285_p6)  ;;  %v1714_v11 = vld [vmem:[#allocation2 + $0x22] sm:$0xff] (!%p2285_p6)  ;;  %v3259_v54 = vld [vmem:[#allocation2 + $0x2a] sm:$0xff] (!%p2285_p6)  ;;  %v1779_v60 = vld [vmem:[#allocation2 + $0x32] sm:$0xff] (!%p2285_p6) }
 0x35d   : > { %s3235_s16 = sld [smem:[#allocation10 + $0xf]] (!%p2285_p6)  ;;  %s3237_s12 = sld [smem:[#allocation10 + $0x10]] (!%p2285_p6)  ;;  %v1722_v31 = vld [vmem:[#allocation2 + $0x23] sm:$0xff] (!%p2285_p6)  ;;  %v1723_v3 = vld [vmem:[#allocation2 + $0x2b] sm:$0xff] (!%p2285_p6) }
 0x35e   : > { %s3239_s20 = sld [smem:[#allocation10 + $0x11]] (!%p2285_p6)  ;;  %s3241_s24 = sld [smem:[#allocation10 + $0x12]] (!%p2285_p6)  ;;  %v1730_v21 = vld [vmem:[#allocation2 + $0x24] sm:$0xff] (!%p2285_p6)  ;;  %v1731_v18 = vld [vmem:[#allocation2 + $0x2c] sm:$0xff] (!%p2285_p6) }
 0x35f   : > { %s3243_s23 = sld [smem:[#allocation10 + $0x13]] (!%p2285_p6)  ;;  %s3249_s11 = sld [smem:[#allocation10 + $0x14]] (!%p2285_p6)  ;;  %v1738_v24 = vld [vmem:[#allocation2 + $0x25] sm:$0xff] (!%p2285_p6)  ;;  %v1739_v12 = vld [vmem:[#allocation2 + $0x2d] sm:$0xff] (!%p2285_p6) }
 0x360   : > { %v1695_v10 = vstv (!%p2285_p6), %s3227_s9  ;;  %v1700_v30 = vstv (!%p2285_p6), %s2297_s13  ;;  %s3251_s30 = sld [smem:[#allocation11]] (!%p2285_p6)  ;;  %s3257_s15 = sld [smem:[#allocation10 + $0x1]] (!%p2285_p6)  ;;  %v1746_v7 = vld [vmem:[#allocation2 + $0x26] sm:$0xff] (!%p2285_p6)  ;;  %v1747_v40 = vld [vmem:[#allocation2 + $0x2e] sm:$0xff] (!%p2285_p6) }
 0x361   : > { %v1708_v51 = vstv (!%p2285_p6), %s3229_s17  ;;  %v1701_v13 = vmul.f32 (!%p2285_p6), %v1700_v30, %v1698_v8  ;;  %v1702_v35 = vmul.f32 (!%p2285_p6), %v1700_v30, %v1699_v49  ;;  %s3255_s18 = sld [smem:[#allocation10]] (!%p2285_p6)  ;;  %s3261_s25 = sld [smem:[#allocation10 + $0x15]] (!%p2285_p6)  ;;  %v1754_v61 = vld [vmem:[#allocation2 + $0x27] sm:$0xff] (!%p2285_p6)  ;;  %v1755_v38 = vld [vmem:[#allocation2 + $0x2f] sm:$0xff] (!%p2285_p6) }
 0x362   : > { %v1709_v15 = vmul.f32 %v1708_v51, %v1706_v9  ;;  %v1716_v16 = vstv %s3231_s10  ;;  %v1724_v17 = vstv %s3233_s19  ;;  %v3264_v37 = vmul.f32 %v1708_v51, %v3247_v14  ;;  %s3267_s29 = sld [smem:[#allocation10 + $0x2]]  ;;  %s3269_s14 = sld [smem:[#allocation10 + $0x3]]  ;;  %v1596_v47 = vld [vmem:[#allocation2] sm:$0xff]  ;;  %v3296_v53 = vld [vmem:[#allocation2 + $0x8] sm:$0xff] }
 0x363   : > { %v1703_v63 = vadd.f32 %v1701_v13, %v1695_v10  ;;  %v1717_v59 = vmul.f32 %v1716_v16, %v1714_v11  ;;  %v1732_v56 = vstv %s3235_s16  ;;  %v1725_v25 = vmul.f32 %v1724_v17, %v1722_v31  ;;  %s3281_s9 = sld [smem:[#allocation10 + $0x4]]  ;;  %s3286_s13 = sld [smem:[#allocation10 + $0x5]]  ;;  %v1604_v45 = vld [vmem:[#allocation2 + $0x1] sm:$0xff]  ;;  %v3315_v13 = vld [vmem:[#allocation2 + $0x9] sm:$0xff] }
 0x364   : > { %v1740_v28 = vstv %s3237_s12  ;;  %v1748_v19 = vstv %s3239_s20  ;;  %v3273_v33 = vadd.f32 %v1702_v35, %v1695_v10  ;;  %v3276_v36 = vmul.f32 %v1716_v16, %v3259_v54  ;;  %s3292_s17 = sld [smem:[#allocation10 + $0x6]]  ;;  %s3298_s10 = sld [smem:[#allocation10 + $0x7]]  ;;  %v1612_v20 = vld [vmem:[#allocation2 + $0x2] sm:$0xff] }
 0x365   : > { %v1711_v6 = vadd.f32 %v1709_v15, %v1703_v63  ;;  %v3278_v42 = vmul.f32 %v1724_v17, %v1723_v3  ;;  %v1756_v39 = vstv %s3241_s24  ;;  %v1733_v27 = vmul.f32 %v1732_v56, %v1730_v21  ;;  %s3304_s19 = sld [smem:[#allocation10 + $0x8]]  ;;  %s3312_s16 = sld [smem:[#allocation10 + $0x9]]  ;;  %v3317_v15 = vld [vmem:[#allocation2 + $0xa] sm:$0xff] }
 0x366   : > { %v3283_v0 = vmul.f32 %v1732_v56, %v1731_v18  ;;  %v1764_v2 = vstv %s3243_s23  ;;  %v1741_v43 = vmul.f32 %v1740_v28, %v1738_v24  ;;  %v3288_v44 = vmul.f32 %v1740_v28, %v1739_v12  ;;  %s3319_s12 = sld [smem:[#allocation10 + $0xa]]  ;;  %v1628_v63 = vld [vmem:[#allocation2 + $0x4] sm:$0xff]  ;;  %s3329_s24 = sld [smem:[#allocation10 + $0x16]]  ;;  %v1629_v56 = vld [vmem:[#allocation2 + $0xc] sm:$0xff] }
 0x367   : > { %v1719_v41 = vadd.f32 %v1717_v59, %v1711_v6  ;;  %v1749_v46 = vmul.f32 %v1748_v19, %v1746_v7  ;;  %v3290_v29 = vmul.f32 %v1748_v19, %v1747_v40  ;;  %v1757_v52 = vmul.f32 %v1756_v39, %v1754_v61  ;;  %s3327_s20 = sld [smem:[#allocation11 + $0x2]]  ;;  %v1621_v21 = vld [vmem:[#allocation2 + $0xb] sm:$0xff]  ;;  %s3332_s23 = sld [smem:[#allocation10 + $0x17]] }
 0x368   : > { %v3294_v50 = vmul.f32 %v1756_v39, %v1755_v38  ;;  %v1765_v55 = vmul.f32 %v1764_v2, %v1699_v49  ;;  %v1772_v62 = vstv %s3249_s11  ;;  %v1594_v34 = vstv %s3251_s30  ;;  %v1620_v49 = vld [vmem:[#allocation2 + $0x3] sm:$0xff]  ;;  %v1637_v28 = vld [vmem:[#allocation2 + $0xd] sm:$0xff]  ;;  %s3337_s11 = sld [smem:[#allocation10 + $0x18]]  ;;  %s3340_s30 = sld [smem:[#allocation10 + $0x19]] }
 0x369   : > { %v1727_v48 = vadd.f32 %v1725_v25, %v1719_v41  ;;  %v1598_v22 = vstv %s3255_s18  ;;  %v1606_v57 = vstv %s3257_s15  ;;  %v1780_v1 = vstv %s3261_s25  ;;  %v1636_v24 = vld [vmem:[#allocation2 + $0x5] sm:$0xff]  ;;  %v1645_v39 = vld [vmem:[#allocation2 + $0xe] sm:$0xff]  ;;  %s3343_s18 = sld [smem:[#allocation10 + $0x1a]]  ;;  %s3356_s15 = sld [smem:[#allocation10 + $0x1b]] }
 0x36a   : > { %v1599_v4 = vmul.f32 %v1598_v22, %v1596_v47  ;;  %v1607_v5 = vmul.f32 %v1606_v57, %v1604_v45  ;;  %v3307_v26 = vmul.f32 %v1764_v2, %v1763_v32  ;;  %v1600_v8 = vmul.f32 %v1598_v22, %v3296_v53  ;;  %v1644_v7 = vld [vmem:[#allocation2 + $0x6] sm:$0xff]  ;;  %s3364_s25 = sld [smem:[#allocation10 + $0x1c]]  ;;  %s3573_s1 = smov 123  }
 0x36b   : > { %v1735_v58 = vadd.f32 %v1733_v27, %v1727_v48  ;;  %v1614_v9 = vstv %s3267_s29  ;;  %v1622_v10 = vstv %s3269_s14  ;;  %v1773_v51 = vmul.f32 %v1772_v62, %v3247_v14  ;;  %v1652_v41 = vld [vmem:[#allocation2 + $0x7] sm:$0xff]  ;;  %s3366_s29 = sld [smem:[#allocation10 + $0x1d]]  ;;  %s3561_s14 = smov 123  }
 0x36c   : > { %v1601_v11 = vadd.f32 %v1599_v4, %v1594_v34  ;;  %v1615_v35 = vmul.f32 %v1614_v9, %v1612_v20  ;;  %v3321_v16 = vmul.f32 %v1772_v62, %v1771_v23  ;;  %v1781_v31 = vmul.f32 %v1780_v1, %v3259_v54  ;;  %v3354_v20 = vld [vmem:[#allocation2 + $0x48] sm:$0xff]  ;;  %s3438_s0 = sld [smem:[#allocation10 + $0x24]] }
 0x36d   : > { %v1743_v30 = vadd.f32 %v1741_v43, %v1735_v58  ;;  %v3324_v17 = vmul.f32 %v1780_v1, %v1779_v60  ;;  %v1630_v59 = vstv %s3281_s9  ;;  %v1623_v18 = vmul.f32 %v1622_v10, %v1620_v49  ;;  %v3362_v1 = vld [vmem:[#allocation2 + $0x49] sm:$0xff]  ;;  %s3389_s9 = sld [smem:[#allocation10 + $0x1e]] }
 0x36e   : > { %v1609_v3 = vadd.f32 %v1607_v5, %v1601_v11  ;;  %v1638_v6 = vstv %s3286_s13  ;;  %v1602_v54 = vadd.f32 %v1600_v8, %v1594_v34  ;;  %v1608_v25 = vmul.f32 %v1606_v57, %v3315_v13  ;;  %v3371_v8 = vld [vmem:[#allocation2 + $0x4a] sm:$0xff]  ;;  %s3394_s13 = sld [smem:[#allocation10 + $0x1f]] }
 0x36f   : > { %v1751_v14 = vadd.f32 %v1749_v46, %v1743_v30  ;;  %v1616_v12 = vmul.f32 %v1614_v9, %v3317_v15  ;;  %v1646_v40 = vstv %s3292_s17  ;;  %v1631_v38 = vmul.f32 %v1630_v59, %v1628_v63  ;;  %s3401_s17 = sld [smem:[#allocation10 + $0x20]] }
 0x370   : > { %v1617_v61 = vadd.f32 %v1615_v35, %v1609_v3  ;;  %v1654_v27 = vstv %s3298_s10  ;;  %v1624_v2 = vmul.f32 %v1622_v10, %v1621_v21  ;;  %v1632_v43 = vmul.f32 %v1630_v59, %v1629_v56  ;;  %v1825_v35 = vld [vmem:[#allocation2 + $0x4b] sm:$0xff]  ;;  %s3419_s10 = sld [smem:[#allocation10 + $0x21]] }
 0x371   : > { %v1759_v19 = vadd.f32 %v1757_v52, %v1751_v14  ;;  %v1639_v46 = vmul.f32 %v1638_v6, %v1636_v24  ;;  %v1662_v47 = vstv %s3304_s19  ;;  %v3345_v52 = vmul.f32 %v1638_v6, %v1637_v28  ;;  %v1653_v24 = vld [vmem:[#allocation2 + $0xf] sm:$0xff]  ;;  %s3427_s19 = sld [smem:[#allocation10 + $0x22]] }
 0x372   : > { %v1625_v48 = vadd.f32 %v1623_v18, %v1617_v61  ;;  %v1647_v32 = vmul.f32 %v1646_v40, %v1644_v7  ;;  %v3347_v62 = vmul.f32 %v1646_v40, %v1645_v39  ;;  %v1655_v34 = vmul.f32 %v1654_v27, %v1652_v41  ;;  %v1849_v41 = vld [vmem:[#allocation2 + $0x4e] sm:$0xff] }
 0x373   : > { %v1767_v45 = vadd.f32 %v1765_v55, %v1759_v19  ;;  %v1670_v22 = vstv %s3312_s16  ;;  %v1712_v57 = vadd.f32 %v3264_v37, %v3273_v33  ;;  %v1663_v23 = vmul.f32 %v1662_v47, %v3296_v53  ;;  %v1841_v19 = vld [vmem:[#allocation2 + $0x4d] sm:$0xff]  ;;  %s3417_s16 = sld [smem:[#allocation11 + $0x3]] }
 0x374   : > { %v1633_v58 = vadd.f32 %v1631_v38, %v1625_v48  ;;  %v1678_v60 = vstv %s3319_s12  ;;  %v1610_v33 = vadd.f32 %v1608_v25, %v1602_v54  ;;  %v1797_v4 = vstv %s3327_s20  ;;  %v1661_v54 = vld [vmem:[#allocation2 + $0x10] sm:$0xff]  ;;  %s3459_s20 = sld [smem:[#allocation10 + $0x26]]  ;;  %s3472_s12 = sld [smem:[#allocation10 + $0x27]] }
 0x375   : > { %v1775_v55 = vadd.f32 %v1773_v51, %v1767_v45  ;;  %v1720_v37 = vadd.f32 %v3276_v36, %v1712_v57  ;;  %v1802_v5 = vstv %s3329_s24  ;;  %v1810_v10 = vstv %s3332_s23  ;;  %s3446_s24 = sld [smem:[#allocation10 + $0x25]]  ;;  %s3481_s23 = sld [smem:[#allocation10 + $0x28]] }
 0x376   : > { %v1641_v9 = vadd.f32 %v1639_v46, %v1633_v58  ;;  %v1804_v49 = vmul.f32 %v1802_v5, %v3354_v20  ;;  %v1618_v51 = vadd.f32 %v1616_v12, %v1610_v33  ;;  %v1812_v36 = vmul.f32 %v1810_v10, %v3362_v1 }
 0x377   : > { %v1783_v53 = vadd.f32 %v1781_v31, %v1775_v55  ;;  %v1728_v30 = vadd.f32 %v3278_v42, %v1720_v37  ;;  %v1818_v11 = vstv %s3337_s11  ;;  %v1826_v14 = vstv %s3340_s30  ;;  %v1833_v42 = vld [vmem:[#allocation2 + $0x4c] sm:$0xff]  ;;  %s3489_s11 = sld [smem:[#allocation10 + $0x29]]  ;;  %s3494_s30 = sld [smem:[#allocation10 + $0x2a]] }
 0x378   : > { %v1649_v63 = vadd.f32 %v1647_v32, %v1641_v9  ;;  %v1806_v31 = vadd.f32 %v1804_v49, %v1797_v4  ;;  %v1820_v59 = vmul.f32 %v1818_v11, %v3371_v8  ;;  %v1671_v3 = vmul.f32 %v1670_v22, %v3315_v13  ;;  %v1800_v32 = vld [vmem:[#allocation2 + $0x40] sm:$0xff]  ;;  %v1677_v37 = vld [vmem:[#allocation2 + $0x12] sm:$0xff] }
 0x379   : > { %1787 = vrot.lane.b32.xlu1 %v1783_v53, %s3561_s14  ;;  %v1736_v21 = vadd.f32 %v3283_v0, %v1728_v30  ;;  %v1626_v18 = vadd.f32 %v1624_v2, %v1618_v51  ;;  %v1834_v56 = vstv %s3343_s18  ;;  %v1679_v25 = vmul.f32 %v1678_v60, %v3317_v15  ;;  %v1669_v0 = vld [vmem:[#allocation2 + $0x11] sm:$0xff]  ;;  %s3429_s14 = sld [smem:[#allocation10 + $0x23]] }
 0x37a   : > { %v1657_v6 = vadd.f32 %v1655_v34, %v1649_v63  ;;  %v1814_v12 = vadd.f32 %v1812_v36, %v1806_v31  ;;  %v1828_v13 = vmul.f32 %v1826_v14, %v1825_v35  ;;  %v1836_v40 = vmul.f32 %v1834_v56, %v1833_v42  ;;  %v1857_v2 = vld [vmem:[#allocation2 + $0x4f] sm:$0xff]  ;;  %v1824_v63 = vld [vmem:[#allocation2 + $0x43] sm:$0xff] }
 0x37b   : > { %v1744_v28 = vadd.f32 %v3288_v44, %v1736_v21  ;;  %v1634_v7 = vadd.f32 %v1632_v43, %v1626_v18  ;;  %v1842_v61 = vstv %s3356_s15  ;;  %v1850_v15 = vstv %s3364_s25  ;;  %v1873_v51 = vld [vmem:[#allocation2 + $0x51] sm:$0xff] }
 0x37c   : > { %v1665_v38 = vadd.f32 %v1663_v23, %v1657_v6  ;;  %v1822_v39 = vadd.f32 %v1820_v59, %v1814_v12  ;;  %v1858_v46 = vstv %s3366_s29  ;;  %v1656_v45 = vmul.f32 %v1654_v27, %v1653_v24  ;;  %v1808_v23 = vld [vmem:[#allocation2 + $0x41] sm:$0xff]  ;;  %v1881_v59 = vld [vmem:[#allocation2 + $0x52] sm:$0xff] }
 0x37d   : > { %v1664_v48 = vmul.f32 %v1662_v47, %v1661_v54  ;;  %v1752_v44 = vadd.f32 %v3290_v29, %v1744_v28  ;;  %v1642_v43 = vadd.f32 %v3345_v52, %v1634_v7  ;;  %v1672_v34 = vmul.f32 %v1670_v22, %v1669_v0  ;;  %v1816_v22 = vld [vmem:[#allocation2 + $0x42] sm:$0xff] }
 0x37e   : > { %v1673_v57 = vadd.f32 %v1671_v3, %v1665_v38  ;;  %v1830_v55 = vadd.f32 %v1828_v13, %v1822_v39  ;;  %v1844_v58 = vmul.f32 %v1842_v61, %v1841_v19  ;;  %v1852_v47 = vmul.f32 %v1850_v15, %v1849_v41  ;;  %v1832_v3 = vld [vmem:[#allocation2 + $0x44] sm:$0xff] }
 0x37f   : > { %v1760_v27 = vadd.f32 %v3294_v50, %v1752_v44  ;;  %v1650_v29 = vadd.f32 %v3347_v62, %v1642_v43  ;;  %v1860_v52 = vmul.f32 %v1858_v46, %v1857_v2  ;;  %v1865_v50 = vld [vmem:[#allocation2 + $0x50] sm:$0xff]  ;;  %v1866_v9 = vstv %s3389_s9  ;;  %v1840_v0 = vld [vmem:[#allocation2 + $0x45] sm:$0xff] }
 0x380   : > { %v1681_v33 = vadd.f32 %v1679_v25, %v1673_v57  ;;  %v1838_v53 = vadd.f32 %v1836_v40, %v1830_v55  ;;  %v1803_v62 = vmul.f32 %v1802_v5, %v1800_v32  ;;  %v1874_v36 = vstv %s3394_s13  ;;  %v3466_v28 = vld [vmem:[#allocation2 + $0x69] sm:$0xff] }
 0x381   : > { %v1768_v49 = vadd.f32 %v3307_v26, %v1760_v27  ;;  %v1658_v30 = vadd.f32 %v1656_v45, %v1650_v29  ;;  %v1811_v35 = vmul.f32 %v1810_v10, %v1808_v23  ;;  %v1882_v42 = vstv %s3401_s17  ;;  %v3470_v38 = vld [vmem:[#allocation2 + $0x6a] sm:$0xff] }
 0x382   : > { %1685 = vrot.lane.b32.xlu0 %v1681_v33, %s3573_s1  ;;  %v1846_v31 = vadd.f32 %v1844_v58, %v1838_v53  ;;  %v1805_v5 = vadd.f32 %v1803_v62, %v1797_v4  ;;  %v1819_v26 = vmul.f32 %v1818_v11, %v1816_v22  ;;  %v1680_v10 = vmul.f32 %v1678_v60, %v1677_v37  ;;  %v3457_v11 = vld [vmem:[#allocation2 + $0x68] sm:$0xff] }
 0x383   : > { %v1776_v21 = vadd.f32 %v3321_v16, %v1768_v49  ;;  %v1666_v18 = vadd.f32 %v1664_v48, %v1658_v30  ;;  %v1868_v24 = vmul.f32 %v1866_v9, %v1865_v50  ;;  %v1876_v54 = vmul.f32 %v1874_v36, %v1873_v51  ;;  %v1848_v39 = vld [vmem:[#allocation2 + $0x46] sm:$0xff] }
 0x384   : > { %v1854_v6 = vadd.f32 %v1852_v47, %v1846_v31  ;;  %v1813_v4 = vadd.f32 %v1811_v35, %v1805_v5  ;;  %v1827_v25 = vmul.f32 %v1826_v14, %v1824_v63  ;;  %v1884_v16 = vmul.f32 %v1882_v42, %v1881_v59  ;;  %v1927_v32 = vld [vmem:[#allocation2 + $0x6b] sm:$0xff]  ;;  %v1902_v49 = vld [vmem:[#allocation2 + $0x60] sm:$0xff] }
 0x385   : > { %v1784_v12 = vadd.f32 %v3324_v17, %v1776_v21  ;;  %v1674_v60 = vadd.f32 %v1672_v34, %v1666_v18  ;;  %v1835_v13 = vmul.f32 %v1834_v56, %v1832_v3  ;;  %v1899_v14 = vstv %s3417_s16  ;;  %v1856_v34 = vld [vmem:[#allocation2 + $0x47] sm:$0xff] }
 0x386   : > { %v1862_v7 = vadd.f32 %v1860_v52, %v1854_v6  ;;  %v1821_v40 = vadd.f32 %v1819_v26, %v1813_v4  ;;  %v1904_v19 = vstv %s3419_s10  ;;  %v1912_v56 = vstv %s3427_s19  ;;  %v1935_v47 = vld [vmem:[#allocation2 + $0x6c] sm:$0xff]  ;;  %v1910_v30 = vld [vmem:[#allocation2 + $0x61] sm:$0xff] }
 0x387   : > { %1789 = vrot.lane.b32.xlu1 %v1784_v12, %s3573_s1  ;;  %v1682_v17 = vadd.f32 %v1680_v10, %v1674_v60  ;;  %v1906_v41 = vmul.f32 %v1904_v19, %v3457_v11  ;;  %v1920_v2 = vstv %s3429_s14  ;;  %v1843_v44 = vmul.f32 %v1842_v61, %v1840_v0  ;;  %v1943_v50 = vld [vmem:[#allocation2 + $0x6d] sm:$0xff]  ;;  %v1934_v0 = vld [vmem:[#allocation2 + $0x64] sm:$0xff] }
 0x388   : > { %v1870_v45 = vadd.f32 %v1868_v24, %v1862_v7  ;;  %v1829_v48 = vadd.f32 %v1827_v25, %v1821_v40  ;;  %v1914_v43 = vmul.f32 %v1912_v56, %v3466_v28  ;;  %v1922_v55 = vmul.f32 %v1920_v2, %v3470_v38  ;;  %v1951_v31 = vld [vmem:[#allocation2 + $0x6e] sm:$0xff] }
 0x389   : > { %1687 = vrot.lane.b32.xlu0 %v1682_v17, %s3573_s1  ;;  %v1908_v57 = vadd.f32 %v1906_v41, %v1899_v14  ;;  %v1928_v58 = vstv %s3438_s0  ;;  %v1851_v29 = vmul.f32 %v1850_v15, %v1848_v39  ;;  %v1936_v61 = vstv %s3446_s24  ;;  %s3501_s0 = sld [smem:[#allocation10 + $0x2b]]  ;;  %v1959_v24 = vld [vmem:[#allocation2 + $0x6f] sm:$0xff]  ;;  %v1942_v41 = vld [vmem:[#allocation2 + $0x65] sm:$0xff] }
 0x38a   : > { %v1878_v23 = vadd.f32 %v1876_v54, %v1870_v45  ;;  %v1837_v27 = vadd.f32 %v1835_v13, %v1829_v48  ;;  %v1930_v22 = vmul.f32 %v1928_v58, %v1927_v32  ;;  %v1859_v53 = vmul.f32 %v1858_v46, %v1856_v34  ;;  %v1918_v46 = vld [vmem:[#allocation2 + $0x62] sm:$0xff]  ;;  %v1975_v17 = vld [vmem:[#allocation2 + $0x71] sm:$0xff] }
 0x38b   : > { %v1916_v52 = vadd.f32 %v1914_v43, %v1908_v57  ;;  %v1944_v62 = vstv %s3459_s20  ;;  %v1938_v51 = vmul.f32 %v1936_v61, %v1935_v47  ;;  %v1867_v63 = vmul.f32 %v1866_v9, %v3354_v20  ;;  %v1926_v54 = vld [vmem:[#allocation2 + $0x63] sm:$0xff] }
 0x38c   : > { %v1886_v37 = vadd.f32 %v1884_v16, %v1878_v23  ;;  %v1845_v33 = vadd.f32 %v1843_v44, %v1837_v27  ;;  %v1952_v59 = vstv %s3472_s12  ;;  %v1946_v26 = vmul.f32 %v1944_v62, %v1943_v50  ;;  %v1967_v16 = vld [vmem:[#allocation2 + $0x70] sm:$0xff] }
 0x38d   : > { %v1924_v15 = vadd.f32 %v1922_v55, %v1916_v52  ;;  %v1905_v3 = vmul.f32 %v1904_v19, %v1902_v49  ;;  %v1913_v10 = vmul.f32 %v1912_v56, %v1910_v30  ;;  %v1875_v18 = vmul.f32 %v1874_v36, %v3362_v1  ;;  %v1983_v44 = vld [vmem:[#allocation2 + $0x72] sm:$0xff]  ;;  %v1958_v55 = vld [vmem:[#allocation2 + $0x67] sm:$0xff] }
 0x38e   : > { %1891 = vrot.lane.b32.xlu1 %v1886_v37, %s3573_s1  ;;  %v1853_v35 = vadd.f32 %v1851_v29, %v1845_v33  ;;  %v1960_v6 = vstv %s3481_s23  ;;  %v1954_v9 = vmul.f32 %v1952_v59, %v1951_v31  ;;  %v1921_v25 = vmul.f32 %v1920_v2, %v1918_v46 }
 0x38f   : > { %v1932_v5 = vadd.f32 %v1930_v22, %v1924_v15  ;;  %v1907_v4 = vadd.f32 %v1905_v3, %v1899_v14  ;;  %v1883_v60 = vmul.f32 %v1882_v42, %v3371_v8  ;;  %v1968_v13 = vstv %s3489_s11  ;;  %v1950_v8 = vld [vmem:[#allocation2 + $0x66] sm:$0xff] }
 0x390   : > { %v1861_v21 = vadd.f32 %v1859_v53, %v1853_v35  ;;  %v1962_v40 = vmul.f32 %v1960_v6, %v1959_v24  ;;  %v1929_v1 = vmul.f32 %v1928_v58, %v1926_v54  ;;  %v1976_v39 = vstv %s3494_s30 }
 0x391   : > { %v1940_v20 = vadd.f32 %v1938_v51, %v1932_v5  ;;  %v1915_v19 = vadd.f32 %v1913_v10, %v1907_v4  ;;  %v1970_v45 = vmul.f32 %v1968_v13, %v1967_v16  ;;  %v1937_v2 = vmul.f32 %v1936_v61, %v1934_v0 }
 0x392   : > { %v1869_v12 = vadd.f32 %v1867_v63, %v1861_v21  ;;  %v1984_v43 = vstv %s3501_s0  ;;  %v1978_v32 = vmul.f32 %v1976_v39, %v1975_v17  ;;  %v1945_v57 = vmul.f32 %v1944_v62, %v1942_v41 }
 0x393   : > { %v1948_v7 = vadd.f32 %v1946_v26, %v1940_v20  ;;  %v1923_v14 = vadd.f32 %v1921_v25, %v1915_v19  ;;  %v1986_v23 = vmul.f32 %v1984_v43, %v1983_v44  ;;  %v1953_v29 = vmul.f32 %v1952_v59, %v1950_v8 }
 0x394   : > { %v1877_v36 = vadd.f32 %v1875_v18, %v1869_v12  ;;  %v1961_v22 = vmul.f32 %v1960_v6, %v1958_v55  ;;  %v1969_v33 = vmul.f32 %v1968_v13, %v3457_v11  ;;  %v1977_v50 = vmul.f32 %v1976_v39, %v3466_v28 }
 0x395   : > { %v1956_v56 = vadd.f32 %v1954_v9, %v1948_v7  ;;  %v1931_v34 = vadd.f32 %v1929_v1, %v1923_v14  ;;  %v1985_v49 = vmul.f32 %v1984_v43, %v3470_v38 }
 0x396   : > { %v1885_v48 = vadd.f32 %v1883_v60, %v1877_v36 }
 0x397   : > { %v1964_v42 = vadd.f32 %v1962_v40, %v1956_v56  ;;  %v1939_v27 = vadd.f32 %v1937_v2, %v1931_v34 }
 0x398   : > { %1889 = vrot.lane.b32.xlu0 %v1885_v48, %s3573_s1 }
 0x399   : > { %v1972_v58 = vadd.f32 %v1970_v45, %v1964_v42  ;;  %v1947_v52 = vadd.f32 %v1945_v57, %v1939_v27 }
 0x39b   : > { %v1980_v47 = vadd.f32 %v1978_v32, %v1972_v58  ;;  %v1955_v37 = vadd.f32 %v1953_v29, %v1947_v52 }
 0x39d   : > { %v1988_v61 = vadd.f32 %v1986_v23, %v1980_v47  ;;  %v1963_v53 = vadd.f32 %v1961_v22, %v1955_v37 }
 0x39f   : > { %1993 = vrot.lane.b32.xlu1 %v1988_v61, %s3573_s1  ;;  %v1971_v62 = vadd.f32 %v1969_v33, %v1963_v53 }
 0x3a1   : > { %v1979_v30 = vadd.f32 %v1977_v50, %v1971_v62 }
 0x3a3   : > { %v1987_v15 = vadd.f32 %v1985_v49, %v1979_v30 }
 0x3a5   : > { %1991 = vrot.lane.b32.xlu0 %v1987_v15, %s3573_s1 }
 0x3eb   : > { %v1788_v51 = vpop.permute.xlu1 %1787 }
 0x3ec   : > { %2308 = vst.msk [vmem:[%s2809_s8 + $0x10] sm:$0xff] %vm1691_vm5, %v1788_v51 }
 0x3f4   : > { %v1686_v11 = vpop.permute.xlu0 %1685 }
 0x3f5   : > { %1692 = vst.msk [vmem:[%s2809_s8] sm:$0xff] %vm1691_vm5, %v1686_v11 }
 0x3f9   : > { %v1790_v35 = vpop.permute.xlu1 %1789 }
 0x3fa   : > { %2309 = vst.msk [vmem:[%s2809_s8 + $0x18] sm:$0xff] %vm1691_vm5, %v1790_v35 }
 0x3fb   : > { %v1688_v28 = vpop.permute.xlu0 %1687 }
 0x3fc   : > { %1693 = vst.msk [vmem:[%s2809_s8 + $0x8] sm:$0xff] %vm1691_vm5, %v1688_v28 }
 0x400   : > { %v1892_v38 = vpop.permute.xlu1 %1891 }
 0x401   : > { %2323 = vst.msk [vmem:[%s2809_s8 + $0x28] sm:$0xff] %vm1691_vm5, %v1892_v38 }
 0x40a   : > { %v1890_v63 = vpop.permute.xlu0 %1889 }
 0x40b   : > { %2322 = vst.msk [vmem:[%s2809_s8 + $0x20] sm:$0xff] %vm1691_vm5, %v1890_v63 }
 0x411   : > { %v1994_v31 = vpop.permute.xlu1 %1993 }
 0x412   : > { %2337 = vst.msk [vmem:[%s2809_s8 + $0x38] sm:$0xff] %vm1691_vm5, %v1994_v31 }
 0x417   : > { %v1992_v59 = vpop.permute.xlu0 %1991 }
 0x418   : > { %2336 = vst.msk [vmem:[%s2809_s8 + $0x30] sm:$0xff] %vm1691_vm5, %v1992_v59 }
 0x419 PF: > { %s21_s28 = sadd.s32 1, %s2605_s28   ;;  %s3574_s24 = smov %s2597_s26 }
 0x41a   : > { %p18_p8 = scmp.ge.s32.totalorder %s21_s28, 8   ;;  %s3575_s25 = smov %s2601_s27 }
 0x41b   : > { %s3576_s26 = smov %s3579_s21  ;;  %s3577_s27 = smov %s3583_s22 }
 0x41c   :  { %20 = sbr.rel (!%p18_p8) target bundleno = 9 (0x9), region = 133 }
 0x423   :  { %2035 = vsyncpa [#allocation4], 1 }
 0x424   :  { %2037 = vsyncpa [#allocation4 + $0x1], 1 }
 0x425   :  { %2038 = vsyncpa [#allocation6], 1 }
 0x426   :  { %2039 = vsyncpa [#allocation9], 1 }
 0x427   :  { %2040 = vsyncpa [#allocation12], 1 }

</bundles_post_ra>
